<compile_context>
chip_gen: v7x
topology: tpu7x:2x2x1
jax: 0.10.0
libtpu: 0.0.40
codegen_flags: <defaults>
</compile_context>

<pallas_src>
import functools

import jax
import jax.numpy as jnp
from jax import lax
from jax.experimental import pallas as pl
from jax.experimental.pallas import tpu as pltpu


def _decoder_kernel(win0_ref, henc_ref, h0_ref, c0_ref,
                    w_win_ref, w_enc_ref, w_hh_ref, b_ref,
                    w_fp_ref, bfp_ref,
                    out_ref, hT_ref, cT_ref,
                    *, time_steps, dof, hidden, unroll):
    """Whole autoregressive decode in one kernel invocation.

    win0_ref : (B, dof*lookback)   initial lookback window (previous_out)
    henc_ref : (B, 2*He)           concat(h_enc[0], h_enc[1]) -- constant over time
    h0_ref   : (B, H)  c0_ref: (B, H)   decoder start states
    w_win_ref: (dof*lookback, 4H)  = W_ih[:, :dof*lookback]^T
    w_enc_ref: (2*He, 4H)          = W_ih[:, dof*lookback:]^T
    w_hh_ref : (H, 4H)             = W_hh^T
    b_ref    : (1, 4H)             = b_ih + b_hh
    w_fp_ref : (H, dof)  bfp_ref: (1, dof)   final_projection
    out_ref  : (T, B, dof)   per-step decoder outputs (time-major)
    hT_ref / cT_ref : (B, H) final hidden / cell (written once)
    """
    H = hidden

    # Hoisted, loop-invariant part of the input projection:
    # the encoder hidden states are re-concatenated into the LSTM input at every
    # timestep in the PyTorch code, so their gate contribution (plus both biases)
    # is one matmul here instead of T tiny matmuls inside the recurrence.
    gates_const = (jnp.dot(henc_ref[...], w_enc_ref[...],
                           preferred_element_type=jnp.float32)
                   + b_ref[...])                                   # (B, 4H)

    # Load weights once; they stay loop-invariant values across the (unrolled) loop.
    w_win = w_win_ref[...]          # (dof*lookback, 4H)
    w_hh = w_hh_ref[...]            # (H, 4H)
    w_fp = w_fp_ref[...]            # (H, dof)
    b_fp = bfp_ref[...]             # (1, dof)

    def step(t, carry):
        win, h, c = carry
        gates = (jnp.dot(win, w_win, preferred_element_type=jnp.float32)
                 + jnp.dot(h, w_hh, preferred_element_type=jnp.float32)
                 + gates_const)                                    # (B, 4H)

        # PyTorch LSTMCell gate order i, f, g, o.  With H a multiple of 128 these
        # slices are lane-tile aligned (no XLU shuffles).
        i = jax.nn.sigmoid(gates[:, 0 * H:1 * H])
        f = jax.nn.sigmoid(gates[:, 1 * H:2 * H])
        g = jnp.tanh(gates[:, 2 * H:3 * H])
        o = jax.nn.sigmoid(gates[:, 3 * H:4 * H])

        c_new = f * c + i * g
        h_new = o * jnp.tanh(c_new)

        # final_projection -> this step's decoder output
        y = (jnp.dot(h_new, w_fp, preferred_element_type=jnp.float32)
             + b_fp)                                               # (B, dof)
        out_ref[t] = y.astype(out_ref.dtype)

        # Slide the lookback window: drop oldest dof entries, append y_t.
        win_new = jnp.concatenate([win[:, dof:], y], axis=1)
        return (win_new, h_new, c_new)

    carry0 = (win0_ref[...], h0_ref[...], c0_ref[...])
    _, h_fin, c_fin = lax.fori_loop(0, time_steps, step, carry0, unroll=unroll)

    # Final states written exactly once (not every timestep).
    hT_ref[...] = h_fin
    cT_ref[...] = c_fin


def _run_decoder(win0, henc_flat, h0, c0, w_win_t, w_enc_t, w_hh_t, bias,
                 w_fp_t, b_fp, time_steps):
    B, H = h0.shape
    dof = w_fp_t.shape[1]
    unroll = True if time_steps <= 32 else 8

    kernel = functools.partial(_decoder_kernel, time_steps=time_steps,
                               dof=dof, hidden=H, unroll=unroll)
    vmem = lambda: pl.BlockSpec(memory_space=pltpu.MemorySpace.VMEM)

    out, hT, cT = pl.pallas_call(
        kernel,
        out_shape=(jax.ShapeDtypeStruct((time_steps, B, dof), jnp.float32),
                   jax.ShapeDtypeStruct((B, H), jnp.float32),
                   jax.ShapeDtypeStruct((B, H), jnp.float32)),
        in_specs=[vmem() for _ in range(10)],
        out_specs=(vmem(), vmem(), vmem()),
    )(win0, henc_flat, h0, c0, w_win_t, w_enc_t, w_hh_t, bias, w_fp_t, b_fp)
    return out, hT, cT


def init_params(key, dof, dec_dim=64, bidirectional_encoder=True, lookback=4):
    """Shapes matching LSTMDecoder(dof, dec_dim=64, dec_layers=1, bidirectional_encoder=True)."""
    H = dec_dim * 2 if bidirectional_encoder else dec_dim
    in_size = dof * lookback + H
    k_lstm = 1.0 / jnp.sqrt(jnp.float32(H))   # nn.LSTMCell: U(-1/sqrt(H), 1/sqrt(H))
    k_fp = 1.0 / jnp.sqrt(jnp.float32(H))     # nn.Linear(H, dof)
    keys = jax.random.split(key, 6)
    u = lambda kk, shape, b: jax.random.uniform(kk, shape, jnp.float32, -b, b)
    return {
        "w_ih": u(keys[0], (4 * H, in_size), k_lstm),
        "w_hh": u(keys[1], (4 * H, H), k_lstm),
        "b_ih": u(keys[2], (4 * H,), k_lstm),
        "b_hh": u(keys[3], (4 * H,), k_lstm),
        "w_fp": u(keys[4], (dof, H), k_fp),
        "b_fp": u(keys[5], (dof,), k_fp),
    }


@functools.partial(jax.jit, static_argnames=("time_step",))
def lstm_decoder_forward(params, tgt_seq, unpacked_out_enc, hidd_stat_enc,
                         cell_stat_enc, previous_out, init_key, *, time_step):
    """Equivalent of LSTMDecoder.forward (eval mode, dropout_prob=0, dec_layers=1)."""
    dof = params["w_fp"].shape[0]
    H = params["w_hh"].shape[1]                       # 2*dec_dim (bidirectional encoder)
    assert dof == tgt_seq.shape[-1]
    B = tgt_seq.shape[0]
    del unpacked_out_enc, cell_stat_enc               # only dtype/shape used in PyTorch forward
    # TODO(synk): F.dropout with p=dropout_prob in training mode not implemented (eval / p=0).
    # TODO(synk): only dec_layers=1 (the module default) is implemented.

    # In PyTorch, _init_state's encoder-derived states are immediately overwritten
    # in-place by nn.init.orthogonal_, so the decoder starts from random
    # (semi-)orthogonal matrices.
    # TODO(synk): PyTorch draws these from the torch global RNG every call; here they
    # come deterministically from `init_key`.
    ortho = jax.nn.initializers.orthogonal()
    k_h, k_c = jax.random.split(init_key)
    h0 = ortho(k_h, (B, H), jnp.float32)
    c0 = ortho(k_c, (B, H), jnp.float32)

    henc_flat = jnp.concatenate([hidd_stat_enc[0], hidd_stat_enc[1]], axis=1)  # (B, 2*He)
    win_size = params["w_ih"].shape[1] - henc_flat.shape[1]                    # dof*lookback
    win0 = previous_out.reshape(B, win_size)

    w_win_t = params["w_ih"][:, :win_size].T          # (dof*lookback, 4H)
    w_enc_t = params["w_ih"][:, win_size:].T          # (2*He, 4H)
    w_hh_t = params["w_hh"].T                         # (H, 4H)
    bias = (params["b_ih"] + params["b_hh"])[None, :] # (1, 4H)
    w_fp_t = params["w_fp"].T                         # (H, dof)
    b_fp = params["b_fp"][None, :]                    # (1, dof)

    out_tbd, hT, cT = _run_decoder(win0, henc_flat, h0, c0,
                                   w_win_t, w_enc_t, w_hh_t, bias,
                                   w_fp_t, b_fp, time_step)

    outputs = jnp.transpose(out_tbd, (1, 0, 2))       # (B, time_step, dof)
    hidden = hT[None]                                 # (dec_layers=1, B, H)
    cell = cT[None]
    # NOTE: for time_step==1 the PyTorch code returns (B, 2, dof) with a trailing
    # zero column; for time_step>=2 shapes match exactly.
    return outputs, hidden, cell


if __name__ == "__main__":
    # Small shapes consistent with the module defaults:
    # dec_dim=64 (-> decoder hidden 128), out_dim_enc=64, lookback=4, dec_layers=1.
    B = 2
    dof = 8
    dec_dim = 64
    enc_hidden = 64          # per-direction encoder hidden; 2*64 == dec_dim*2
    out_dim_enc = 64
    lookback = 4
    T_dec = 8                # time_step
    T_enc = 8

    key = jax.random.PRNGKey(0)
    k_par, k_tgt, k_enc, k_h, k_c, k_prev, k_init = jax.random.split(key, 7)

    params = init_params(k_par, dof, dec_dim=dec_dim)

    tgt_seq = jax.random.normal(k_tgt, (B, T_dec, dof), jnp.float32)
    unpacked_out_enc = jax.random.normal(k_enc, (B, T_enc, out_dim_enc), jnp.float32)
    hidd_stat_enc = jax.random.normal(k_h, (2, B, enc_hidden), jnp.float32)
    cell_stat_enc = jax.random.normal(k_c, (2, B, enc_hidden), jnp.float32)
    previous_out = jax.random.normal(k_prev, (B, lookback, dof), jnp.float32)

    outputs, hidden, cell = lstm_decoder_forward(
        params, tgt_seq, unpacked_out_enc, hidd_stat_enc, cell_stat_enc,
        previous_out, k_init, time_step=T_dec)
    jax.block_until_ready((outputs, hidden, cell))

    assert outputs.shape == (B, T_dec, dof)
    assert hidden.shape == (1, B, 2 * dec_dim)
    assert cell.shape == (1, B, 2 * dec_dim)
    print("KERNEL_OK")
</pallas_src>

<mosaic_0001>
module attributes {stable_mosaic.version = 11 : i64} {
  func.func @_decoder_kernel(%arg0: memref<2x32xf32, #tpu.memory_space<vmem>>, %arg1: memref<2x128xf32, #tpu.memory_space<vmem>>, %arg2: memref<2x128xf32, #tpu.memory_space<vmem>>, %arg3: memref<2x128xf32, #tpu.memory_space<vmem>>, %arg4: memref<32x512xf32, #tpu.memory_space<vmem>>, %arg5: memref<128x512xf32, #tpu.memory_space<vmem>>, %arg6: memref<128x512xf32, #tpu.memory_space<vmem>>, %arg7: memref<1x512xf32, #tpu.memory_space<vmem>>, %arg8: memref<128x8xf32, #tpu.memory_space<vmem>>, %arg9: memref<1x8xf32, #tpu.memory_space<vmem>>, %arg10: memref<8x2x8xf32, #tpu.memory_space<vmem>>, %arg11: memref<2x128xf32, #tpu.memory_space<vmem>>, %arg12: memref<2x128xf32, #tpu.memory_space<vmem>>) attributes {dimension_semantics = [], scalar_prefetch = 0 : i64, scratch_operands = 0 : i64, tpu.core_type = #tpu.core_type<tc>} {
    %c0 = arith.constant 0 : index
    %c0_0 = arith.constant 0 : index
    %0 = vector.load %arg1[%c0, %c0_0] : memref<2x128xf32, #tpu.memory_space<vmem>>, vector<2x128xf32>
    %c0_1 = arith.constant 0 : index
    %c0_2 = arith.constant 0 : index
    %1 = vector.load %arg5[%c0_1, %c0_2] : memref<128x512xf32, #tpu.memory_space<vmem>>, vector<128x512xf32>
    %cst = arith.constant dense<0.000000e+00> : vector<2x512xf32>
    %2 = tpu.matmul %0, %1, %cst {dimension_numbers = #tpu.dot_dimension_numbers<[1], [0], [0], [1], [0, 0, 1, 1], [], []>} : vector<2x128xf32>, vector<128x512xf32>, vector<2x512xf32> -> vector<2x512xf32>
    %c0_3 = arith.constant 0 : index
    %c0_4 = arith.constant 0 : index
    %3 = vector.load %arg7[%c0_3, %c0_4] : memref<1x512xf32, #tpu.memory_space<vmem>>, vector<1x512xf32>
    %4 = vector.broadcast %3 : vector<1x512xf32> to vector<2x512xf32>
    %5 = arith.addf %2, %4 : vector<2x512xf32>
    %c0_5 = arith.constant 0 : index
    %c0_6 = arith.constant 0 : index
    %6 = vector.load %arg4[%c0_5, %c0_6] : memref<32x512xf32, #tpu.memory_space<vmem>>, vector<32x512xf32>
    %c0_7 = arith.constant 0 : index
    %c0_8 = arith.constant 0 : index
    %7 = vector.load %arg6[%c0_7, %c0_8] : memref<128x512xf32, #tpu.memory_space<vmem>>, vector<128x512xf32>
    %c0_9 = arith.constant 0 : index
    %c0_10 = arith.constant 0 : index
    %8 = vector.load %arg8[%c0_9, %c0_10] : memref<128x8xf32, #tpu.memory_space<vmem>>, vector<128x8xf32>
    %c0_11 = arith.constant 0 : index
    %c0_12 = arith.constant 0 : index
    %9 = vector.load %arg9[%c0_11, %c0_12] : memref<1x8xf32, #tpu.memory_space<vmem>>, vector<1x8xf32>
    %c0_13 = arith.constant 0 : index
    %c0_14 = arith.constant 0 : index
    %10 = vector.load %arg0[%c0_13, %c0_14] : memref<2x32xf32, #tpu.memory_space<vmem>>, vector<2x32xf32>
    %c0_15 = arith.constant 0 : index
    %c0_16 = arith.constant 0 : index
    %11 = vector.load %arg2[%c0_15, %c0_16] : memref<2x128xf32, #tpu.memory_space<vmem>>, vector<2x128xf32>
    %c0_17 = arith.constant 0 : index
    %c0_18 = arith.constant 0 : index
    %12 = vector.load %arg3[%c0_17, %c0_18] : memref<2x128xf32, #tpu.memory_space<vmem>>, vector<2x128xf32>
    %c0_i32 = arith.constant 0 : i32
    %cst_19 = arith.constant dense<0.000000e+00> : vector<2x512xf32>
    %13 = tpu.matmul %10, %6, %cst_19 {dimension_numbers = #tpu.dot_dimension_numbers<[1], [0], [0], [1], [0, 0, 1, 1], [], []>} : vector<2x32xf32>, vector<32x512xf32>, vector<2x512xf32> -> vector<2x512xf32>
    %cst_20 = arith.constant dense<0.000000e+00> : vector<2x512xf32>
    %14 = tpu.matmul %11, %7, %cst_20 {dimension_numbers = #tpu.dot_dimension_numbers<[1], [0], [0], [1], [0, 0, 1, 1], [], []>} : vector<2x128xf32>, vector<128x512xf32>, vector<2x512xf32> -> vector<2x512xf32>
    %15 = arith.addf %13, %14 : vector<2x512xf32>
    %16 = arith.addf %15, %5 : vector<2x512xf32>
    %17 = vector.extract_strided_slice %16 {offsets = [0, 0], sizes = [2, 128], strides = [1, 1]} : vector<2x512xf32> to vector<2x128xf32>
    %18 = arith.negf %17 : vector<2x128xf32>
    %19 = math.exp %18 : vector<2x128xf32>
    %cst_21 = arith.constant 1.000000e+00 : f32
    %20 = vector.broadcast %cst_21 : f32 to vector<2x128xf32>
    %21 = arith.addf %20, %19 : vector<2x128xf32>
    %22 = arith.divf %20, %21 : vector<2x128xf32>
    %23 = vector.extract_strided_slice %16 {offsets = [0, 128], sizes = [2, 128], strides = [1, 1]} : vector<2x512xf32> to vector<2x128xf32>
    %24 = arith.negf %23 : vector<2x128xf32>
    %25 = math.exp %24 : vector<2x128xf32>
    %cst_22 = arith.constant 1.000000e+00 : f32
    %26 = vector.broadcast %cst_22 : f32 to vector<2x128xf32>
    %27 = arith.addf %26, %25 : vector<2x128xf32>
    %28 = arith.divf %26, %27 : vector<2x128xf32>
    %29 = vector.extract_strided_slice %16 {offsets = [0, 256], sizes = [2, 128], strides = [1, 1]} : vector<2x512xf32> to vector<2x128xf32>
    %30 = math.tanh %29 : vector<2x128xf32>
    %31 = vector.extract_strided_slice %16 {offsets = [0, 384], sizes = [2, 128], strides = [1, 1]} : vector<2x512xf32> to vector<2x128xf32>
    %32 = arith.negf %31 : vector<2x128xf32>
    %33 = math.exp %32 : vector<2x128xf32>
    %cst_23 = arith.constant 1.000000e+00 : f32
    %34 = vector.broadcast %cst_23 : f32 to vector<2x128xf32>
    %35 = arith.addf %34, %33 : vector<2x128xf32>
    %36 = arith.divf %34, %35 : vector<2x128xf32>
    %37 = arith.mulf %28, %12 : vector<2x128xf32>
    %38 = arith.mulf %22, %30 : vector<2x128xf32>
    %39 = arith.addf %37, %38 : vector<2x128xf32>
    %40 = math.tanh %39 : vector<2x128xf32>
    %41 = arith.mulf %36, %40 : vector<2x128xf32>
    %cst_24 = arith.constant dense<0.000000e+00> : vector<2x8xf32>
    %42 = tpu.matmul %41, %8, %cst_24 {dimension_numbers = #tpu.dot_dimension_numbers<[1], [0], [0], [1], [0, 0, 1, 1], [], []>} : vector<2x128xf32>, vector<128x8xf32>, vector<2x8xf32> -> vector<2x8xf32>
    %43 = vector.broadcast %9 : vector<1x8xf32> to vector<2x8xf32>
    %44 = arith.addf %42, %43 : vector<2x8xf32>
    %45 = arith.index_cast %c0_i32 : i32 to index
    %c0_25 = arith.constant 0 : index
    %c0_26 = arith.constant 0 : index
    %46 = vector.load %arg10[%45, %c0_25, %c0_26] : memref<8x2x8xf32, #tpu.memory_space<vmem>>, vector<1x2x8xf32>
    %47 = vector.shape_cast %46 : vector<1x2x8xf32> to vector<2x8xf32>
    %48 = vector.shape_cast %44 : vector<2x8xf32> to vector<1x2x8xf32>
    tpu.vector_store %arg10[%45, %c0_25, %c0_26], %48 {strides = array<i32>} : memref<8x2x8xf32, #tpu.memory_space<vmem>>, vector<1x2x8xf32>,
    %49 = vector.extract_strided_slice %10 {offsets = [0, 8], sizes = [2, 24], strides = [1, 1]} : vector<2x32xf32> to vector<2x24xf32>
    %50 = tpu.concatenate %49, %44 in 1 : vector<2x24xf32>, vector<2x8xf32> -> vector<2x32xf32>
    %c1_i32 = arith.constant 1 : i32
    %cst_27 = arith.constant dense<0.000000e+00> : vector<2x512xf32>
    %51 = tpu.matmul %50, %6, %cst_27 {dimension_numbers = #tpu.dot_dimension_numbers<[1], [0], [0], [1], [0, 0, 1, 1], [], []>} : vector<2x32xf32>, vector<32x512xf32>, vector<2x512xf32> -> vector<2x512xf32>
    %cst_28 = arith.constant dense<0.000000e+00> : vector<2x512xf32>
    %52 = tpu.matmul %41, %7, %cst_28 {dimension_numbers = #tpu.dot_dimension_numbers<[1], [0], [0], [1], [0, 0, 1, 1], [], []>} : vector<2x128xf32>, vector<128x512xf32>, vector<2x512xf32> -> vector<2x512xf32>
    %53 = arith.addf %51, %52 : vector<2x512xf32>
    %54 = arith.addf %53, %5 : vector<2x512xf32>
    %55 = vector.extract_strided_slice %54 {offsets = [0, 0], sizes = [2, 128], strides = [1, 1]} : vector<2x512xf32> to vector<2x128xf32>
    %56 = arith.negf %55 : vector<2x128xf32>
    %57 = math.exp %56 : vector<2x128xf32>
    %cst_29 = arith.constant 1.000000e+00 : f32
    %58 = vector.broadcast %cst_29 : f32 to vector<2x128xf32>
    %59 = arith.addf %58, %57 : vector<2x128xf32>
    %60 = arith.divf %58, %59 : vector<2x128xf32>
    %61 = vector.extract_strided_slice %54 {offsets = [0, 128], sizes = [2, 128], strides = [1, 1]} : vector<2x512xf32> to vector<2x128xf32>
    %62 = arith.negf %61 : vector<2x128xf32>
    %63 = math.exp %62 : vector<2x128xf32>
    %cst_30 = arith.constant 1.000000e+00 : f32
    %64 = vector.broadcast %cst_30 : f32 to vector<2x128xf32>
    %65 = arith.addf %64, %63 : vector<2x128xf32>
    %66 = arith.divf %64, %65 : vector<2x128xf32>
    %67 = vector.extract_strided_slice %54 {offsets = [0, 256], sizes = [2, 128], strides = [1, 1]} : vector<2x512xf32> to vector<2x128xf32>
    %68 = math.tanh %67 : vector<2x128xf32>
    %69 = vector.extract_strided_slice %54 {offsets = [0, 384], sizes = [2, 128], strides = [1, 1]} : vector<2x512xf32> to vector<2x128xf32>
    %70 = arith.negf %69 : vector<2x128xf32>
    %71 = math.exp %70 : vector<2x128xf32>
    %cst_31 = arith.constant 1.000000e+00 : f32
    %72 = vector.broadcast %cst_31 : f32 to vector<2x128xf32>
    %73 = arith.addf %72, %71 : vector<2x128xf32>
    %74 = arith.divf %72, %73 : vector<2x128xf32>
    %75 = arith.mulf %66, %39 : vector<2x128xf32>
    %76 = arith.mulf %60, %68 : vector<2x128xf32>
    %77 = arith.addf %75, %76 : vector<2x128xf32>
    %78 = math.tanh %77 : vector<2x128xf32>
    %79 = arith.mulf %74, %78 : vector<2x128xf32>
    %cst_32 = arith.constant dense<0.000000e+00> : vector<2x8xf32>
    %80 = tpu.matmul %79, %8, %cst_32 {dimension_numbers = #tpu.dot_dimension_numbers<[1], [0], [0], [1], [0, 0, 1, 1], [], []>} : vector<2x128xf32>, vector<128x8xf32>, vector<2x8xf32> -> vector<2x8xf32>
    %81 = vector.broadcast %9 : vector<1x8xf32> to vector<2x8xf32>
    %82 = arith.addf %80, %81 : vector<2x8xf32>
    %83 = arith.index_cast %c1_i32 : i32 to index
    %c0_33 = arith.constant 0 : index
    %c0_34 = arith.constant 0 : index
    %84 = vector.load %arg10[%83, %c0_33, %c0_34] : memref<8x2x8xf32, #tpu.memory_space<vmem>>, vector<1x2x8xf32>
    %85 = vector.shape_cast %84 : vector<1x2x8xf32> to vector<2x8xf32>
    %86 = vector.shape_cast %82 : vector<2x8xf32> to vector<1x2x8xf32>
    tpu.vector_store %arg10[%83, %c0_33, %c0_34], %86 {strides = array<i32>} : memref<8x2x8xf32, #tpu.memory_space<vmem>>, vector<1x2x8xf32>,
    %87 = vector.extract_strided_slice %50 {offsets = [0, 8], sizes = [2, 24], strides = [1, 1]} : vector<2x32xf32> to vector<2x24xf32>
    %88 = tpu.concatenate %87, %82 in 1 : vector<2x24xf32>, vector<2x8xf32> -> vector<2x32xf32>
    %c2_i32 = arith.constant 2 : i32
    %cst_35 = arith.constant dense<0.000000e+00> : vector<2x512xf32>
    %89 = tpu.matmul %88, %6, %cst_35 {dimension_numbers = #tpu.dot_dimension_numbers<[1], [0], [0], [1], [0, 0, 1, 1], [], []>} : vector<2x32xf32>, vector<32x512xf32>, vector<2x512xf32> -> vector<2x512xf32>
    %cst_36 = arith.constant dense<0.000000e+00> : vector<2x512xf32>
    %90 = tpu.matmul %79, %7, %cst_36 {dimension_numbers = #tpu.dot_dimension_numbers<[1], [0], [0], [1], [0, 0, 1, 1], [], []>} : vector<2x128xf32>, vector<128x512xf32>, vector<2x512xf32> -> vector<2x512xf32>
    %91 = arith.addf %89, %90 : vector<2x512xf32>
    %92 = arith.addf %91, %5 : vector<2x512xf32>
    %93 = vector.extract_strided_slice %92 {offsets = [0, 0], sizes = [2, 128], strides = [1, 1]} : vector<2x512xf32> to vector<2x128xf32>
    %94 = arith.negf %93 : vector<2x128xf32>
    %95 = math.exp %94 : vector<2x128xf32>
    %cst_37 = arith.constant 1.000000e+00 : f32
    %96 = vector.broadcast %cst_37 : f32 to vector<2x128xf32>
    %97 = arith.addf %96, %95 : vector<2x128xf32>
    %98 = arith.divf %96, %97 : vector<2x128xf32>
    %99 = vector.extract_strided_slice %92 {offsets = [0, 128], sizes = [2, 128], strides = [1, 1]} : vector<2x512xf32> to vector<2x128xf32>
    %100 = arith.negf %99 : vector<2x128xf32>
    %101 = math.exp %100 : vector<2x128xf32>
    %cst_38 = arith.constant 1.000000e+00 : f32
    %102 = vector.broadcast %cst_38 : f32 to vector<2x128xf32>
    %103 = arith.addf %102, %101 : vector<2x128xf32>
    %104 = arith.divf %102, %103 : vector<2x128xf32>
    %105 = vector.extract_strided_slice %92 {offsets = [0, 256], sizes = [2, 128], strides = [1, 1]} : vector<2x512xf32> to vector<2x128xf32>
    %106 = math.tanh %105 : vector<2x128xf32>
    %107 = vector.extract_strided_slice %92 {offsets = [0, 384], sizes = [2, 128], strides = [1, 1]} : vector<2x512xf32> to vector<2x128xf32>
    %108 = arith.negf %107 : vector<2x128xf32>
    %109 = math.exp %108 : vector<2x128xf32>
    %cst_39 = arith.constant 1.000000e+00 : f32
    %110 = vector.broadcast %cst_39 : f32 to vector<2x128xf32>
    %111 = arith.addf %110, %109 : vector<2x128xf32>
    %112 = arith.divf %110, %111 : vector<2x128xf32>
    %113 = arith.mulf %104, %77 : vector<2x128xf32>
    %114 = arith.mulf %98, %106 : vector<2x128xf32>
    %115 = arith.addf %113, %114 : vector<2x128xf32>
    %116 = math.tanh %115 : vector<2x128xf32>
    %117 = arith.mulf %112, %116 : vector<2x128xf32>
    %cst_40 = arith.constant dense<0.000000e+00> : vector<2x8xf32>
    %118 = tpu.matmul %117, %8, %cst_40 {dimension_numbers = #tpu.dot_dimension_numbers<[1], [0], [0], [1], [0, 0, 1, 1], [], []>} : vector<2x128xf32>, vector<128x8xf32>, vector<2x8xf32> -> vector<2x8xf32>
    %119 = vector.broadcast %9 : vector<1x8xf32> to vector<2x8xf32>
    %120 = arith.addf %118, %119 : vector<2x8xf32>
    %121 = arith.index_cast %c2_i32 : i32 to index
    %c0_41 = arith.constant 0 : index
    %c0_42 = arith.constant 0 : index
    %122 = vector.load %arg10[%121, %c0_41, %c0_42] : memref<8x2x8xf32, #tpu.memory_space<vmem>>, vector<1x2x8xf32>
    %123 = vector.shape_cast %122 : vector<1x2x8xf32> to vector<2x8xf32>
    %124 = vector.shape_cast %120 : vector<2x8xf32> to vector<1x2x8xf32>
    tpu.vector_store %arg10[%121, %c0_41, %c0_42], %124 {strides = array<i32>} : memref<8x2x8xf32, #tpu.memory_space<vmem>>, vector<1x2x8xf32>,
    %125 = vector.extract_strided_slice %88 {offsets = [0, 8], sizes = [2, 24], strides = [1, 1]} : vector<2x32xf32> to vector<2x24xf32>
    %126 = tpu.concatenate %125, %120 in 1 : vector<2x24xf32>, vector<2x8xf32> -> vector<2x32xf32>
    %c3_i32 = arith.constant 3 : i32
    %cst_43 = arith.constant dense<0.000000e+00> : vector<2x512xf32>
    %127 = tpu.matmul %126, %6, %cst_43 {dimension_numbers = #tpu.dot_dimension_numbers<[1], [0], [0], [1], [0, 0, 1, 1], [], []>} : vector<2x32xf32>, vector<32x512xf32>, vector<2x512xf32> -> vector<2x512xf32>
    %cst_44 = arith.constant dense<0.000000e+00> : vector<2x512xf32>
    %128 = tpu.matmul %117, %7, %cst_44 {dimension_numbers = #tpu.dot_dimension_numbers<[1], [0], [0], [1], [0, 0, 1, 1], [], []>} : vector<2x128xf32>, vector<128x512xf32>, vector<2x512xf32> -> vector<2x512xf32>
    %129 = arith.addf %127, %128 : vector<2x512xf32>
    %130 = arith.addf %129, %5 : vector<2x512xf32>
    %131 = vector.extract_strided_slice %130 {offsets = [0, 0], sizes = [2, 128], strides = [1, 1]} : vector<2x512xf32> to vector<2x128xf32>
    %132 = arith.negf %131 : vector<2x128xf32>
    %133 = math.exp %132 : vector<2x128xf32>
    %cst_45 = arith.constant 1.000000e+00 : f32
    %134 = vector.broadcast %cst_45 : f32 to vector<2x128xf32>
    %135 = arith.addf %134, %133 : vector<2x128xf32>
    %136 = arith.divf %134, %135 : vector<2x128xf32>
    %137 = vector.extract_strided_slice %130 {offsets = [0, 128], sizes = [2, 128], strides = [1, 1]} : vector<2x512xf32> to vector<2x128xf32>
    %138 = arith.negf %137 : vector<2x128xf32>
    %139 = math.exp %138 : vector<2x128xf32>
    %cst_46 = arith.constant 1.000000e+00 : f32
    %140 = vector.broadcast %cst_46 : f32 to vector<2x128xf32>
    %141 = arith.addf %140, %139 : vector<2x128xf32>
    %142 = arith.divf %140, %141 : vector<2x128xf32>
    %143 = vector.extract_strided_slice %130 {offsets = [0, 256], sizes = [2, 128], strides = [1, 1]} : vector<2x512xf32> to vector<2x128xf32>
    %144 = math.tanh %143 : vector<2x128xf32>
    %145 = vector.extract_strided_slice %130 {offsets = [0, 384], sizes = [2, 128], strides = [1, 1]} : vector<2x512xf32> to vector<2x128xf32>
    %146 = arith.negf %145 : vector<2x128xf32>
    %147 = math.exp %146 : vector<2x128xf32>
    %cst_47 = arith.constant 1.000000e+00 : f32
    %148 = vector.broadcast %cst_47 : f32 to vector<2x128xf32>
    %149 = arith.addf %148, %147 : vector<2x128xf32>
    %150 = arith.divf %148, %149 : vector<2x128xf32>
    %151 = arith.mulf %142, %115 : vector<2x128xf32>
    %152 = arith.mulf %136, %144 : vector<2x128xf32>
    %153 = arith.addf %151, %152 : vector<2x128xf32>
    %154 = math.tanh %153 : vector<2x128xf32>
    %155 = arith.mulf %150, %154 : vector<2x128xf32>
    %cst_48 = arith.constant dense<0.000000e+00> : vector<2x8xf32>
    %156 = tpu.matmul %155, %8, %cst_48 {dimension_numbers = #tpu.dot_dimension_numbers<[1], [0], [0], [1], [0, 0, 1, 1], [], []>} : vector<2x128xf32>, vector<128x8xf32>, vector<2x8xf32> -> vector<2x8xf32>
    %157 = vector.broadcast %9 : vector<1x8xf32> to vector<2x8xf32>
    %158 = arith.addf %156, %157 : vector<2x8xf32>
    %159 = arith.index_cast %c3_i32 : i32 to index
    %c0_49 = arith.constant 0 : index
    %c0_50 = arith.constant 0 : index
    %160 = vector.load %arg10[%159, %c0_49, %c0_50] : memref<8x2x8xf32, #tpu.memory_space<vmem>>, vector<1x2x8xf32>
    %161 = vector.shape_cast %160 : vector<1x2x8xf32> to vector<2x8xf32>
    %162 = vector.shape_cast %158 : vector<2x8xf32> to vector<1x2x8xf32>
    tpu.vector_store %arg10[%159, %c0_49, %c0_50], %162 {strides = array<i32>} : memref<8x2x8xf32, #tpu.memory_space<vmem>>, vector<1x2x8xf32>,
    %163 = vector.extract_strided_slice %126 {offsets = [0, 8], sizes = [2, 24], strides = [1, 1]} : vector<2x32xf32> to vector<2x24xf32>
    %164 = tpu.concatenate %163, %158 in 1 : vector<2x24xf32>, vector<2x8xf32> -> vector<2x32xf32>
    %c4_i32 = arith.constant 4 : i32
    %cst_51 = arith.constant dense<0.000000e+00> : vector<2x512xf32>
    %165 = tpu.matmul %164, %6, %cst_51 {dimension_numbers = #tpu.dot_dimension_numbers<[1], [0], [0], [1], [0, 0, 1, 1], [], []>} : vector<2x32xf32>, vector<32x512xf32>, vector<2x512xf32> -> vector<2x512xf32>
    %cst_52 = arith.constant dense<0.000000e+00> : vector<2x512xf32>
    %166 = tpu.matmul %155, %7, %cst_52 {dimension_numbers = #tpu.dot_dimension_numbers<[1], [0], [0], [1], [0, 0, 1, 1], [], []>} : vector<2x128xf32>, vector<128x512xf32>, vector<2x512xf32> -> vector<2x512xf32>
    %167 = arith.addf %165, %166 : vector<2x512xf32>
    %168 = arith.addf %167, %5 : vector<2x512xf32>
    %169 = vector.extract_strided_slice %168 {offsets = [0, 0], sizes = [2, 128], strides = [1, 1]} : vector<2x512xf32> to vector<2x128xf32>
    %170 = arith.negf %169 : vector<2x128xf32>
    %171 = math.exp %170 : vector<2x128xf32>
    %cst_53 = arith.constant 1.000000e+00 : f32
    %172 = vector.broadcast %cst_53 : f32 to vector<2x128xf32>
    %173 = arith.addf %172, %171 : vector<2x128xf32>
    %174 = arith.divf %172, %173 : vector<2x128xf32>
    %175 = vector.extract_strided_slice %168 {offsets = [0, 128], sizes = [2, 128], strides = [1, 1]} : vector<2x512xf32> to vector<2x128xf32>
    %176 = arith.negf %175 : vector<2x128xf32>
    %177 = math.exp %176 : vector<2x128xf32>
    %cst_54 = arith.constant 1.000000e+00 : f32
    %178 = vector.broadcast %cst_54 : f32 to vector<2x128xf32>
    %179 = arith.addf %178, %177 : vector<2x128xf32>
    %180 = arith.divf %178, %179 : vector<2x128xf32>
    %181 = vector.extract_strided_slice %168 {offsets = [0, 256], sizes = [2, 128], strides = [1, 1]} : vector<2x512xf32> to vector<2x128xf32>
    %182 = math.tanh %181 : vector<2x128xf32>
    %183 = vector.extract_strided_slice %168 {offsets = [0, 384], sizes = [2, 128], strides = [1, 1]} : vector<2x512xf32> to vector<2x128xf32>
    %184 = arith.negf %183 : vector<2x128xf32>
    %185 = math.exp %184 : vector<2x128xf32>
    %cst_55 = arith.constant 1.000000e+00 : f32
    %186 = vector.broadcast %cst_55 : f32 to vector<2x128xf32>
    %187 = arith.addf %186, %185 : vector<2x128xf32>
    %188 = arith.divf %186, %187 : vector<2x128xf32>
    %189 = arith.mulf %180, %153 : vector<2x128xf32>
    %190 = arith.mulf %174, %182 : vector<2x128xf32>
    %191 = arith.addf %189, %190 : vector<2x128xf32>
    %192 = math.tanh %191 : vector<2x128xf32>
    %193 = arith.mulf %188, %192 : vector<2x128xf32>
    %cst_56 = arith.constant dense<0.000000e+00> : vector<2x8xf32>
    %194 = tpu.matmul %193, %8, %cst_56 {dimension_numbers = #tpu.dot_dimension_numbers<[1], [0], [0], [1], [0, 0, 1, 1], [], []>} : vector<2x128xf32>, vector<128x8xf32>, vector<2x8xf32> -> vector<2x8xf32>
    %195 = vector.broadcast %9 : vector<1x8xf32> to vector<2x8xf32>
    %196 = arith.addf %194, %195 : vector<2x8xf32>
    %197 = arith.index_cast %c4_i32 : i32 to index
    %c0_57 = arith.constant 0 : index
    %c0_58 = arith.constant 0 : index
    %198 = vector.load %arg10[%197, %c0_57, %c0_58] : memref<8x2x8xf32, #tpu.memory_space<vmem>>, vector<1x2x8xf32>
    %199 = vector.shape_cast %198 : vector<1x2x8xf32> to vector<2x8xf32>
    %200 = vector.shape_cast %196 : vector<2x8xf32> to vector<1x2x8xf32>
    tpu.vector_store %arg10[%197, %c0_57, %c0_58], %200 {strides = array<i32>} : memref<8x2x8xf32, #tpu.memory_space<vmem>>, vector<1x2x8xf32>,
    %201 = vector.extract_strided_slice %164 {offsets = [0, 8], sizes = [2, 24], strides = [1, 1]} : vector<2x32xf32> to vector<2x24xf32>
    %202 = tpu.concatenate %201, %196 in 1 : vector<2x24xf32>, vector<2x8xf32> -> vector<2x32xf32>
    %c5_i32 = arith.constant 5 : i32
    %cst_59 = arith.constant dense<0.000000e+00> : vector<2x512xf32>
    %203 = tpu.matmul %202, %6, %cst_59 {dimension_numbers = #tpu.dot_dimension_numbers<[1], [0], [0], [1], [0, 0, 1, 1], [], []>} : vector<2x32xf32>, vector<32x512xf32>, vector<2x512xf32> -> vector<2x512xf32>
    %cst_60 = arith.constant dense<0.000000e+00> : vector<2x512xf32>
    %204 = tpu.matmul %193, %7, %cst_60 {dimension_numbers = #tpu.dot_dimension_numbers<[1], [0], [0], [1], [0, 0, 1, 1], [], []>} : vector<2x128xf32>, vector<128x512xf32>, vector<2x512xf32> -> vector<2x512xf32>
    %205 = arith.addf %203, %204 : vector<2x512xf32>
    %206 = arith.addf %205, %5 : vector<2x512xf32>
    %207 = vector.extract_strided_slice %206 {offsets = [0, 0], sizes = [2, 128], strides = [1, 1]} : vector<2x512xf32> to vector<2x128xf32>
    %208 = arith.negf %207 : vector<2x128xf32>
    %209 = math.exp %208 : vector<2x128xf32>
    %cst_61 = arith.constant 1.000000e+00 : f32
    %210 = vector.broadcast %cst_61 : f32 to vector<2x128xf32>
    %211 = arith.addf %210, %209 : vector<2x128xf32>
    %212 = arith.divf %210, %211 : vector<2x128xf32>
    %213 = vector.extract_strided_slice %206 {offsets = [0, 128], sizes = [2, 128], strides = [1, 1]} : vector<2x512xf32> to vector<2x128xf32>
    %214 = arith.negf %213 : vector<2x128xf32>
    %215 = math.exp %214 : vector<2x128xf32>
    %cst_62 = arith.constant 1.000000e+00 : f32
    %216 = vector.broadcast %cst_62 : f32 to vector<2x128xf32>
    %217 = arith.addf %216, %215 : vector<2x128xf32>
    %218 = arith.divf %216, %217 : vector<2x128xf32>
    %219 = vector.extract_strided_slice %206 {offsets = [0, 256], sizes = [2, 128], strides = [1, 1]} : vector<2x512xf32> to vector<2x128xf32>
    %220 = math.tanh %219 : vector<2x128xf32>
    %221 = vector.extract_strided_slice %206 {offsets = [0, 384], sizes = [2, 128], strides = [1, 1]} : vector<2x512xf32> to vector<2x128xf32>
    %222 = arith.negf %221 : vector<2x128xf32>
    %223 = math.exp %222 : vector<2x128xf32>
    %cst_63 = arith.constant 1.000000e+00 : f32
    %224 = vector.broadcast %cst_63 : f32 to vector<2x128xf32>
    %225 = arith.addf %224, %223 : vector<2x128xf32>
    %226 = arith.divf %224, %225 : vector<2x128xf32>
    %227 = arith.mulf %218, %191 : vector<2x128xf32>
    %228 = arith.mulf %212, %220 : vector<2x128xf32>
    %229 = arith.addf %227, %228 : vector<2x128xf32>
    %230 = math.tanh %229 : vector<2x128xf32>
    %231 = arith.mulf %226, %230 : vector<2x128xf32>
    %cst_64 = arith.constant dense<0.000000e+00> : vector<2x8xf32>
    %232 = tpu.matmul %231, %8, %cst_64 {dimension_numbers = #tpu.dot_dimension_numbers<[1], [0], [0], [1], [0, 0, 1, 1], [], []>} : vector<2x128xf32>, vector<128x8xf32>, vector<2x8xf32> -> vector<2x8xf32>
    %233 = vector.broadcast %9 : vector<1x8xf32> to vector<2x8xf32>
    %234 = arith.addf %232, %233 : vector<2x8xf32>
    %235 = arith.index_cast %c5_i32 : i32 to index
    %c0_65 = arith.constant 0 : index
    %c0_66 = arith.constant 0 : index
    %236 = vector.load %arg10[%235, %c0_65, %c0_66] : memref<8x2x8xf32, #tpu.memory_space<vmem>>, vector<1x2x8xf32>
    %237 = vector.shape_cast %236 : vector<1x2x8xf32> to vector<2x8xf32>
    %238 = vector.shape_cast %234 : vector<2x8xf32> to vector<1x2x8xf32>
    tpu.vector_store %arg10[%235, %c0_65, %c0_66], %238 {strides = array<i32>} : memref<8x2x8xf32, #tpu.memory_space<vmem>>, vector<1x2x8xf32>,
    %239 = vector.extract_strided_slice %202 {offsets = [0, 8], sizes = [2, 24], strides = [1, 1]} : vector<2x32xf32> to vector<2x24xf32>
    %240 = tpu.concatenate %239, %234 in 1 : vector<2x24xf32>, vector<2x8xf32> -> vector<2x32xf32>
    %c6_i32 = arith.constant 6 : i32
    %cst_67 = arith.constant dense<0.000000e+00> : vector<2x512xf32>
    %241 = tpu.matmul %240, %6, %cst_67 {dimension_numbers = #tpu.dot_dimension_numbers<[1], [0], [0], [1], [0, 0, 1, 1], [], []>} : vector<2x32xf32>, vector<32x512xf32>, vector<2x512xf32> -> vector<2x512xf32>
    %cst_68 = arith.constant dense<0.000000e+00> : vector<2x512xf32>
    %242 = tpu.matmul %231, %7, %cst_68 {dimension_numbers = #tpu.dot_dimension_numbers<[1], [0], [0], [1], [0, 0, 1, 1], [], []>} : vector<2x128xf32>, vector<128x512xf32>, vector<2x512xf32> -> vector<2x512xf32>
    %243 = arith.addf %241, %242 : vector<2x512xf32>
    %244 = arith.addf %243, %5 : vector<2x512xf32>
    %245 = vector.extract_strided_slice %244 {offsets = [0, 0], sizes = [2, 128], strides = [1, 1]} : vector<2x512xf32> to vector<2x128xf32>
    %246 = arith.negf %245 : vector<2x128xf32>
    %247 = math.exp %246 : vector<2x128xf32>
    %cst_69 = arith.constant 1.000000e+00 : f32
    %248 = vector.broadcast %cst_69 : f32 to vector<2x128xf32>
    %249 = arith.addf %248, %247 : vector<2x128xf32>
    %250 = arith.divf %248, %249 : vector<2x128xf32>
    %251 = vector.extract_strided_slice %244 {offsets = [0, 128], sizes = [2, 128], strides = [1, 1]} : vector<2x512xf32> to vector<2x128xf32>
    %252 = arith.negf %251 : vector<2x128xf32>
    %253 = math.exp %252 : vector<2x128xf32>
    %cst_70 = arith.constant 1.000000e+00 : f32
    %254 = vector.broadcast %cst_70 : f32 to vector<2x128xf32>
    %255 = arith.addf %254, %253 : vector<2x128xf32>
    %256 = arith.divf %254, %255 : vector<2x128xf32>
    %257 = vector.extract_strided_slice %244 {offsets = [0, 256], sizes = [2, 128], strides = [1, 1]} : vector<2x512xf32> to vector<2x128xf32>
    %258 = math.tanh %257 : vector<2x128xf32>
    %259 = vector.extract_strided_slice %244 {offsets = [0, 384], sizes = [2, 128], strides = [1, 1]} : vector<2x512xf32> to vector<2x128xf32>
    %260 = arith.negf %259 : vector<2x128xf32>
    %261 = math.exp %260 : vector<2x128xf32>
    %cst_71 = arith.constant 1.000000e+00 : f32
    %262 = vector.broadcast %cst_71 : f32 to vector<2x128xf32>
    %263 = arith.addf %262, %261 : vector<2x128xf32>
    %264 = arith.divf %262, %263 : vector<2x128xf32>
    %265 = arith.mulf %256, %229 : vector<2x128xf32>
    %266 = arith.mulf %250, %258 : vector<2x128xf32>
    %267 = arith.addf %265, %266 : vector<2x128xf32>
    %268 = math.tanh %267 : vector<2x128xf32>
    %269 = arith.mulf %264, %268 : vector<2x128xf32>
    %cst_72 = arith.constant dense<0.000000e+00> : vector<2x8xf32>
    %270 = tpu.matmul %269, %8, %cst_72 {dimension_numbers = #tpu.dot_dimension_numbers<[1], [0], [0], [1], [0, 0, 1, 1], [], []>} : vector<2x128xf32>, vector<128x8xf32>, vector<2x8xf32> -> vector<2x8xf32>
    %271 = vector.broadcast %9 : vector<1x8xf32> to vector<2x8xf32>
    %272 = arith.addf %270, %271 : vector<2x8xf32>
    %273 = arith.index_cast %c6_i32 : i32 to index
    %c0_73 = arith.constant 0 : index
    %c0_74 = arith.constant 0 : index
    %274 = vector.load %arg10[%273, %c0_73, %c0_74] : memref<8x2x8xf32, #tpu.memory_space<vmem>>, vector<1x2x8xf32>
    %275 = vector.shape_cast %274 : vector<1x2x8xf32> to vector<2x8xf32>
    %276 = vector.shape_cast %272 : vector<2x8xf32> to vector<1x2x8xf32>
    tpu.vector_store %arg10[%273, %c0_73, %c0_74], %276 {strides = array<i32>} : memref<8x2x8xf32, #tpu.memory_space<vmem>>, vector<1x2x8xf32>,
    %277 = vector.extract_strided_slice %240 {offsets = [0, 8], sizes = [2, 24], strides = [1, 1]} : vector<2x32xf32> to vector<2x24xf32>
    %278 = tpu.concatenate %277, %272 in 1 : vector<2x24xf32>, vector<2x8xf32> -> vector<2x32xf32>
    %c7_i32 = arith.constant 7 : i32
    %cst_75 = arith.constant dense<0.000000e+00> : vector<2x512xf32>
    %279 = tpu.matmul %278, %6, %cst_75 {dimension_numbers = #tpu.dot_dimension_numbers<[1], [0], [0], [1], [0, 0, 1, 1], [], []>} : vector<2x32xf32>, vector<32x512xf32>, vector<2x512xf32> -> vector<2x512xf32>
    %cst_76 = arith.constant dense<0.000000e+00> : vector<2x512xf32>
    %280 = tpu.matmul %269, %7, %cst_76 {dimension_numbers = #tpu.dot_dimension_numbers<[1], [0], [0], [1], [0, 0, 1, 1], [], []>} : vector<2x128xf32>, vector<128x512xf32>, vector<2x512xf32> -> vector<2x512xf32>
    %281 = arith.addf %279, %280 : vector<2x512xf32>
    %282 = arith.addf %281, %5 : vector<2x512xf32>
    %283 = vector.extract_strided_slice %282 {offsets = [0, 0], sizes = [2, 128], strides = [1, 1]} : vector<2x512xf32> to vector<2x128xf32>
    %284 = arith.negf %283 : vector<2x128xf32>
    %285 = math.exp %284 : vector<2x128xf32>
    %cst_77 = arith.constant 1.000000e+00 : f32
    %286 = vector.broadcast %cst_77 : f32 to vector<2x128xf32>
    %287 = arith.addf %286, %285 : vector<2x128xf32>
    %288 = arith.divf %286, %287 : vector<2x128xf32>
    %289 = vector.extract_strided_slice %282 {offsets = [0, 128], sizes = [2, 128], strides = [1, 1]} : vector<2x512xf32> to vector<2x128xf32>
    %290 = arith.negf %289 : vector<2x128xf32>
    %291 = math.exp %290 : vector<2x128xf32>
    %cst_78 = arith.constant 1.000000e+00 : f32
    %292 = vector.broadcast %cst_78 : f32 to vector<2x128xf32>
    %293 = arith.addf %292, %291 : vector<2x128xf32>
    %294 = arith.divf %292, %293 : vector<2x128xf32>
    %295 = vector.extract_strided_slice %282 {offsets = [0, 256], sizes = [2, 128], strides = [1, 1]} : vector<2x512xf32> to vector<2x128xf32>
    %296 = math.tanh %295 : vector<2x128xf32>
    %297 = vector.extract_strided_slice %282 {offsets = [0, 384], sizes = [2, 128], strides = [1, 1]} : vector<2x512xf32> to vector<2x128xf32>
    %298 = arith.negf %297 : vector<2x128xf32>
    %299 = math.exp %298 : vector<2x128xf32>
    %cst_79 = arith.constant 1.000000e+00 : f32
    %300 = vector.broadcast %cst_79 : f32 to vector<2x128xf32>
    %301 = arith.addf %300, %299 : vector<2x128xf32>
    %302 = arith.divf %300, %301 : vector<2x128xf32>
    %303 = arith.mulf %294, %267 : vector<2x128xf32>
    %304 = arith.mulf %288, %296 : vector<2x128xf32>
    %305 = arith.addf %303, %304 : vector<2x128xf32>
    %306 = math.tanh %305 : vector<2x128xf32>
    %307 = arith.mulf %302, %306 : vector<2x128xf32>
    %cst_80 = arith.constant dense<0.000000e+00> : vector<2x8xf32>
    %308 = tpu.matmul %307, %8, %cst_80 {dimension_numbers = #tpu.dot_dimension_numbers<[1], [0], [0], [1], [0, 0, 1, 1], [], []>} : vector<2x128xf32>, vector<128x8xf32>, vector<2x8xf32> -> vector<2x8xf32>
    %309 = vector.broadcast %9 : vector<1x8xf32> to vector<2x8xf32>
    %310 = arith.addf %308, %309 : vector<2x8xf32>
    %311 = arith.index_cast %c7_i32 : i32 to index
    %c0_81 = arith.constant 0 : index
    %c0_82 = arith.constant 0 : index
    %312 = vector.load %arg10[%311, %c0_81, %c0_82] : memref<8x2x8xf32, #tpu.memory_space<vmem>>, vector<1x2x8xf32>
    %313 = vector.shape_cast %312 : vector<1x2x8xf32> to vector<2x8xf32>
    %314 = vector.shape_cast %310 : vector<2x8xf32> to vector<1x2x8xf32>
    tpu.vector_store %arg10[%311, %c0_81, %c0_82], %314 {strides = array<i32>} : memref<8x2x8xf32, #tpu.memory_space<vmem>>, vector<1x2x8xf32>,
    %315 = vector.extract_strided_slice %278 {offsets = [0, 8], sizes = [2, 24], strides = [1, 1]} : vector<2x32xf32> to vector<2x24xf32>
    %316 = tpu.concatenate %315, %310 in 1 : vector<2x24xf32>, vector<2x8xf32> -> vector<2x32xf32>
    %c8_i32 = arith.constant 8 : i32
    %c0_83 = arith.constant 0 : index
    %c0_84 = arith.constant 0 : index
    %317 = vector.load %arg11[%c0_83, %c0_84] : memref<2x128xf32, #tpu.memory_space<vmem>>, vector<2x128xf32>
    tpu.vector_store %arg11[%c0_83, %c0_84], %307 {strides = array<i32>} : memref<2x128xf32, #tpu.memory_space<vmem>>, vector<2x128xf32>,
    %c0_85 = arith.constant 0 : index
    %c0_86 = arith.constant 0 : index
    %318 = vector.load %arg12[%c0_85, %c0_86] : memref<2x128xf32, #tpu.memory_space<vmem>>, vector<2x128xf32>
    tpu.vector_store %arg12[%c0_85, %c0_86], %305 {strides = array<i32>} : memref<2x128xf32, #tpu.memory_space<vmem>>, vector<2x128xf32>,
    return
  }
}

</mosaic_0001>

<bundles_post_ra>
// kernel: custom-call.11
= control target key start
LH: loop header
LB: loop body
LE: loop exit
PB: predicated region body
PF: predicated region fallthrough
CT: control target
= control target key end

     0   :  { %v1431_v6 = vmov 0.0   ;;  %s1496_s13 = smov 0   ;;  %s2175_s0 = inlined_call_operand.vmem [shape: f32[128,2], index: 0, kind: input, shape index: {}]   ;;  %s2176_s1 = inlined_call_operand.vmem [shape: f32[128,2], index: 1, kind: output, shape index: {0}]   ;;  %s2177_s2 = inlined_call_operand.vmem [shape: f32[2], index: 2, kind: output, shape index: {1}]  }
   0x1   :  { %v61_v0 = vld [vmem:[%s2175_s0] sm:$0xff]  ;;  %v63_v1 = vld [vmem:[%s2175_s0 + $0x8] sm:$0xff]  ;;  %v65_v2 = vld [vmem:[%s2175_s0 + $0x10] sm:$0xff]  ;;  %158 = vst [vmem:[#allocation2] sm:$0x1] %v1431_v6 }
   0x2   :  { %v67_v3 = vld [vmem:[%s2175_s0 + $0x18] sm:$0xff]  ;;  %v69_v4 = vld [vmem:[%s2175_s0 + $0x20] sm:$0xff]  ;;  %v71_v5 = vld [vmem:[%s2175_s0 + $0x28] sm:$0xff]  ;;  %97 = vst [vmem:[#allocation1] sm:$0xff] %v61_v0 }
   0x3   :  { %101 = vst [vmem:[#allocation1 + $0x8] sm:$0xff] %v63_v1  ;;  %105 = vst [vmem:[#allocation1 + $0x10] sm:$0xff] %v65_v2  ;;  %v73_v7 = vld [vmem:[%s2175_s0 + $0x30] sm:$0xff]  ;;  %v75_v8 = vld [vmem:[%s2175_s0 + $0x38] sm:$0xff] }
   0x4   :  { %v77_v9 = vld [vmem:[%s2175_s0 + $0x40] sm:$0xff]  ;;  %109 = vst [vmem:[#allocation1 + $0x18] sm:$0xff] %v67_v3  ;;  %113 = vst [vmem:[#allocation1 + $0x20] sm:$0xff] %v69_v4  ;;  %v79_v10 = vld [vmem:[%s2175_s0 + $0x48] sm:$0xff] }
   0x5   :  { %117 = vst [vmem:[#allocation1 + $0x28] sm:$0xff] %v71_v5  ;;  %v81_v11 = vld [vmem:[%s2175_s0 + $0x50] sm:$0xff]  ;;  %v83_v12 = vld [vmem:[%s2175_s0 + $0x58] sm:$0xff]  ;;  %121 = vst [vmem:[#allocation1 + $0x30] sm:$0xff] %v73_v7 }
   0x6   :  { %125 = vst [vmem:[#allocation1 + $0x38] sm:$0xff] %v75_v8  ;;  %129 = vst [vmem:[#allocation1 + $0x40] sm:$0xff] %v77_v9  ;;  %v85_v13 = vld [vmem:[%s2175_s0 + $0x60] sm:$0xff]  ;;  %v87_v14 = vld [vmem:[%s2175_s0 + $0x68] sm:$0xff] }
   0x7   :  { %v89_v15 = vld [vmem:[%s2175_s0 + $0x70] sm:$0xff]  ;;  %133 = vst [vmem:[#allocation1 + $0x48] sm:$0xff] %v79_v10  ;;  %137 = vst [vmem:[#allocation1 + $0x50] sm:$0xff] %v81_v11  ;;  %v91_v16 = vld [vmem:[%s2175_s0 + $0x78] sm:$0xff] }
   0x8   :  { %141 = vst [vmem:[#allocation1 + $0x58] sm:$0xff] %v83_v12  ;;  %145 = vst [vmem:[#allocation1 + $0x60] sm:$0xff] %v85_v13 }
   0x9   :  { %149 = vst [vmem:[#allocation1 + $0x68] sm:$0xff] %v87_v14  ;;  %153 = vst [vmem:[#allocation1 + $0x70] sm:$0xff] %v89_v15 }
   0xa   :  { %157 = vst [vmem:[#allocation1 + $0x78] sm:$0xff] %v91_v16 }
   0xb LB: > { %v166_v17 = vlaneseq  ;;  %v165_v18 = vld [vmem:[#allocation1] sm:$0xff]  ;;  %v1505_v20 = vstv %s1429_s13  ;;  %v174_v21 = vld [vmem:[#allocation1 + $0x8] sm:$0xff]  ;;  %v184_v23 = vld [vmem:[#allocation1 + $0x10] sm:$0xff]  ;;  %s343_s0 = scalar_lea.vmem [#allocation1], %s1429_s13  ;;  %s1567_s14 = smov [#allocation1]  ;;  %s1429_s13 = sphi %s1496_s13, %s164_s13  }
   0xc   : > { %v194_v25 = vld [vmem:[#allocation1 + $0x18] sm:$0xff]  ;;  %v204_v32 = vld [vmem:[#allocation1 + $0x20] sm:$0xff]  ;;  %v214_v38 = vld [vmem:[#allocation1 + $0x28] sm:$0xff]  ;;  %s671_s15 = scalar_lea.vmem [#allocation4], %s1429_s13  ;;  %s1728_s16 = smov [#allocation1] }
   0xd   : > { %v1502_v19 = vshrl.u32 %v166_v17, 7  ;;  %v224_v43 = vld [vmem:[#allocation1 + $0x30] sm:$0xff]  ;;  %v234_v48 = vld [vmem:[#allocation1 + $0x38] sm:$0xff]  ;;  %v244_v53 = vld [vmem:[#allocation1 + $0x40] sm:$0xff]  ;;  %s1735_s17 = smov [#allocation4] }
   0xe   : > { %v254_v58 = vld [vmem:[#allocation1 + $0x48] sm:$0xff]  ;;  %v264_v63 = vld [vmem:[#allocation1 + $0x50] sm:$0xff] }
   0xf   : > { %vm170_vm0 = vcmp.gt.s32.totalorder %v1502_v19, %v1505_v20  ;;  %v177_v22 = vadd.s32 8, %v1502_v19  ;;  %v187_v24 = vadd.s32 16, %v1502_v19  ;;  %v197_v26 = vadd.s32 24, %v1502_v19  ;;  %v274_v4 = vld [vmem:[#allocation1 + $0x58] sm:$0xff]  ;;  %v284_v9 = vld [vmem:[#allocation1 + $0x60] sm:$0xff] }
  0x10   : > { %v171_v27 = vsel %vm170_vm0, %v165_v18, 0.0  ;;  %v207_v28 = vadd.s32 32, %v1502_v19  ;;  %v217_v29 = vadd.s32 40, %v1502_v19  ;;  %v227_v30 = vadd.s32 48, %v1502_v19  ;;  %v294_v14 = vld [vmem:[#allocation1 + $0x68] sm:$0xff] }
  0x11   : > { %v172_v31 = vmul.f32 %v171_v27, %v171_v27  ;;  %vm179_vm1 = vcmp.gt.s32.totalorder %v177_v22, %v1505_v20  ;;  %vm189_vm2 = vcmp.gt.s32.totalorder %v187_v24, %v1505_v20  ;;  %vm199_vm3 = vcmp.gt.s32.totalorder %v197_v26, %v1505_v20  ;;  %v304_v22 = vld [vmem:[#allocation1 + $0x70] sm:$0xff]  ;;  %v314_v26 = vld [vmem:[#allocation1 + $0x78] sm:$0xff] }
  0x12   : > { %v180_v33 = vsel %vm179_vm1, %v174_v21, 0.0  ;;  %v190_v34 = vsel %vm189_vm2, %v184_v23, 0.0  ;;  %v200_v35 = vsel %vm199_vm3, %v194_v25, 0.0  ;;  %vm209_vm4 = vcmp.gt.s32.totalorder %v207_v28, %v1505_v20 }
  0x13   : > { %v181_v36 = vmul.f32 %v180_v33, %v180_v33  ;;  %v191_v37 = vmul.f32 %v190_v34, %v190_v34  ;;  %v210_v39 = vsel %vm209_vm4, %v204_v32, 0.0  ;;  %vm219_vm5 = vcmp.gt.s32.totalorder %v217_v29, %v1505_v20 }
  0x14   : > { %v237_v40 = vadd.s32 56, %v1502_v19  ;;  %v201_v42 = vmul.f32 %v200_v35, %v200_v35  ;;  %vm229_vm6 = vcmp.gt.s32.totalorder %v227_v30, %v1505_v20  ;;  %v247_v44 = vadd.s32 64, %v1502_v19 }
  0x15   : > { %v182_v41 = vadd.f32 %v181_v36, %v172_v31  ;;  %v220_v45 = vsel %vm219_vm5, %v214_v38, 0.0  ;;  %v211_v47 = vmul.f32 %v210_v39, %v210_v39  ;;  %v257_v49 = vadd.s32 72, %v1502_v19 }
  0x16   : > { %vm239_vm7 = vcmp.gt.s32.totalorder %v237_v40, %v1505_v20  ;;  %v230_v50 = vsel %vm229_vm6, %v224_v43, 0.0  ;;  %v221_v52 = vmul.f32 %v220_v45, %v220_v45  ;;  %vm249_vm8 = vcmp.gt.s32.totalorder %v247_v44, %v1505_v20  ;;  %v1543_v43 = vld [vmem:[%s343_s0] ss:$0 sm:$0xff] }
  0x17   : > { %v192_v46 = vadd.f32 %v191_v37, %v182_v41  ;;  %v267_v54 = vadd.s32 80, %v1502_v19  ;;  %v240_v55 = vsel %vm239_vm7, %v234_v48, 0.0  ;;  %v231_v57 = vmul.f32 %v230_v50, %v230_v50 }
  0x18   : > { %vm259_vm9 = vcmp.gt.s32.totalorder %v257_v49, %v1505_v20  ;;  %v277_v59 = vadd.s32 88, %v1502_v19  ;;  %v250_v60 = vsel %vm249_vm8, %v244_v53, 0.0  ;;  %v241_v62 = vmul.f32 %v240_v55, %v240_v55 }
  0x19   : > { %v202_v51 = vadd.f32 %v201_v42, %v192_v46  ;;  %vm269_vm10 = vcmp.gt.s32.totalorder %v267_v54, %v1505_v20  ;;  %v287_v0 = vadd.s32 96, %v1502_v19  ;;  %v260_v1 = vsel %vm259_vm9, %v254_v58, 0.0 }
  0x1a   : > { %v251_v3 = vmul.f32 %v250_v60, %v250_v60  ;;  %vm279_vm11 = vcmp.gt.s32.totalorder %v277_v59, %v1505_v20  ;;  %v297_v5 = vadd.s32 104, %v1502_v19  ;;  %v270_v6 = vsel %vm269_vm10, %v264_v63, 0.0 }
  0x1b   : > { %v212_v56 = vadd.f32 %v211_v47, %v202_v51  ;;  %v261_v8 = vmul.f32 %v260_v1, %v260_v1  ;;  %vm289_vm12 = vcmp.gt.s32.totalorder %v287_v0, %v1505_v20  ;;  %v307_v10 = vadd.s32 112, %v1502_v19 }
  0x1c   : > { %v280_v11 = vsel %vm279_vm11, %v274_v4, 0.0  ;;  %v271_v13 = vmul.f32 %v270_v6, %v270_v6  ;;  %vm299_vm13 = vcmp.gt.s32.totalorder %v297_v5, %v1505_v20  ;;  %v317_v15 = vadd.s32 120, %v1502_v19 }
  0x1d   : > { %v222_v61 = vadd.f32 %v221_v52, %v212_v56  ;;  %v290_v16 = vsel %vm289_vm12, %v284_v9, 0.0  ;;  %v281_v21 = vmul.f32 %v280_v11, %v280_v11  ;;  %vm309_vm14 = vcmp.gt.s32.totalorder %v307_v10, %v1505_v20 }
  0x1e   : > { %v300_v23 = vsel %vm299_vm13, %v294_v14, 0.0  ;;  %v291_v25 = vmul.f32 %v290_v16, %v290_v16  ;;  %vm319_vm15 = vcmp.gt.s32.totalorder %v317_v15, %v1505_v20  ;;  %v310_v27 = vsel %vm309_vm14, %v304_v22, 0.0  ;;  %v1314_v15 = vld [vmem:[%s1567_s14 + $0x10] sm:$0xff]  ;;  %v383_v16 = vld [vmem:[%s1567_s14] sm:$0xff]  ;;  %v1317_v22 = vld [vmem:[%s1567_s14 + $0x28] sm:$0xff] }
  0x1f   : > { %v232_v2 = vadd.f32 %v231_v57, %v222_v61  ;;  %v301_v29 = vmul.f32 %v300_v23, %v300_v23  ;;  %v322_v30 = vsel %vm319_vm15, %v314_v26, 0.0  ;;  %v311_v32 = vmul.f32 %v310_v27, %v310_v27  ;;  %v1316_v23 = vld [vmem:[%s1567_s14 + $0x20] sm:$0xff] }
  0x20   : > { %v323_v34 = vmul.f32 %v322_v30, %v322_v30  ;;  %v345_v44 = vand.u32 2147483647, %v1543_v43  ;;  %vm370_vm5 = vcmp.lt.f32.partialorder %v1543_v43, 0.0  ;;  %v1565_v19 = vmov %v1502_v19 }
  0x21   : > { %v242_v7 = vadd.f32 %v241_v62, %v232_v2  ;;  %v419_v9 = vadd.s32 16, %v1565_v19  ;;  %v437_v10 = vadd.s32 24, %v1565_v19  ;;  %v401_v11 = vadd.s32 8, %v1565_v19 }
  0x22   : > { %v346_v49 = vmax.f32 %v345_v44, 0.0  ;;  %v1575_v14 = vand.u32 127, %v166_v17  ;;  %vm386_vm7 = vcmp.gt.s32.totalorder %v1565_v19, %v1505_v20  ;;  %v509_v17 = vadd.s32 56, %v1565_v19 }
  0x23   : > { %v252_v12 = vadd.f32 %v251_v3, %v242_v7  ;;  %vm421_vm6 = vcmp.gt.s32.totalorder %v419_v9, %v1505_v20  ;;  %vm439_vm8 = vcmp.gt.s32.totalorder %v437_v10, %v1505_v20  ;;  %vm403_vm9 = vcmp.gt.s32.totalorder %v401_v11, %v1505_v20 }
  0x24   : > { %v387_v26 = vsel %vm386_vm7, %v383_v16, 0.0  ;;  %vm1594_vm12 = vcmp.eq.s32.totalorder %v1575_v14, %v1505_v20  ;;  %vm511_vm13 = vcmp.gt.s32.totalorder %v509_v17, %v1505_v20 }
  0x25   : > { %v262_v18 = vadd.f32 %v261_v8, %v252_v12  ;;  %v473_v12 = vadd.s32 40, %v1565_v19 }
  0x27   : > { %v272_v24 = vadd.f32 %v271_v13, %v262_v18  ;;  %v455_v13 = vadd.s32 32, %v1565_v19  ;;  %v1315_v18 = vld [vmem:[%s1567_s14 + $0x18] sm:$0xff]  ;;  %vm475_vm10 = vcmp.gt.s32.totalorder %v473_v12, %v1505_v20 }
  0x28   : > { %v440_v27 = vsel %vm439_vm8, %v1315_v18, 0.0  ;;  %v476_v30 = vsel %vm475_vm10, %v1317_v22, 0.0  ;;  %v1325_v18 = vld [vmem:[%s1567_s14 + $0x68] sm:$0xff]  ;;  %v635_v22 = vadd.s32 112, %v1565_v19 }
  0x29   : > { %v282_v28 = vadd.f32 %v281_v21, %v272_v24  ;;  %v1313_v21 = vld [vmem:[%s1567_s14 + $0x8] sm:$0xff]  ;;  %vm457_vm11 = vcmp.gt.s32.totalorder %v455_v13, %v1505_v20  ;;  %v491_v24 = vadd.s32 48, %v1565_v19 }
  0x2b   : > { %v292_v31 = vadd.f32 %v291_v25, %v282_v28  ;;  %v422_v25 = vsel %vm421_vm6, %v1314_v15, 0.0  ;;  %v404_v28 = vsel %vm403_vm9, %v1313_v21, 0.0  ;;  %vm493_vm14 = vcmp.gt.s32.totalorder %v491_v24, %v1505_v20  ;;  %v1324_v21 = vld [vmem:[%s1567_s14 + $0x60] sm:$0xff] }
  0x2c   : > { %vm637_vm9 = vcmp.gt.s32.totalorder %v635_v22, %v1505_v20  ;;  %v1331_v22 = vld [vmem:[%s1728_s16 + $0x10] sm:$0xff] }
  0x2d   : > { %v302_v33 = vadd.f32 %v301_v29, %v292_v31  ;;  %v458_v31 = vsel %vm457_vm11, %v1316_v23, 0.0 }
  0x2f   : > { %v312_v35 = vadd.f32 %v311_v32, %v302_v33  ;;  %v545_v33 = vadd.s32 72, %v1565_v19 }
  0x31   : > { %v324_v36 = vadd.f32 %v323_v34, %v312_v35  ;;  %v527_v34 = vadd.s32 64, %v1565_v19  ;;  %vm547_vm15 = vcmp.gt.s32.totalorder %v545_v33, %v1505_v20 }
  0x33   : > { %v325_v37 = vrot.slane %v324_v36, 4 }
  0x35   : > { %v326_v38 = vadd.f32 %v325_v37, %v324_v36 }
  0x37   : > { %v327_v39 = vrot.slane %v326_v38, 2 }
  0x39   : > { %v328_v40 = vadd.f32 %v327_v39, %v326_v38  ;;  %v1319_v39 = vld [vmem:[%s1567_s14 + $0x38] sm:$0xff] }
  0x3b   : > { %v329_v41 = vrot.slane %v328_v40, 1 }
  0x3d   : > { %v1539_v42 = vadd.f32 %v329_v41, %v328_v40  ;;  %v1318_v40 = vld [vmem:[%s1567_s14 + $0x30] sm:$0xff] }
  0x3f   : > { %1413 = vrsqrt.f32 %v1539_v42  ;;  %vm333_vm0 = vcmp.eq.f32.partialorder %v1539_v42, inf  ;;  %v336_v46 = vand.u32 2147483648, %v1539_v42  ;;  %vm335_vm1 = vcmp.eq.f32.partialorder %v1539_v42, 0.0 }
  0x49   : > { %v1414_v45 = vpop.eup %1413 }
  0x4a   : > { %v332_v47 = vmul.f32 %v1414_v45, %v1539_v42 }
  0x4c   : > { %v334_v48 = vsel %vm333_vm0, %v1539_v42, %v332_v47  ;;  %vm529_vm0 = vcmp.gt.s32.totalorder %v527_v34, %v1505_v20  ;;  %v1326_v34 = vld [vmem:[%s1567_s14 + $0x70] sm:$0xff] }
  0x4d   : > { %v337_v50 = vsel %vm335_vm1, %v336_v46, %v334_v48 }
  0x4e   : > { %v347_v51 = vand.u32 2147483647, %v337_v50 }
  0x50   : > { %v348_v52 = vmax.f32 %v346_v49, %v347_v51 }
  0x52   : > { %1415 = vrcp.f32 %v348_v52  ;;  %vm360_vm4 = vcmp.eq.f32.partialorder %v348_v52, 0.0 }
  0x5c   : > { %v1416_v53 = vpop.eup %1415 }
  0x5d   : > { %v350_v54 = vmul.f32 %v1416_v53, %v345_v44  ;;  %v353_v55 = vmul.f32 0.0, %v1416_v53  ;;  %v357_v56 = vmul.f32 %v1416_v53, %v347_v51  ;;  %v512_v51 = vsel %vm511_vm13, %v1319_v39, 0.0  ;;  %v1321_v53 = vld [vmem:[%s1567_s14 + $0x48] sm:$0xff] }
  0x5f   : > { %v351_v57 = vmul.f32 %v350_v54, %v350_v54  ;;  %v354_v58 = vmul.f32 %v353_v55, %v353_v55  ;;  %v358_v59 = vmul.f32 %v357_v56, %v357_v56  ;;  %v1320_v54 = vld [vmem:[%s1567_s14 + $0x40] sm:$0xff]  ;;  %v581_v55 = vadd.s32 88, %v1565_v19 }
  0x60   : > { %v563_v56 = vadd.s32 80, %v1565_v19 }
  0x61   : > { %v355_v60 = vadd.f32 %v354_v58, %v351_v57 }
  0x63   : > { %v359_v61 = vadd.f32 %v358_v59, %v355_v60 }
  0x65   : > { %1417 = vrsqrt.f32 %v359_v61  ;;  %vm363_vm2 = vcmp.eq.f32.partialorder %v359_v61, inf  ;;  %v366_v63 = vand.u32 2147483648, %v359_v61  ;;  %vm365_vm3 = vcmp.eq.f32.partialorder %v359_v61, 0.0 }
  0x6f   : > { %v1418_v62 = vpop.eup %1417 }
  0x70   : > { %v362_v0 = vmul.f32 %v1418_v62, %v359_v61 }
  0x72   : > { %v364_v1 = vsel %vm363_vm2, %v359_v61, %v362_v0  ;;  %v530_v0 = vsel %vm529_vm0, %v1320_v54, 0.0  ;;  %vm583_vm2 = vcmp.gt.s32.totalorder %v581_v55, %v1505_v20 }
  0x73   : > { %v367_v2 = vsel %vm365_vm3, %v366_v63, %v364_v1  ;;  %v548_v63 = vsel %vm547_vm15, %v1321_v53, 0.0  ;;  %v617_v1 = vadd.s32 104, %v1565_v19  ;;  %vm565_vm3 = vcmp.gt.s32.totalorder %v563_v56, %v1505_v20 }
  0x74   : > { %v368_v3 = vmul.f32 %v367_v2, %v348_v52  ;;  %v494_v52 = vsel %vm493_vm14, %v1318_v40, 0.0  ;;  %v1323_v2 = vld [vmem:[%s1567_s14 + $0x58] sm:$0xff] }
  0x75   : > { %v584_v15 = vsel %vm583_vm2, %v1323_v2, 0.0 }
  0x76   : > { %v369_v4 = vsel %vm360_vm4, 0.0, %v368_v3  ;;  %v1322_v3 = vld [vmem:[%s1567_s14 + $0x50] sm:$0xff]  ;;  %vm619_vm4 = vcmp.gt.s32.totalorder %v617_v1, %v1505_v20 }
  0x77   : > { %v371_v5 = vxor.u32 2147483648, %v369_v4  ;;  %v566_v16 = vsel %vm565_vm3, %v1322_v3, 0.0 }
  0x79   : > { %v1554_v6 = vsel %vm370_vm5, %v369_v4, %v371_v5  ;;  %v599_v4 = vadd.s32 96, %v1565_v19  ;;  %v653_v5 = vadd.s32 120, %v1565_v19  ;;  %v691_v19 = vmov %v1502_v19 }
  0x7a   : > { %v1560_v7 = vsel %vm335_vm1, %v1543_v43, %v1554_v6 }
  0x7b   : > { %v378_v8 = vsub.f32 %v1543_v43, %v1560_v7  ;;  %vm601_vm5 = vcmp.gt.s32.totalorder %v599_v4, %v1505_v20  ;;  %vm655_vm6 = vcmp.gt.s32.totalorder %v653_v5, %v1505_v20  ;;  %vm656_vm7 = vcmp.lt.s32.totalorder %v653_v5, 128 }
  0x7c   : > { %vm1681_vm8 = vmand %vm655_vm6, %vm656_vm7  ;;  %vm1822_vm6 = vcmp.gt.s32.totalorder %v1575_v14, %v1505_v20 }
  0x7d   : > { %1419 = vrcp.f32 %v378_v8 }
  0x7e   : > { %1421 = vrcp.f32 %v1554_v6 }
  0x87   : > { %v1598_v32 = vpop.eup %1419 }
  0x88   : > { %v424_v35 = vmul.f32 %v1598_v32, %v422_v25  ;;  %v389_v36 = vmul.f32 %v1598_v32, %v387_v26  ;;  %v442_v37 = vmul.f32 %v1598_v32, %v440_v27  ;;  %v406_v38 = vmul.f32 %v1598_v32, %v404_v28 }
  0x89   : > { %v478_v41 = vmul.f32 %v1598_v32, %v476_v30  ;;  %v460_v44 = vmul.f32 %v1598_v32, %v458_v31  ;;  %v514_v61 = vmul.f32 %v1598_v32, %v512_v51  ;;  %v496_v62 = vmul.f32 %v1598_v32, %v494_v52  ;;  %v1327_v31 = vld [vmem:[%s1567_s14 + $0x78] sm:$0xff]  ;;  %v1422_v52 = vpop.eup %1421 }
  0x8a   : > { %v425_v45 = vsel %vm335_vm1, 0.0, %v424_v35  ;;  %v390_v46 = vsel %vm335_vm1, 0.0, %v389_v36  ;;  %v443_v47 = vsel %vm335_vm1, 0.0, %v442_v37  ;;  %v407_v48 = vsel %vm335_vm1, 0.0, %v406_v38 }
  0x8b   : > { %v430_v49 = vsel %vm1594_vm12, %v425_v45, 0.0  ;;  %v395_v50 = vsel %vm1594_vm12, %v390_v46, 0.0  ;;  %v448_v57 = vsel %vm1594_vm12, %v443_v47, 0.0  ;;  %v412_v58 = vsel %vm1594_vm12, %v407_v48, 0.0 }
  0x8c   : > { %431 = vadd.xlane.f32.xlu1 %v430_v49  ;;  %396 = vadd.xlane.f32.xlu0 %v395_v50  ;;  %v479_v59 = vsel %vm335_vm1, 0.0, %v478_v41  ;;  %v461_v60 = vsel %vm335_vm1, 0.0, %v460_v44  ;;  %v515_v10 = vsel %vm335_vm1, 0.0, %v514_v61  ;;  %v497_v11 = vsel %vm335_vm1, 0.0, %v496_v62 }
  0x8d   : > { %v484_v8 = vsel %vm1594_vm12, %v479_v59, 0.0  ;;  %v466_v9 = vsel %vm1594_vm12, %v461_v60, 0.0  ;;  %v550_v12 = vmul.f32 %v1598_v32, %v548_v63  ;;  %v532_v13 = vmul.f32 %v1598_v32, %v530_v0 }
  0x8e   : > { %v520_v23 = vsel %vm1594_vm12, %v515_v10, 0.0  ;;  %v502_v17 = vsel %vm1594_vm12, %v497_v11, 0.0  ;;  %v586_v26 = vmul.f32 %v1598_v32, %v584_v15  ;;  %v568_v27 = vmul.f32 %v1598_v32, %v566_v16 }
  0x8f   : > { %v551_v24 = vsel %vm335_vm1, 0.0, %v550_v12  ;;  %v533_v25 = vsel %vm335_vm1, 0.0, %v532_v13  ;;  %v620_v28 = vsel %vm619_vm4, %v1325_v18, 0.0  ;;  %v602_v30 = vsel %vm601_vm5, %v1324_v21, 0.0  ;;  %v684_v13 = vld [vmem:[#allocation2] ss:$0 sm:$0xff] }
  0x90   : > { %449 = vadd.xlane.f32.xlu1 %v448_v57  ;;  %413 = vadd.xlane.f32.xlu0 %v412_v58  ;;  %v556_v35 = vsel %vm1594_vm12, %v551_v24, 0.0  ;;  %v538_v36 = vsel %vm1594_vm12, %v533_v25, 0.0  ;;  %v587_v37 = vsel %vm335_vm1, 0.0, %v586_v26  ;;  %v569_v38 = vsel %vm335_vm1, 0.0, %v568_v27  ;;  %v694_v18 = vld [vmem:[%s1728_s16] sm:$0xff]  ;;  %v1329_v21 = vld [vmem:[%s1728_s16 + $0x8] sm:$0xff] }
  0x91   : > { %v622_v39 = vmul.f32 %v1598_v32, %v620_v28  ;;  %v604_v40 = vmul.f32 %v1598_v32, %v602_v30  ;;  %v658_v41 = vsel %vm1681_vm8, %v1327_v31, 0.0  ;;  %v638_v44 = vsel %vm637_vm9, %v1326_v34, 0.0  ;;  %v1333_v27 = vld [vmem:[%s1728_s16 + $0x18] sm:$0xff]  ;;  %v1335_v34 = vld [vmem:[%s1728_s16 + $0x20] sm:$0xff] }
  0x92   : > { %v592_v45 = vsel %vm1594_vm12, %v587_v37, 0.0  ;;  %v574_v46 = vsel %vm1594_vm12, %v569_v38, 0.0  ;;  %v373_v47 = vsub.f32 %v1554_v6, %v1543_v43  ;;  %v660_v50 = vmul.f32 %v1598_v32, %v658_v41  ;;  %v1337_v37 = vld [vmem:[%s1728_s16 + $0x28] sm:$0xff] }
  0x93   : > { %v623_v48 = vsel %vm335_vm1, 0.0, %v622_v39  ;;  %v605_v49 = vsel %vm335_vm1, 0.0, %v604_v40  ;;  %v640_v51 = vmul.f32 %v1598_v32, %v638_v44  ;;  %v1432_v12 = vmov 1.0   ;;  %v1339_v44 = vld [vmem:[%s1728_s16 + $0x30] sm:$0xff] }
  0x94   : > { %485 = vadd.xlane.f32.xlu1 %v484_v8  ;;  %467 = vadd.xlane.f32.xlu0 %v466_v9  ;;  %v628_v53 = vsel %vm1594_vm12, %v623_v48, 0.0  ;;  %v610_v54 = vsel %vm1594_vm12, %v605_v49, 0.0  ;;  %v661_v43 = vsel %vm335_vm1, 0.0, %v660_v50  ;;  %v375_v55 = vmul.f32 %v1422_v52, %v373_v47  ;;  %v1341_v48 = vld [vmem:[%s1728_s16 + $0x38] sm:$0xff]  ;;  %v1343_v52 = vld [vmem:[%s1728_s16 + $0x40] sm:$0xff] }
  0x95   : > { %v641_v6 = vsel %vm335_vm1, 0.0, %v640_v51  ;;  %v666_v32 = vsel %vm1594_vm12, %v661_v43, 0.0 }
  0x96   : > { %v646_v56 = vsel %vm1594_vm12, %v641_v6, 0.0  ;;  %v377_v57 = vsel %vm335_vm1, 0.0, %v375_v55  ;;  %v1345_v6 = vld [vmem:[%s1728_s16 + $0x48] sm:$0xff] }
  0x97   : > { %v677_v58 = vsel %vm1594_vm12, %v377_v57, 0.0  ;;  %v1347_v57 = vld [vmem:[%s1728_s16 + $0x50] sm:$0xff] }
  0x98   : > { %521 = vadd.xlane.f32.xlu1 %v520_v23  ;;  %503 = vadd.xlane.f32.xlu0 %v502_v17 }
  0x9c   : > { %557 = vadd.xlane.f32.xlu1 %v556_v35  ;;  %539 = vadd.xlane.f32.xlu0 %v538_v36 }
  0xa0   : > { %593 = vadd.xlane.f32.xlu1 %v592_v45  ;;  %575 = vadd.xlane.f32.xlu0 %v574_v46 }
  0xa4   : > { %629 = vadd.xlane.f32.xlu1 %v628_v53  ;;  %611 = vadd.xlane.f32.xlu0 %v610_v54 }
  0xa8   : > { %667 = vadd.xlane.f32.xlu1 %v666_v32  ;;  %647 = vadd.xlane.f32.xlu0 %v646_v56 }
  0xac   : > { %678 = vadd.xlane.f32.xlu0 %v677_v58 }
 0x119   : > { %v432_v59 = vpop.xlane.xlu1 %431  ;;  %v397_v60 = vpop.xlane.xlu0 %396 }
 0x11a   : > { %434 = vst [vmem:[#allocation4 + $0x10] sm:$0xff] %v432_v59  ;;  %398 = vst [vmem:[#allocation4] sm:$0xff] %v397_v60 }
 0x11d   : > { %v450_v61 = vpop.xlane.xlu1 %449  ;;  %v414_v62 = vpop.xlane.xlu0 %413 }
 0x11e   : > { %452 = vst [vmem:[#allocation4 + $0x18] sm:$0xff] %v450_v61  ;;  %416 = vst [vmem:[#allocation4 + $0x8] sm:$0xff] %v414_v62  ;;  %v1349_v61 = vld [vmem:[%s1728_s16 + $0x58] sm:$0xff] }
 0x121   : > { %v486_v63 = vpop.xlane.xlu1 %485  ;;  %v468_v0 = vpop.xlane.xlu0 %467 }
 0x122   : > { %488 = vst [vmem:[#allocation4 + $0x28] sm:$0xff] %v486_v63  ;;  %470 = vst [vmem:[#allocation4 + $0x20] sm:$0xff] %v468_v0 }
 0x125   : > { %v522_v42 = vpop.xlane.xlu1 %521  ;;  %v504_v1 = vpop.xlane.xlu0 %503 }
 0x126   : > { %524 = vst [vmem:[#allocation4 + $0x38] sm:$0xff] %v522_v42  ;;  %506 = vst [vmem:[#allocation4 + $0x30] sm:$0xff] %v504_v1  ;;  %v1351_v42 = vld [vmem:[%s1728_s16 + $0x60] sm:$0xff] }
 0x129   : > { %v558_v2 = vpop.xlane.xlu1 %557  ;;  %v540_v3 = vpop.xlane.xlu0 %539 }
 0x12a   : > { %560 = vst [vmem:[#allocation4 + $0x48] sm:$0xff] %v558_v2  ;;  %542 = vst [vmem:[#allocation4 + $0x40] sm:$0xff] %v540_v3 }
 0x12d   : > { %v594_v4 = vpop.xlane.xlu1 %593  ;;  %v576_v5 = vpop.xlane.xlu0 %575 }
 0x12e   : > { %596 = vst [vmem:[#allocation4 + $0x58] sm:$0xff] %v594_v4  ;;  %578 = vst [vmem:[#allocation4 + $0x50] sm:$0xff] %v576_v5  ;;  %v1353_v4 = vld [vmem:[%s1728_s16 + $0x68] sm:$0xff] }
 0x131   : > { %v630_v8 = vpop.xlane.xlu1 %629  ;;  %v612_v9 = vpop.xlane.xlu0 %611 }
 0x132   : > { %632 = vst [vmem:[#allocation4 + $0x68] sm:$0xff] %v630_v8  ;;  %614 = vst [vmem:[#allocation4 + $0x60] sm:$0xff] %v612_v9  ;;  %v794_v9 = vadd.s32 120, %v691_v19  ;;  %v813_v19 = vmov %v1502_v19 }
 0x133   : > { %vm830_vm10 = vcmp.ge.s32.totalorder %v813_v19, %v1505_v20  ;;  %v1838_v14 = vadd.s32 120, %v813_v19 }
 0x134   : > { %vm800_vm1 = vcmp.lt.s32.totalorder %v794_v9, 128  ;;  %vm1780_vm15 = vmand %vm1594_vm12, %vm830_vm10 }
 0x135   : > { %v668_v10 = vpop.xlane.xlu1 %667  ;;  %v648_v11 = vpop.xlane.xlu0 %647 }
 0x136   : > { %670 = vst [vmem:[#allocation4 + $0x78] sm:$0xff] %v668_v10  ;;  %650 = vst [vmem:[#allocation4 + $0x70] sm:$0xff] %v648_v11  ;;  %v1357_v11 = vld [vmem:[%s1728_s16 + $0x78] sm:$0xff] }
 0x137   : > { %672 = vst [vmem:[%s671_s15] sm:$0x1] %v1432_v12 }
 0x139   : > { %v1730_v15 = vpop.xlane.xlu0 %678 }
 0x13a   : > { %v685_v16 = vsel %vm1594_vm12, %v1730_v15, %v684_v13  ;;  %v1355_v13 = vld [vmem:[%s1728_s16 + $0x70] sm:$0xff]  ;;  %s1776_s16 = smov %s1728_s16 }
 0x13b   : > { %686 = vst [vmem:[#allocation2] sm:$0x1] %v685_v16  ;;  %s1149_s18 = scalar_lea.vmem %s1776_s16, %s1429_s13  ;;  %s164_s13 = sadd.s32 1, %s1429_s13  }
 0x13c   : > { %p161_p0 = scmp.ge.s32.totalorder %s164_s13, 2  }
 0x13e   : > { %v693_v23 = vld [vmem:[%s1735_s17] sm:$0xff]  ;;  %v1328_v17 = vld [vmem:[%s1735_s17 + $0x8] sm:$0xff]  ;;  %v1330_v24 = vld [vmem:[%s1735_s17 + $0x10] sm:$0xff] }
 0x13f   : > { %v695_v25 = vmul.f32 %v694_v18, %v693_v23  ;;  %v701_v26 = vmul.f32 %v1329_v21, %v1328_v17  ;;  %v1332_v28 = vld [vmem:[%s1735_s17 + $0x18] sm:$0xff]  ;;  %v708_v31 = vmul.f32 %v1331_v22, %v1330_v24  ;;  %v1334_v33 = vld [vmem:[%s1735_s17 + $0x20] sm:$0xff]  ;;  %v1336_v40 = vld [vmem:[%s1735_s17 + $0x28] sm:$0xff] }
 0x140   : > { %v715_v35 = vmul.f32 %v1333_v27, %v1332_v28  ;;  %v722_v39 = vmul.f32 %v1335_v34, %v1334_v33  ;;  %v1338_v41 = vld [vmem:[%s1735_s17 + $0x30] sm:$0xff]  ;;  %v729_v46 = vmul.f32 %v1337_v37, %v1336_v40  ;;  %v1340_v47 = vld [vmem:[%s1735_s17 + $0x38] sm:$0xff]  ;;  %v1342_v51 = vld [vmem:[%s1735_s17 + $0x40] sm:$0xff]  ;;  %v834_v27 = vadd.s32 8, %v813_v19 }
 0x141   : > { %v702_v30 = vadd.f32 %v701_v26, %v695_v25  ;;  %v736_v50 = vmul.f32 %v1339_v44, %v1338_v41  ;;  %v743_v54 = vmul.f32 %v1341_v48, %v1340_v47  ;;  %v1344_v43 = vld [vmem:[%s1735_s17 + $0x48] sm:$0xff]  ;;  %v750_v32 = vmul.f32 %v1343_v52, %v1342_v51  ;;  %v1346_v56 = vld [vmem:[%s1735_s17 + $0x50] sm:$0xff]  ;;  %v1348_v60 = vld [vmem:[%s1735_s17 + $0x58] sm:$0xff] }
 0x142   : > { %v757_v59 = vmul.f32 %v1345_v6, %v1344_v43  ;;  %v764_v63 = vmul.f32 %v1347_v57, %v1346_v56  ;;  %v1350_v0 = vld [vmem:[%s1735_s17 + $0x60] sm:$0xff]  ;;  %v771_v2 = vmul.f32 %v1349_v61, %v1348_v60  ;;  %v1352_v3 = vld [vmem:[%s1735_s17 + $0x68] sm:$0xff]  ;;  %v1356_v10 = vld [vmem:[%s1735_s17 + $0x78] sm:$0xff]  ;;  %v897_v34 = vadd.s32 32, %v813_v19 }
 0x143   : > { %v709_v36 = vadd.f32 %v708_v31, %v702_v30  ;;  %v778_v8 = vmul.f32 %v1351_v42, %v1350_v0  ;;  %v1354_v12 = vld [vmem:[%s1735_s17 + $0x70] sm:$0xff]  ;;  %v785_v18 = vmul.f32 %v1353_v4, %v1352_v3  ;;  %v799_v21 = vmul.f32 %v1357_v11, %v1356_v10  ;;  %s1793_s17 = smov %s1735_s17  ;;  %v1359_v6 = vld [vmem:[%s1776_s16 + $0x8] sm:$0xff]  ;;  %v1392_v44 = vld [vmem:[%s1776_s16 + $0x60] sm:$0xff] }
 0x144   : > { %v792_v23 = vmul.f32 %v1355_v13, %v1354_v12  ;;  %v855_v30 = vadd.s32 16, %v813_v19  ;;  %v876_v31 = vadd.s32 24, %v813_v19  ;;  %vm851_vm11 = vcmp.ge.s32.totalorder %v834_v27, %v1505_v20  ;;  %v1841_v57 = vld [vmem:[%s1793_s17] sm:$0xff]  ;;  %v1850_v60 = vld [vmem:[%s1776_s16 + $0x28] sm:$0xff]  ;;  %v1361_v0 = vld [vmem:[%s1793_s17 + $0x10] sm:$0xff] }
 0x145   : > { %v716_v38 = vadd.f32 %v715_v35, %v709_v36  ;;  %v801_v24 = vsel %vm800_vm1, %v799_v21, 0.0  ;;  %v918_v35 = vadd.s32 40, %v813_v19  ;;  %v939_v37 = vadd.s32 48, %v813_v19  ;;  %vm1786_vm0 = vmand %vm1594_vm12, %vm851_vm11  ;;  %v1364_v42 = vld [vmem:[%s1793_s17 + $0x18] sm:$0xff] }
 0x146   : > { %vm872_vm13 = vcmp.ge.s32.totalorder %v855_v30, %v1505_v20  ;;  %vm893_vm14 = vcmp.ge.s32.totalorder %v876_v31, %v1505_v20  ;;  %vm914_vm2 = vcmp.ge.s32.totalorder %v897_v34, %v1505_v20  ;;  %v1801_v47 = vadd.s32 80, %v813_v19  ;;  %v1892_v3 = vld [vmem:[%s1793_s17 + $0x38] sm:$0xff] }
 0x147   : > { %v723_v45 = vadd.f32 %v722_v39, %v716_v38  ;;  %v960_v38 = vadd.s32 56, %v813_v19  ;;  %v981_v39 = vadd.s32 64, %v813_v19  ;;  %vm935_vm3 = vcmp.ge.s32.totalorder %v918_v35, %v1505_v20  ;;  %vm1797_vm4 = vmand %vm1594_vm12, %vm872_vm13 }
 0x148   : > { %v1803_v48 = vadd.s32 88, %v813_v19  ;;  %vm1813_vm5 = vmand %vm1594_vm12, %vm893_vm14  ;;  %vm956_vm8 = vcmp.ge.s32.totalorder %v939_v37, %v1505_v20  ;;  %vm1040_vm13 = vcmp.ge.s32.totalorder %v1801_v47, %v1505_v20  ;;  %v1383_v37 = vld [vmem:[%s1776_s16 + $0x48] sm:$0xff] }
 0x149   : > { %v730_v49 = vadd.f32 %v729_v46, %v723_v45  ;;  %v1002_v45 = vadd.s32 72, %v813_v19  ;;  %vm1833_vm7 = vmand %vm1594_vm12, %vm914_vm2  ;;  %vm977_vm1 = vcmp.ge.s32.totalorder %v960_v38, %v1505_v20  ;;  %vm998_vm10 = vcmp.ge.s32.totalorder %v981_v39, %v1505_v20  ;;  %v1386_v38 = vld [vmem:[%s1776_s16 + $0x50] sm:$0xff]  ;;  %v1395_v46 = vld [vmem:[%s1776_s16 + $0x68] sm:$0xff] }
 0x14a   : > { %vm1856_vm9 = vmand %vm1594_vm12, %vm935_vm3  ;;  %vm1061_vm14 = vcmp.ge.s32.totalorder %v1803_v48, %v1505_v20 }
 0x14b   : > { %v737_v53 = vadd.f32 %v736_v50, %v730_v49  ;;  %v1805_v49 = vadd.s32 96, %v813_v19  ;;  %v1807_v50 = vadd.s32 104, %v813_v19  ;;  %vm1906_vm3 = vmand %vm1594_vm12, %vm956_vm8 }
 0x14c   : > { %vm1924_vm8 = vmand %vm1594_vm12, %vm977_vm1  ;;  %vm2202_vm1 = vcmp.ge.s32.totalorder %v1002_v45, %v1505_v20 }
 0x14d   : > { %v744_v55 = vadd.f32 %v743_v54, %v737_v53  ;;  %v1817_v53 = vadd.s32 112, %v813_v19  ;;  %v820_v54 = vld [vmem:[%s1776_s16] sm:$0xff]  ;;  %v1861_v19 = vld [vmem:[%s1776_s16 + $0x30] sm:$0xff]  ;;  %vm1932_vm11 = vmand %vm1594_vm12, %vm998_vm10 }
 0x14e   : > { %vm1944_vm2 = vmand %vm1594_vm12, %vm2202_vm1 }
 0x14f   : > { %v751_v58 = vadd.f32 %v750_v32, %v744_v55  ;;  %v1362_v55 = vld [vmem:[%s1776_s16 + $0x10] sm:$0xff]  ;;  %v1365_v32 = vld [vmem:[%s1776_s16 + $0x18] sm:$0xff]  ;;  %vm1964_vm10 = vmand %vm1594_vm12, %vm1040_vm13 }
 0x151   : > { %v758_v62 = vadd.f32 %v757_v59, %v751_v58  ;;  %v1844_v58 = vld [vmem:[%s1793_s17 + $0x8] sm:$0xff]  ;;  %v1847_v59 = vld [vmem:[%s1776_s16 + $0x20] sm:$0xff] }
 0x153   : > { %v765_v1 = vadd.f32 %v764_v63, %v758_v62  ;;  %v1864_v62 = vld [vmem:[%s1776_s16 + $0x38] sm:$0xff] }
 0x155   : > { %v772_v5 = vadd.f32 %v771_v2, %v765_v1  ;;  %v1875_v1 = vld [vmem:[%s1793_s17 + $0x20] sm:$0xff]  ;;  %v1886_v2 = vld [vmem:[%s1793_s17 + $0x28] sm:$0xff] }
 0x157   : > { %v779_v16 = vadd.f32 %v778_v8, %v772_v5 }
 0x159   : > { %v786_v22 = vadd.f32 %v785_v18, %v779_v16 }
 0x15b   : > { %v793_v17 = vadd.f32 %v792_v23, %v786_v22 }
 0x15d   : > { %v802_v25 = vadd.f32 %v801_v24, %v793_v17 }
 0x15f   : > { %v803_v26 = vrot.slane %v802_v25, 4 }
 0x161   : > { %v804_v28 = vadd.f32 %v803_v26, %v802_v25 }
 0x163   : > { %v805_v33 = vrot.slane %v804_v28, 2 }
 0x165   : > { %v806_v36 = vadd.f32 %v805_v33, %v804_v28 }
 0x167   : > { %v807_v40 = vrot.slane %v806_v36, 1 }
 0x169   : > { %v808_v51 = vadd.f32 %v807_v40, %v806_v36  ;;  %v1380_v36 = vld [vmem:[%s1776_s16 + $0x40] sm:$0xff]  ;;  %v1389_v40 = vld [vmem:[%s1776_s16 + $0x58] sm:$0xff] }
 0x16b   : > { %v1870_v63 = vmul.f32 %v808_v51, %v1730_v15  ;;  %v1889_v15 = vld [vmem:[%s1793_s17 + $0x30] sm:$0xff] }
 0x16d   : > { %v819_v4 = vmul.f32 %v1841_v57, %v1870_v63  ;;  %v839_v5 = vmul.f32 %v1844_v58, %v1870_v63  ;;  %v860_v8 = vmul.f32 %v1361_v0, %v1870_v63  ;;  %v881_v9 = vmul.f32 %v1364_v42, %v1870_v63 }
 0x16e   : > { %v902_v11 = vmul.f32 %v1875_v1, %v1870_v63  ;;  %v923_v12 = vmul.f32 %v1886_v2, %v1870_v63  ;;  %v944_v13 = vmul.f32 %v1889_v15, %v1870_v63  ;;  %v965_v16 = vmul.f32 %v1892_v3, %v1870_v63 }
 0x16f   : > { %v823_v21 = vsub.f32 %v820_v54, %v819_v4  ;;  %v844_v22 = vsub.f32 %v1359_v6, %v839_v5  ;;  %v865_v23 = vsub.f32 %v1362_v55, %v860_v8  ;;  %v886_v17 = vsub.f32 %v1365_v32, %v881_v9  ;;  %v1388_v4 = vld [vmem:[%s1793_s17 + $0x58] sm:$0xff]  ;;  %v1391_v5 = vld [vmem:[%s1793_s17 + $0x60] sm:$0xff]  ;;  %v1397_v9 = vld [vmem:[%s1793_s17 + $0x70] sm:$0xff] }
 0x170   : > { %v907_v25 = vsub.f32 %v1847_v59, %v902_v11  ;;  %v928_v26 = vsub.f32 %v1850_v60, %v923_v12  ;;  %v949_v27 = vsub.f32 %v1861_v19, %v944_v13  ;;  %v970_v28 = vsub.f32 %v1864_v62, %v965_v16  ;;  %v1400_v11 = vld [vmem:[%s1793_s17 + $0x78] sm:$0xff] }
 0x171   : > { %v824_v31 = vsel %vm1822_vm6, %v823_v21, %v820_v54  ;;  %v845_v33 = vsel %vm1822_vm6, %v844_v22, %v1359_v6  ;;  %v866_v34 = vsel %vm1822_vm6, %v865_v23, %v1362_v55  ;;  %v887_v35 = vsel %vm1822_vm6, %v886_v17, %v1365_v32  ;;  %v1379_v6 = vld [vmem:[%s1793_s17 + $0x40] sm:$0xff]  ;;  %v1382_v55 = vld [vmem:[%s1793_s17 + $0x48] sm:$0xff]  ;;  %v1398_v32 = vld [vmem:[%s1776_s16 + $0x70] sm:$0xff] }
 0x172   : > { %v832_v45 = vsel %vm1780_vm15, %v1841_v57, %v824_v31  ;;  %v853_v51 = vsel %vm1786_vm0, %v1844_v58, %v845_v33  ;;  %v874_v47 = vsel %vm1797_vm4, %v1361_v0, %v866_v34  ;;  %v895_v54 = vsel %vm1813_vm5, %v1364_v42, %v887_v35  ;;  %vm1986_vm15 = vmand %vm1594_vm12, %vm1061_vm14  ;;  %v1401_v57 = vld [vmem:[%s1776_s16 + $0x78] sm:$0xff]  ;;  %v1385_v42 = vld [vmem:[%s1793_s17 + $0x50] sm:$0xff] }
 0x173   : > { %833 = vst [vmem:[%s1776_s16] sm:$0xff] %v832_v45  ;;  %1360 = vst [vmem:[%s1776_s16 + $0x8] sm:$0xff] %v853_v51  ;;  %v908_v48 = vsel %vm1822_vm6, %v907_v25, %v1847_v59  ;;  %v929_v52 = vsel %vm1822_vm6, %v928_v26, %v1850_v60  ;;  %v950_v58 = vsel %vm1822_vm6, %v949_v27, %v1861_v19  ;;  %v1160_v51 = vld [vmem:[#allocation2] sm:$0x1] (%p161_p0) }
 0x174   : > { %1363 = vst [vmem:[%s1776_s16 + $0x10] sm:$0xff] %v874_v47  ;;  %1366 = vst [vmem:[%s1776_s16 + $0x18] sm:$0xff] %v895_v54  ;;  %v971_v0 = vsel %vm1822_vm6, %v970_v28, %v1864_v62  ;;  %v916_v59 = vsel %vm1833_vm7, %v1875_v1, %v908_v48  ;;  %v937_v60 = vsel %vm1856_vm9, %v1886_v2, %v929_v52  ;;  %v1394_v62 = vld [vmem:[%s1793_s17 + $0x68] sm:$0xff] }
 0x175   : > { %v958_v8 = vsel %vm1906_vm3, %v1889_v15, %v950_v58  ;;  %v979_v19 = vsel %vm1924_vm8, %v1892_v3, %v971_v0  ;;  %1369 = vst [vmem:[%s1776_s16 + $0x20] sm:$0xff] %v916_v59  ;;  %1372 = vst [vmem:[%s1776_s16 + $0x28] sm:$0xff] %v937_v60  ;;  %v986_v56 = vmul.f32 %v1379_v6, %v1870_v63 }
 0x176   : > { %1375 = vst [vmem:[%s1776_s16 + $0x30] sm:$0xff] %v958_v8  ;;  %1378 = vst [vmem:[%s1776_s16 + $0x38] sm:$0xff] %v979_v19  ;;  %v1007_v61 = vmul.f32 %v1382_v55, %v1870_v63  ;;  %v1028_v1 = vmul.f32 %v1385_v42, %v1870_v63  ;;  %v1049_v2 = vmul.f32 %v1388_v4, %v1870_v63 }
 0x177   : > { %vm2209_vm0 = vcmp.ge.s32.totalorder %v1805_v49, %v1505_v20  ;;  %v1070_v3 = vmul.f32 %v1391_v5, %v1870_v63  ;;  %v1091_v10 = vmul.f32 %v1394_v62, %v1870_v63  ;;  %v1112_v12 = vmul.f32 %v1397_v9, %v1870_v63  ;;  %1162 = vst [vmem:[#allocation3] sm:$0x1] (%p161_p0), %v1160_v51 }
 0x178   : > { %vm2041_vm4 = vmand %vm1594_vm12, %vm2209_vm0  ;;  %v1133_v13 = vmul.f32 %v1400_v11, %v1870_v63  ;;  %vm2212_vm5 = vcmp.ge.s32.totalorder %v1807_v50, %v1505_v20  ;;  %v991_v16 = vsub.f32 %v1380_v36, %v986_v56  ;;  %v1012_v18 = vsub.f32 %v1383_v37, %v1007_v61 }
 0x179   : > { %vm2054_vm7 = vmand %vm1594_vm12, %vm2212_vm5  ;;  %v1033_v21 = vsub.f32 %v1386_v38, %v1028_v1  ;;  %v1054_v22 = vsub.f32 %v1389_v40, %v1049_v2  ;;  %vm2215_vm9 = vcmp.ge.s32.totalorder %v1817_v53, %v1505_v20  ;;  %v1075_v50 = vsub.f32 %v1392_v44, %v1070_v3 }
 0x17a   : > { %vm2063_vm13 = vmand %vm1594_vm12, %vm2215_vm9  ;;  %v1096_v23 = vsub.f32 %v1395_v46, %v1091_v10  ;;  %v1117_v17 = vsub.f32 %v1398_v32, %v1112_v12  ;;  %v1138_v25 = vsub.f32 %v1401_v57, %v1133_v13  ;;  %vm2218_vm14 = vcmp.ge.s32.totalorder %v1838_v14, %v1505_v20 }
 0x17b   : > { %vm2072_vm3 = vmand %vm1594_vm12, %vm2218_vm14  ;;  %v992_v26 = vsel %vm1822_vm6, %v991_v16, %v1380_v36  ;;  %v1013_v27 = vsel %vm1822_vm6, %v1012_v18, %v1383_v37  ;;  %v1034_v28 = vsel %vm1822_vm6, %v1033_v21, %v1386_v38  ;;  %v1055_v31 = vsel %vm1822_vm6, %v1054_v22, %v1389_v40 }
 0x17c   : > { %v1000_v20 = vsel %vm1932_vm11, %v1379_v6, %v992_v26  ;;  %v1021_v14 = vsel %vm1944_vm2, %v1382_v55, %v1013_v27  ;;  %v1042_v33 = vsel %vm1964_vm10, %v1385_v42, %v1034_v28  ;;  %v1063_v34 = vsel %vm1986_vm15, %v1388_v4, %v1055_v31 }
 0x17d   : > { %1381 = vst [vmem:[%s1776_s16 + $0x40] sm:$0xff] %v1000_v20  ;;  %1384 = vst [vmem:[%s1776_s16 + $0x48] sm:$0xff] %v1021_v14  ;;  %v1076_v24 = vsel %vm1822_vm6, %v1075_v50, %v1392_v44  ;;  %v1097_v30 = vsel %vm1822_vm6, %v1096_v23, %v1395_v46  ;;  %v1118_v35 = vsel %vm1822_vm6, %v1117_v17, %v1398_v32 }
 0x17e   : > { %1387 = vst [vmem:[%s1776_s16 + $0x50] sm:$0xff] %v1042_v33  ;;  %1390 = vst [vmem:[%s1776_s16 + $0x58] sm:$0xff] %v1063_v34  ;;  %v1139_v36 = vsel %vm1822_vm6, %v1138_v25, %v1401_v57  ;;  %v1084_v37 = vsel %vm2041_vm4, %v1391_v5, %v1076_v24  ;;  %v1105_v38 = vsel %vm2054_vm7, %v1394_v62, %v1097_v30  ;;  %v1272_v4 = vld [vmem:[#allocation3] sm:$0x1] (%p161_p0) }
 0x17f   : > { %v1126_v39 = vsel %vm2063_vm13, %v1397_v9, %v1118_v35  ;;  %v1147_v40 = vsel %vm2072_vm3, %v1400_v11, %v1139_v36  ;;  %1393 = vst [vmem:[%s1776_s16 + $0x60] sm:$0xff] %v1084_v37  ;;  %1396 = vst [vmem:[%s1776_s16 + $0x68] sm:$0xff] %v1105_v38 }
 0x180   : > { %1399 = vst [vmem:[%s1776_s16 + $0x70] sm:$0xff] %v1126_v39  ;;  %1402 = vst [vmem:[%s1776_s16 + $0x78] sm:$0xff] %v1147_v40 }
 0x181   :  { %1273 = vst [vmem:[%s2177_s2] sm:$0x1] (%p161_p0), %v1272_v4 }
 0x185   :  { %163 = sbr.rel (!%p161_p0) target bundleno = 11 (0xb), region = 274 }
 0x187   : > { %v1150_v45 = vld [vmem:[%s1149_s18] ss:$0 sm:$0xff] }
 0x188   : > { %v1155_v43 = vsel %vm1594_vm12, %v1560_v7, %v1150_v45 }
 0x189   : > { %1156 = vst [vmem:[%s1149_s18] sm:$0x1] %v1155_v43 }
 0x190   :  { %v1220_v47 = vld [vmem:[#allocation1] sm:$0xff]  ;;  %v1222_v54 = vld [vmem:[#allocation1 + $0x8] sm:$0xff]  ;;  %v1224_v7 = vld [vmem:[#allocation1 + $0x10] sm:$0xff] }
 0x191   :  { %1221 = vst [vmem:[%s2176_s1] sm:$0xff] %v1220_v47  ;;  %1223 = vst [vmem:[%s2176_s1 + $0x8] sm:$0xff] %v1222_v54  ;;  %v1226_v29 = vld [vmem:[#allocation1 + $0x18] sm:$0xff]  ;;  %v1228_v6 = vld [vmem:[#allocation1 + $0x20] sm:$0xff] }
 0x192   :  { %1225 = vst [vmem:[%s2176_s1 + $0x10] sm:$0xff] %v1224_v7  ;;  %1227 = vst [vmem:[%s2176_s1 + $0x18] sm:$0xff] %v1226_v29  ;;  %v1230_v55 = vld [vmem:[#allocation1 + $0x28] sm:$0xff]  ;;  %v1232_v41 = vld [vmem:[#allocation1 + $0x30] sm:$0xff] }
 0x193   :  { %1229 = vst [vmem:[%s2176_s1 + $0x20] sm:$0xff] %v1228_v6  ;;  %v1234_v44 = vld [vmem:[#allocation1 + $0x38] sm:$0xff]  ;;  %1231 = vst [vmem:[%s2176_s1 + $0x28] sm:$0xff] %v1230_v55  ;;  %v1236_v46 = vld [vmem:[#allocation1 + $0x40] sm:$0xff] }
 0x194   :  { %1233 = vst [vmem:[%s2176_s1 + $0x30] sm:$0xff] %v1232_v41  ;;  %1235 = vst [vmem:[%s2176_s1 + $0x38] sm:$0xff] %v1234_v44  ;;  %v1238_v32 = vld [vmem:[#allocation1 + $0x48] sm:$0xff]  ;;  %v1240_v57 = vld [vmem:[#allocation1 + $0x50] sm:$0xff] }
 0x195   :  { %1237 = vst [vmem:[%s2176_s1 + $0x40] sm:$0xff] %v1236_v46  ;;  %1239 = vst [vmem:[%s2176_s1 + $0x48] sm:$0xff] %v1238_v32  ;;  %v1242_v48 = vld [vmem:[#allocation1 + $0x58] sm:$0xff]  ;;  %v1244_v52 = vld [vmem:[#allocation1 + $0x60] sm:$0xff] }
 0x196   :  { %1241 = vst [vmem:[%s2176_s1 + $0x50] sm:$0xff] %v1240_v57  ;;  %v1246_v58 = vld [vmem:[#allocation1 + $0x68] sm:$0xff]  ;;  %1243 = vst [vmem:[%s2176_s1 + $0x58] sm:$0xff] %v1242_v48  ;;  %v1248_v0 = vld [vmem:[#allocation1 + $0x70] sm:$0xff] }
 0x197   :  { %1245 = vst [vmem:[%s2176_s1 + $0x60] sm:$0xff] %v1244_v52  ;;  %1247 = vst [vmem:[%s2176_s1 + $0x68] sm:$0xff] %v1246_v58  ;;  %v1250_v42 = vld [vmem:[#allocation1 + $0x78] sm:$0xff] }
 0x198   :  { %1249 = vst [vmem:[%s2176_s1 + $0x70] sm:$0xff] %v1248_v0  ;;  %1251 = vst [vmem:[%s2176_s1 + $0x78] sm:$0xff] %v1250_v42 }

// kernel: custom-call.12
= control target key start
LH: loop header
LB: loop body
LE: loop exit
PB: predicated region body
PF: predicated region fallthrough
CT: control target
= control target key end

     0   :  { %v68_v1 = vlaneseq  ;;  %vm82_vm1 = vcmask 15360   ;;  %s227_s0 = inlined_call_operand.vmem [shape: f32[2,2], index: 0, kind: input, shape index: {}]   ;;  %s228_s1 = inlined_call_operand.vmem [shape: f32[2,2], index: 1, kind: output, shape index: {}]  }
   0x1   :  { %v62_v0 = vld [vmem:[%s227_s0] sm:$0x3] }
   0x2   :  { %63 = vst [vmem:[#allocation1] sm:$0x3] %v62_v0  ;;  %v69_v3 = vand.u32 127, %v68_v1  ;;  %v71_v4 = vshrl.u32 %v68_v1, 7 }
   0x4   :  { %vm77_vm0 = vcmp.eq.s32.totalorder %v69_v3, 0  ;;  %vm73_vm2 = vcmp.eq.s32.totalorder %v69_v3, %v71_v4  ;;  %vm86_vm3 = vcmp.eq.s32.totalorder %v69_v3, 1 }
   0x9   :  { %v66_v2 = vld [vmem:[#allocation1] sm:$0x3] }
   0xa   :  { %67 = vst [vmem:[#allocation0] sm:$0x3] %v66_v2 }
  0x11   :  { %v74_v5 = vld [vmem:[#allocation0] sm:$0xff] }
  0x12   :  { %v81_v6 = vld [vmem:[#allocation0 + $0x1] ss:$0 sm:$0xff]  ;;  %v78_v7 = vsel %vm77_vm0, %v74_v5, 1.0 }
  0x13   :  { %v83_v8 = vsel %vm82_vm1, %v81_v6, 0.0  ;;  %v79_v9 = vsel %vm73_vm2, %v78_v7, 0.0 }
  0x14   :  { %v87_v10 = vmul.f32 %v83_v8, %v79_v9 }
  0x16   :  { %88 = vadd.xlane.f32.xlu0 %v87_v10 }
  0xa3   :  { %v89_v11 = vpop.xlane.xlu0 %88 }
  0xa4   :  { %v90_v12 = vsel %vm86_vm3, %v89_v11, %v79_v9 }
  0xa5   :  { %91 = vst [vmem:[#allocation2] sm:$0xff] %v90_v12 }
  0xac   :  { %v95_v13 = vld [vmem:[#allocation2] sm:$0x3] }
  0xad   :  { %97 = vst [vmem:[#allocation3] sm:$0x3] %v95_v13 }
  0xb4   :  { %v158_v14 = vld [vmem:[#allocation3] sm:$0x3] }
  0xb5   :  { %159 = vst [vmem:[%s228_s1] sm:$0x3] %v158_v14 }

// kernel: lstm_decoder_forward.3
= control target key start
LH: loop header
LB: loop body
LE: loop exit
PB: predicated region body
PF: predicated region fallthrough
CT: control target
= control target key end

     0   :  { %18 = vsyncpa [#allocation3], 0  ;;  %v6499_v7 = vmov 0.0   ;;  %s6484_s0 = inlined_call_operand.vmem [shape: f32[2,32], index: 0, kind: input, shape index: {}]   ;;  %s6485_s1 = inlined_call_operand.vmem [shape: f32[2,128], index: 1, kind: input, shape index: {}]   ;;  %s6486_s2 = inlined_call_operand.vmem [shape: f32[2,128], index: 2, kind: input, shape index: {}]   ;;  %s6487_s3 = inlined_call_operand.vmem [shape: f32[2,128], index: 3, kind: input, shape index: {}]   ;;  %s6488_s4 = inlined_call_operand.vmem [shape: f32[32,512], index: 4, kind: input, shape index: {}]   ;;  %s6489_s5 = inlined_call_operand.vmem [shape: f32[128,512], index: 5, kind: input, shape index: {}]   ;;  %s6490_s6 = inlined_call_operand.vmem [shape: f32[128,512], index: 6, kind: input, shape index: {}]   ;;  %s6491_s7 = inlined_call_operand.vmem [shape: f32[1,512], index: 7, kind: input, shape index: {}]   ;;  %s6492_s8 = inlined_call_operand.vmem [shape: f32[128,8], index: 8, kind: input, shape index: {}]   ;;  %s6493_s9 = inlined_call_operand.vmem [shape: f32[1,8], index: 9, kind: input, shape index: {}]   ;;  %s6494_s10 = inlined_call_operand.vmem [shape: f32[8,2,8], index: 10, kind: output, shape index: {0}]   ;;  %s6495_s11 = inlined_call_operand.hbm [shape: f32[2,128], index: 11, kind: output, shape index: {1}]   ;;  %s6496_s12 = inlined_call_operand.hbm [shape: f32[2,128], index: 12, kind: output, shape index: {2}]  }
   0x1   :  { %v42_v0 = vld [vmem:[%s6489_s5 + $0x8] sm:$0xff]  ;;  %v44_v2 = vld [vmem:[%s6489_s5 + $0x18] sm:$0xff]  ;;  %v41_v5 = vld [vmem:[%s6489_s5] sm:$0xff]  ;;  %191 = vmatprep.mubr.f32.mxu0 %v6499_v7  ;;  %262 = vmatprep.mubr.f32.mxu1 %v6499_v7 }
   0x2   :  { %v46_v1 = vld [vmem:[%s6489_s5 + $0x28] sm:$0xff]  ;;  %v48_v4 = vld [vmem:[%s6489_s5 + $0x38] sm:$0xff]  ;;  %v45_v6 = vld [vmem:[%s6489_s5 + $0x20] sm:$0xff] }
   0x3   :  { %v4027_v3 = vpack.c.bf16 %v46_v1, %v42_v0  ;;  %v4059_v8 = vpack.c.bf16 %v48_v4, %v44_v2  ;;  %v4029_v9 = vpack.c.bf16 %v45_v6, %v41_v5  ;;  %v43_v10 = vld [vmem:[%s6489_s5 + $0x10] sm:$0xff]  ;;  %v50_v12 = vld [vmem:[%s6489_s5 + $0x48] sm:$0xff]  ;;  %v52_v15 = vld [vmem:[%s6489_s5 + $0x58] sm:$0xff] }
   0x4   :  { %v47_v11 = vld [vmem:[%s6489_s5 + $0x30] sm:$0xff]  ;;  %v54_v14 = vld [vmem:[%s6489_s5 + $0x68] sm:$0xff]  ;;  %v56_v16 = vld [vmem:[%s6489_s5 + $0x78] sm:$0xff] }
   0x5   :  { %4028 = vmatprep.subr.bf16.mxu0 %v4027_v3  ;;  %v4061_v13 = vpack.c.bf16 %v47_v11, %v43_v10  ;;  %4060 = vmatprep.subr.bf16.mxu1 %v4059_v8  ;;  %v4031_v17 = vpack.c.bf16 %v54_v14, %v50_v12  ;;  %v4063_v18 = vpack.c.bf16 %v56_v16, %v52_v15  ;;  %v49_v19 = vld [vmem:[%s6489_s5 + $0x40] sm:$0xff]  ;;  %v51_v21 = vld [vmem:[%s6489_s5 + $0x50] sm:$0xff]  ;;  %v58_v24 = vld [vmem:[%s6489_s5 + $0x88] sm:$0xff] }
   0x6   :  { %4030 = vmatpush1.bf16.msra.mxu0 %v4029_v9  ;;  %v53_v20 = vld [vmem:[%s6489_s5 + $0x60] sm:$0xff]  ;;  %v55_v23 = vld [vmem:[%s6489_s5 + $0x70] sm:$0xff]  ;;  %v62_v25 = vld [vmem:[%s6489_s5 + $0xa8] sm:$0xff] }
   0x7   :  { %4062 = vmatpush1.bf16.msra.mxu1 %v4061_v13  ;;  %v4033_v22 = vpack.c.bf16 %v53_v20, %v49_v19  ;;  %4032 = vmatprep.subr.bf16.mxu0 %v4031_v17  ;;  %v4065_v26 = vpack.c.bf16 %v55_v23, %v51_v21  ;;  %v4035_v27 = vpack.c.bf16 %v62_v25, %v58_v24  ;;  %v60_v28 = vld [vmem:[%s6489_s5 + $0x98] sm:$0xff]  ;;  %v57_v30 = vld [vmem:[%s6489_s5 + $0x80] sm:$0xff]  ;;  %v59_v33 = vld [vmem:[%s6489_s5 + $0x90] sm:$0xff] }
   0x8   :  { %4064 = vmatprep.subr.bf16.mxu1 %v4063_v18  ;;  %v64_v29 = vld [vmem:[%s6489_s5 + $0xb8] sm:$0xff]  ;;  %v61_v32 = vld [vmem:[%s6489_s5 + $0xa0] sm:$0xff]  ;;  %v63_v34 = vld [vmem:[%s6489_s5 + $0xb0] sm:$0xff] }
   0x9   :  { %v4067_v31 = vpack.c.bf16 %v64_v29, %v60_v28  ;;  %v4037_v35 = vpack.c.bf16 %v61_v32, %v57_v30  ;;  %v66_v36 = vld [vmem:[%s6489_s5 + $0xc8] sm:$0xff]  ;;  %v68_v38 = vld [vmem:[%s6489_s5 + $0xd8] sm:$0xff]  ;;  %v4069_v39 = vpack.c.bf16 %v63_v34, %v59_v33  ;;  %v65_v42 = vld [vmem:[%s6489_s5 + $0xc0] sm:$0xff] }
   0xa   :  { %4034 = vmatpush1.bf16.msra.mxu0 %v4033_v22  ;;  %v70_v37 = vld [vmem:[%s6489_s5 + $0xe8] sm:$0xff]  ;;  %v72_v41 = vld [vmem:[%s6489_s5 + $0xf8] sm:$0xff]  ;;  %v69_v43 = vld [vmem:[%s6489_s5 + $0xe0] sm:$0xff] }
   0xb   :  { %4066 = vmatpush1.bf16.msra.mxu1 %v4065_v26  ;;  %4036 = vmatprep.subr.bf16.mxu0 %v4035_v27  ;;  %v4039_v40 = vpack.c.bf16 %v70_v37, %v66_v36  ;;  %v4071_v44 = vpack.c.bf16 %v72_v41, %v68_v38  ;;  %v67_v45 = vld [vmem:[%s6489_s5 + $0xd0] sm:$0xff]  ;;  %v74_v47 = vld [vmem:[%s6489_s5 + $0x108] sm:$0xff]  ;;  %v76_v49 = vld [vmem:[%s6489_s5 + $0x118] sm:$0xff]  ;;  %v4041_v51 = vpack.c.bf16 %v69_v43, %v65_v42 }
   0xc   :  { %4068 = vmatprep.subr.bf16.mxu1 %v4067_v31  ;;  %v71_v46 = vld [vmem:[%s6489_s5 + $0xf0] sm:$0xff]  ;;  %v78_v48 = vld [vmem:[%s6489_s5 + $0x128] sm:$0xff]  ;;  %v80_v50 = vld [vmem:[%s6489_s5 + $0x138] sm:$0xff] }
   0xd   :  { %v4073_v52 = vpack.c.bf16 %v71_v46, %v67_v45  ;;  %v4043_v53 = vpack.c.bf16 %v78_v48, %v74_v47  ;;  %v73_v54 = vld [vmem:[%s6489_s5 + $0x100] sm:$0xff]  ;;  %v75_v56 = vld [vmem:[%s6489_s5 + $0x110] sm:$0xff]  ;;  %v4075_v57 = vpack.c.bf16 %v80_v50, %v76_v49  ;;  %v82_v59 = vld [vmem:[%s6489_s5 + $0x148] sm:$0xff] }
   0xe   :  { %4038 = vmatpush1.bf16.msra.mxu0 %v4037_v35  ;;  %v77_v55 = vld [vmem:[%s6489_s5 + $0x120] sm:$0xff]  ;;  %v79_v58 = vld [vmem:[%s6489_s5 + $0x130] sm:$0xff]  ;;  %v86_v60 = vld [vmem:[%s6489_s5 + $0x168] sm:$0xff] }
   0xf   :  { %4070 = vmatpush1.bf16.msra.mxu1 %v4069_v39  ;;  %4040 = vmatprep.subr.bf16.mxu0 %v4039_v40  ;;  %v84_v61 = vld [vmem:[%s6489_s5 + $0x158] sm:$0xff]  ;;  %v4045_v63 = vpack.c.bf16 %v77_v55, %v73_v54  ;;  %v4077_v0 = vpack.c.bf16 %v79_v58, %v75_v56  ;;  %v4047_v1 = vpack.c.bf16 %v86_v60, %v82_v59  ;;  %v81_v2 = vld [vmem:[%s6489_s5 + $0x140] sm:$0xff]  ;;  %v83_v4 = vld [vmem:[%s6489_s5 + $0x150] sm:$0xff] }
  0x10   :  { %4072 = vmatprep.subr.bf16.mxu1 %v4071_v44  ;;  %v88_v62 = vld [vmem:[%s6489_s5 + $0x178] sm:$0xff]  ;;  %v85_v3 = vld [vmem:[%s6489_s5 + $0x160] sm:$0xff]  ;;  %v87_v6 = vld [vmem:[%s6489_s5 + $0x170] sm:$0xff] }
  0x11   :  { %v4079_v5 = vpack.c.bf16 %v88_v62, %v84_v61  ;;  %v90_v8 = vld [vmem:[%s6489_s5 + $0x188] sm:$0xff]  ;;  %v92_v10 = vld [vmem:[%s6489_s5 + $0x198] sm:$0xff]  ;;  %v4049_v12 = vpack.c.bf16 %v85_v3, %v81_v2  ;;  %v4081_v13 = vpack.c.bf16 %v87_v6, %v83_v4  ;;  %v89_v15 = vld [vmem:[%s6489_s5 + $0x180] sm:$0xff] }
  0x12   :  { %4042 = vmatpush1.bf16.msra.mxu0 %v4041_v51  ;;  %v94_v9 = vld [vmem:[%s6489_s5 + $0x1a8] sm:$0xff]  ;;  %v96_v11 = vld [vmem:[%s6489_s5 + $0x1b8] sm:$0xff]  ;;  %v93_v16 = vld [vmem:[%s6489_s5 + $0x1a0] sm:$0xff] }
  0x13   :  { %4074 = vmatpush1.bf16.msra.mxu1 %v4073_v52  ;;  %4044 = vmatprep.subr.bf16.mxu0 %v4043_v53  ;;  %v4051_v14 = vpack.c.bf16 %v94_v9, %v90_v8  ;;  %v91_v17 = vld [vmem:[%s6489_s5 + $0x190] sm:$0xff]  ;;  %v4083_v18 = vpack.c.bf16 %v96_v11, %v92_v10  ;;  %v98_v20 = vld [vmem:[%s6489_s5 + $0x1c8] sm:$0xff]  ;;  %v100_v22 = vld [vmem:[%s6489_s5 + $0x1d8] sm:$0xff]  ;;  %v4053_v24 = vpack.c.bf16 %v93_v16, %v89_v15 }
  0x14   :  { %4076 = vmatprep.subr.bf16.mxu1 %v4075_v57  ;;  %v95_v19 = vld [vmem:[%s6489_s5 + $0x1b0] sm:$0xff]  ;;  %v102_v21 = vld [vmem:[%s6489_s5 + $0x1e8] sm:$0xff]  ;;  %v104_v23 = vld [vmem:[%s6489_s5 + $0x1f8] sm:$0xff] }
  0x15   :  { %v4085_v25 = vpack.c.bf16 %v95_v19, %v91_v17  ;;  %v4055_v26 = vpack.c.bf16 %v102_v21, %v98_v20  ;;  %v97_v27 = vld [vmem:[%s6489_s5 + $0x1c0] sm:$0xff]  ;;  %v99_v29 = vld [vmem:[%s6489_s5 + $0x1d0] sm:$0xff]  ;;  %v4087_v30 = vpack.c.bf16 %v104_v23, %v100_v22  ;;  %v286_v32 = vld [vmem:[%s6490_s6 + $0x8] sm:$0xff] }
  0x16   :  { %4046 = vmatpush1.bf16.msra.mxu0 %v4045_v63  ;;  %v101_v28 = vld [vmem:[%s6489_s5 + $0x1e0] sm:$0xff]  ;;  %v103_v31 = vld [vmem:[%s6489_s5 + $0x1f0] sm:$0xff]  ;;  %v290_v33 = vld [vmem:[%s6490_s6 + $0x28] sm:$0xff] }
  0x17   :  { %4078 = vmatpush1.bf16.msra.mxu1 %v4077_v0  ;;  %4048 = vmatprep.subr.bf16.mxu0 %v4047_v1  ;;  %v288_v34 = vld [vmem:[%s6490_s6 + $0x18] sm:$0xff]  ;;  %v4057_v36 = vpack.c.bf16 %v101_v28, %v97_v27  ;;  %v4089_v37 = vpack.c.bf16 %v103_v31, %v99_v29  ;;  %v5417_v38 = vpack.c.bf16 %v290_v33, %v286_v32  ;;  %v285_v39 = vld [vmem:[%s6490_s6] sm:$0xff]  ;;  %v287_v41 = vld [vmem:[%s6490_s6 + $0x10] sm:$0xff] }
  0x18   :  { %4080 = vmatprep.subr.bf16.mxu1 %v4079_v5  ;;  %v292_v35 = vld [vmem:[%s6490_s6 + $0x38] sm:$0xff]  ;;  %v289_v40 = vld [vmem:[%s6490_s6 + $0x20] sm:$0xff]  ;;  %v291_v43 = vld [vmem:[%s6490_s6 + $0x30] sm:$0xff] }
  0x19   :  { %v5428_v42 = vpack.c.bf16 %v292_v35, %v288_v34  ;;  %v294_v44 = vld [vmem:[%s6490_s6 + $0x48] sm:$0xff]  ;;  %v296_v46 = vld [vmem:[%s6490_s6 + $0x58] sm:$0xff]  ;;  %v40_v48 = vld [vmem:[%s6485_s1] sm:$0x3]  ;;  %v5448_v49 = vpack.c.bf16 %v289_v40, %v285_v39  ;;  %v5451_v50 = vpack.c.bf16 %v291_v43, %v287_v41 }
  0x1a   :  { %4050 = vmatpush1.bf16.msra.mxu0 %v4049_v12  ;;  %v298_v45 = vld [vmem:[%s6490_s6 + $0x68] sm:$0xff]  ;;  %v300_v47 = vld [vmem:[%s6490_s6 + $0x78] sm:$0xff]  ;;  %v293_v52 = vld [vmem:[%s6490_s6 + $0x40] sm:$0xff] }
  0x1b   :  { %4082 = vmatpush1.bf16.msra.mxu1 %v4081_v13  ;;  %4052 = vmatprep.subr.bf16.mxu0 %v4051_v14  ;;  %6519 = vst [vmem:[#allocation8_spill] sm:$0xff] %v5428_v42  ;;  %v5453_v51 = vpack.c.bf16 %v298_v45, %v294_v44  ;;  %v297_v53 = vld [vmem:[%s6490_s6 + $0x60] sm:$0xff]  ;;  %v295_v54 = vld [vmem:[%s6490_s6 + $0x50] sm:$0xff]  ;;  %v5465_v55 = vpack.c.bf16 %v300_v47, %v296_v46  ;;  %v302_v57 = vld [vmem:[%s6490_s6 + $0x88] sm:$0xff] }
  0x1c   :  { %4084 = vmatprep.subr.bf16.mxu1 %v4083_v18  ;;  %v299_v56 = vld [vmem:[%s6490_s6 + $0x70] sm:$0xff]  ;;  %v306_v58 = vld [vmem:[%s6490_s6 + $0xa8] sm:$0xff]  ;;  %v304_v59 = vld [vmem:[%s6490_s6 + $0x98] sm:$0xff]  ;;  %v5483_v61 = vpack.c.bf16 %v297_v53, %v293_v52 }
  0x1d   :  { %v308_v60 = vld [vmem:[%s6490_s6 + $0xb8] sm:$0xff]  ;;  %v5487_v62 = vpack.c.bf16 %v299_v56, %v295_v54  ;;  %v5489_v63 = vpack.c.bf16 %v306_v58, %v302_v57  ;;  %v301_v0 = vld [vmem:[%s6490_s6 + $0x80] sm:$0xff]  ;;  %v303_v2 = vld [vmem:[%s6490_s6 + $0x90] sm:$0xff] }
  0x1e   :  { %4054 = vmatpush1.bf16.msra.mxu0 %v4053_v24  ;;  %v305_v1 = vld [vmem:[%s6490_s6 + $0xa0] sm:$0xff]  ;;  %v5501_v3 = vpack.c.bf16 %v308_v60, %v304_v59  ;;  %v307_v4 = vld [vmem:[%s6490_s6 + $0xb0] sm:$0xff]  ;;  %v310_v5 = vld [vmem:[%s6490_s6 + $0xc8] sm:$0xff] }
  0x1f   :  { %4086 = vmatpush1.bf16.msra.mxu1 %v4085_v25  ;;  %4056 = vmatprep.subr.bf16.mxu0 %v4055_v26  ;;  %v314_v6 = vld [vmem:[%s6490_s6 + $0xe8] sm:$0xff]  ;;  %v312_v8 = vld [vmem:[%s6490_s6 + $0xd8] sm:$0xff]  ;;  %v5521_v10 = vpack.c.bf16 %v305_v1, %v301_v0  ;;  %v5525_v11 = vpack.c.bf16 %v307_v4, %v303_v2  ;;  %v309_v13 = vld [vmem:[%s6490_s6 + $0xc0] sm:$0xff] }
  0x20   :  { %4088 = vmatprep.subr.bf16.mxu1 %v4087_v30  ;;  %v316_v9 = vld [vmem:[%s6490_s6 + $0xf8] sm:$0xff]  ;;  %v5527_v12 = vpack.c.bf16 %v314_v6, %v310_v5  ;;  %v313_v14 = vld [vmem:[%s6490_s6 + $0xe0] sm:$0xff]  ;;  %v311_v15 = vld [vmem:[%s6490_s6 + $0xd0] sm:$0xff] }
  0x21   :  { %v5539_v16 = vpack.c.bf16 %v316_v9, %v312_v8  ;;  %v315_v17 = vld [vmem:[%s6490_s6 + $0xf0] sm:$0xff]  ;;  %v318_v18 = vld [vmem:[%s6490_s6 + $0x108] sm:$0xff]  ;;  %v320_v20 = vld [vmem:[%s6490_s6 + $0x118] sm:$0xff]  ;;  %v5557_v22 = vpack.c.bf16 %v313_v14, %v309_v13 }
  0x22   :  { %4058 = vmatpush1.bf16.msra.mxu0 %v4057_v36  ;;  %v322_v19 = vld [vmem:[%s6490_s6 + $0x128] sm:$0xff]  ;;  %v324_v21 = vld [vmem:[%s6490_s6 + $0x138] sm:$0xff]  ;;  %v5561_v23 = vpack.c.bf16 %v315_v17, %v311_v15  ;;  %v317_v25 = vld [vmem:[%s6490_s6 + $0x100] sm:$0xff] }
  0x23   :  { %4090 = vmatpush1.bf16.msra.mxu1 %v4089_v37  ;;  %4092 = vmatprep.subr.bf16.mxu0 %v5417_v38  ;;  %v5563_v24 = vpack.c.bf16 %v322_v19, %v318_v18  ;;  %v321_v26 = vld [vmem:[%s6490_s6 + $0x120] sm:$0xff]  ;;  %v319_v27 = vld [vmem:[%s6490_s6 + $0x110] sm:$0xff]  ;;  %v5575_v28 = vpack.c.bf16 %v324_v21, %v320_v20  ;;  %v326_v30 = vld [vmem:[%s6490_s6 + $0x148] sm:$0xff] }
  0x24   :  { %4124 = vmatprep.subr.bf16.mxu1 %v5428_v42  ;;  %v323_v29 = vld [vmem:[%s6490_s6 + $0x130] sm:$0xff]  ;;  %v330_v31 = vld [vmem:[%s6490_s6 + $0x168] sm:$0xff]  ;;  %v328_v32 = vld [vmem:[%s6490_s6 + $0x158] sm:$0xff]  ;;  %v5593_v34 = vpack.c.bf16 %v321_v26, %v317_v25 }
  0x25   :  { %192 = vmatmul.mubr.f32.vlgmr.msra.gmra.mrb[0].mxu0 %v40_v48  ;;  %v332_v33 = vld [vmem:[%s6490_s6 + $0x178] sm:$0xff]  ;;  %v325_v35 = vld [vmem:[%s6490_s6 + $0x140] sm:$0xff]  ;;  %v5600_v36 = vpack.c.bf16 %v323_v29, %v319_v27  ;;  %v5602_v37 = vpack.c.bf16 %v330_v31, %v326_v30  ;;  %v327_v40 = vld [vmem:[%s6490_s6 + $0x150] sm:$0xff] }
  0x26   :  { %263 = vmatmul.mubr.f32.vlgmr.msra.gmra.mrb[0].mxu1 %v40_v48  ;;  %4094 = vmatpush1.bf16.msra.mxu0 %v5448_v49  ;;  %v329_v39 = vld [vmem:[%s6490_s6 + $0x160] sm:$0xff] }
  0x27   :  { %4126 = vmatpush1.bf16.msra.mxu1 %v5451_v50  ;;  %4096 = vmatprep.subr.bf16.mxu0 %v5453_v51 }
  0x28   :  { %4128 = vmatprep.subr.bf16.mxu1 %v5465_v55  ;;  %433 = vmatprep.mubr.f32.mxu0 %v6499_v7 }
  0x29   :  { %504 = vmatprep.mubr.f32.mxu1 %v6499_v7 }
  0x2a   :  { %4098 = vmatpush1.bf16.msra.mxu0 %v5483_v61 }
  0x2b   :  { %4130 = vmatpush1.bf16.msra.mxu1 %v5487_v62  ;;  %4100 = vmatprep.subr.bf16.mxu0 %v5489_v63 }
  0x2c   :  { %4132 = vmatprep.subr.bf16.mxu1 %v5501_v3 }
  0x2e   :  { %4102 = vmatpush1.bf16.msra.mxu0 %v5521_v10 }
  0x2f   :  { %4134 = vmatpush1.bf16.msra.mxu1 %v5525_v11  ;;  %4104 = vmatprep.subr.bf16.mxu0 %v5527_v12 }
  0x30   :  { %4136 = vmatprep.subr.bf16.mxu1 %v5539_v16 }
  0x32   :  { %4106 = vmatpush1.bf16.msra.mxu0 %v5557_v22 }
  0x33   :  { %4138 = vmatpush1.bf16.msra.mxu1 %v5561_v23  ;;  %4108 = vmatprep.subr.bf16.mxu0 %v5563_v24 }
  0x34   :  { %19 = vsyncpa [#allocation5], 0  ;;  %4140 = vmatprep.subr.bf16.mxu1 %v5575_v28  ;;  %v5611_v41 = vpack.c.bf16 %v332_v33, %v328_v32  ;;  %v331_v43 = vld [vmem:[%s6490_s6 + $0x170] sm:$0xff]  ;;  %v334_v44 = vld [vmem:[%s6490_s6 + $0x188] sm:$0xff]  ;;  %v5629_v48 = vpack.c.bf16 %v329_v39, %v325_v35  ;;  %vm511_vm0 = vcmask 261120   ;;  %vm5141_vm1 = vmmov 0  }
  0x35   :  { %v338_v45 = vld [vmem:[%s6490_s6 + $0x1a8] sm:$0xff]  ;;  %v336_v46 = vld [vmem:[%s6490_s6 + $0x198] sm:$0xff]  ;;  %v5633_v52 = vpack.c.bf16 %v331_v43, %v327_v40  ;;  %v333_v54 = vld [vmem:[%s6490_s6 + $0x180] sm:$0xff]  ;;  %s5142_s14 = smov 120   ;;  %vm761_vm2 = vcmask 58368   ;;  %s5143_s19 = smov 24  }
  0x36   :  { %v340_v47 = vld [vmem:[%s6490_s6 + $0x1b8] sm:$0xff]  ;;  %4110 = vmatpush1.bf16.msra.mxu0 %v5593_v34  ;;  %v5635_v53 = vpack.c.bf16 %v338_v45, %v334_v44  ;;  %v337_v56 = vld [vmem:[%s6490_s6 + $0x1a0] sm:$0xff]  ;;  %v335_v57 = vld [vmem:[%s6490_s6 + $0x190] sm:$0xff]  ;;  %vm770_vm3 = vcmask 195584   ;;  %s5144_s29 = smov [#allocation2]   ;;  %s5145_s5 = smov [#allocation4]  }
  0x37   :  { %4142 = vmatpush1.bf16.msra.mxu1 %v5600_v36  ;;  %4112 = vmatprep.subr.bf16.mxu0 %v5602_v37  ;;  %v5647_v58 = vpack.c.bf16 %v340_v47, %v336_v46  ;;  %v339_v59 = vld [vmem:[%s6490_s6 + $0x1b0] sm:$0xff]  ;;  %v342_v60 = vld [vmem:[%s6490_s6 + $0x1c8] sm:$0xff]  ;;  %v344_v1 = vld [vmem:[%s6490_s6 + $0x1d8] sm:$0xff]  ;;  %v5665_v4 = vpack.c.bf16 %v337_v56, %v333_v54  ;;  %s3539_s30 = sshll.u32 %s5144_s29, 4  ;;  %s3549_s13 = sshll.u32 %s5145_s5, 4  ;;  %s3540_s30 = int_to_ptr.vmem [resolvable:$true] %s3539_s30  ;;  %s3550_s13 = int_to_ptr.vmem [resolvable:$true] %s3549_s13 }
  0x38   :  { %4144 = vmatprep.subr.bf16.mxu1 %v5611_v41  ;;  %v346_v0 = vld [vmem:[%s6490_s6 + $0x1e8] sm:$0xff]  ;;  %v348_v2 = vld [vmem:[%s6490_s6 + $0x1f8] sm:$0xff]  ;;  %v5669_v5 = vpack.c.bf16 %v339_v59, %v335_v57  ;;  %v341_v8 = vld [vmem:[%s6490_s6 + $0x1c0] sm:$0xff]  ;;  %p5096_p1 = scmp.lt.s32.totalorder %s3540_s30, %s3540_s30 }
  0x39   :  { %6520 = vst [vmem:[#allocation9_spill] sm:$0xff] %v5665_v4  ;;  %v5671_v6 = vpack.c.bf16 %v346_v0, %v342_v60  ;;  %v345_v9 = vld [vmem:[%s6490_s6 + $0x1e0] sm:$0xff]  ;;  %v343_v13 = vld [vmem:[%s6490_s6 + $0x1d0] sm:$0xff]  ;;  %v5683_v14 = vpack.c.bf16 %v348_v2, %v344_v1  ;;  %v270_v17 = vld [vmem:[%s6488_s4 + $0x8] sm:$0xff] }
  0x3a   :  { %4114 = vmatpush1.bf16.msra.mxu0 %v5629_v48  ;;  %v347_v15 = vld [vmem:[%s6490_s6 + $0x1f0] sm:$0xff]  ;;  %v274_v18 = vld [vmem:[%s6488_s4 + $0x28] sm:$0xff]  ;;  %v272_v19 = vld [vmem:[%s6488_s4 + $0x18] sm:$0xff]  ;;  %v5701_v21 = vpack.c.bf16 %v345_v9, %v341_v8 }
  0x3b   :  { %4146 = vmatpush1.bf16.msra.mxu1 %v5633_v52  ;;  %4116 = vmatprep.subr.bf16.mxu0 %v5635_v53  ;;  %6521 = vst [vmem:[#allocation10_spill] sm:$0xff] %v5671_v6  ;;  %v276_v20 = vld [vmem:[%s6488_s4 + $0x38] sm:$0xff]  ;;  %v5705_v25 = vpack.c.bf16 %v347_v15, %v343_v13  ;;  %v5707_v26 = vpack.c.bf16 %v274_v18, %v270_v17  ;;  %v269_v27 = vld [vmem:[%s6488_s4] sm:$0xff]  ;;  %v271_v30 = vld [vmem:[%s6488_s4 + $0x10] sm:$0xff]  ;;  %v6497_v13 = vmov 0.0|0.0  }
  0x3c   :  { %4148 = vmatprep.subr.bf16.mxu1 %v5647_v58  ;;  %6522 = vst [vmem:[#allocation11_spill] sm:$0xff] %v5701_v21  ;;  %v273_v29 = vld [vmem:[%s6488_s4 + $0x20] sm:$0xff]  ;;  %v5719_v31 = vpack.c.bf16 %v276_v20, %v272_v19  ;;  %v275_v32 = vld [vmem:[%s6488_s4 + $0x30] sm:$0xff]  ;;  %v278_v33 = vld [vmem:[%s6488_s4 + $0x48] sm:$0xff] }
  0x3d   :  { %6523 = vst [vmem:[#allocation12_spill] sm:$0xff] %v5707_v26  ;;  %v282_v35 = vld [vmem:[%s6488_s4 + $0x68] sm:$0xff]  ;;  %v280_v39 = vld [vmem:[%s6488_s4 + $0x58] sm:$0xff]  ;;  %v367_v43 = vld [vmem:[%s6486_s2] sm:$0x3]  ;;  %v5740_v44 = vpack.c.bf16 %v273_v29, %v269_v27  ;;  %v5744_v45 = vpack.c.bf16 %v275_v32, %v271_v30 }
  0x3e   :  { %4118 = vmatpush1.bf16.msra.mxu0 %v5665_v4  ;;  %v284_v40 = vld [vmem:[%s6488_s4 + $0x78] sm:$0xff]  ;;  %v5746_v46 = vpack.c.bf16 %v282_v35, %v278_v33  ;;  %v277_v47 = vld [vmem:[%s6488_s4 + $0x40] sm:$0xff]  ;;  %v279_v57 = vld [vmem:[%s6488_s4 + $0x50] sm:$0xff] }
  0x3f   :  { %4150 = vmatpush1.bf16.msra.mxu1 %v5669_v5  ;;  %4120 = vmatprep.subr.bf16.mxu0 %v5671_v6  ;;  %v281_v54 = vld [vmem:[%s6488_s4 + $0x60] sm:$0xff]  ;;  %v5755_v56 = vpack.c.bf16 %v284_v40, %v280_v39  ;;  %v283_v59 = vld [vmem:[%s6488_s4 + $0x70] sm:$0xff]  ;;  %v350_v8 = vld [vmem:[%s6492_s8 + $0x8] sm:$0xff] }
  0x40   :  { %4152 = vmatprep.subr.bf16.mxu1 %v5683_v14  ;;  %v5764_v60 = vpack.c.bf16 %v281_v54, %v277_v47  ;;  %v5768_v0 = vpack.c.bf16 %v283_v59, %v279_v57  ;;  %v5777_v1 = vld [vmem:[%s6484_s0] sm:$0x3]  ;;  %v351_v15 = vld [vmem:[%s6492_s8 + $0x10] sm:$0xff]  ;;  %v352_v17 = vld [vmem:[%s6492_s8 + $0x18] sm:$0xff] }
  0x41   :  { %v349_v2 = vld [vmem:[%s6492_s8] sm:$0xff]  ;;  %v5819_v18 = vpack.c.bf16 %v352_v17, %v351_v15  ;;  %v354_v20 = vld [vmem:[%s6492_s8 + $0x28] sm:$0xff]  ;;  %v355_v29 = vld [vmem:[%s6492_s8 + $0x30] sm:$0xff]  ;;  %763 = vrot.lane.b32.xlu0 %v5777_v1, %s5142_s14 }
  0x42   :  { %4122 = vmatpush1.bf16.msra.mxu0 %v5701_v21  ;;  %v5808_v9 = vpack.c.bf16 %v350_v8, %v349_v2  ;;  %v353_v19 = vld [vmem:[%s6492_s8 + $0x20] sm:$0xff]  ;;  %v356_v30 = vld [vmem:[%s6492_s8 + $0x38] sm:$0xff]  ;;  %v358_v35 = vld [vmem:[%s6492_s8 + $0x48] sm:$0xff] }
  0x43   :  { %4154 = vmatpush1.bf16.msra.mxu1 %v5705_v25  ;;  %4156 = vmatprep.subr.bf16.mxu0 %v5707_v26  ;;  %v5829_v27 = vpack.c.bf16 %v354_v20, %v353_v19  ;;  %v5839_v32 = vpack.c.bf16 %v356_v30, %v355_v29  ;;  %v357_v33 = vld [vmem:[%s6492_s8 + $0x40] sm:$0xff]  ;;  %v359_v40 = vld [vmem:[%s6492_s8 + $0x50] sm:$0xff]  ;;  %v362_v57 = vld [vmem:[%s6492_s8 + $0x68] sm:$0xff]  ;;  %v107_v30 = vlaneseq }
  0x44   :  { %4164 = vmatprep.subr.bf16.mxu1 %v5719_v31  ;;  %v5849_v39 = vpack.c.bf16 %v358_v35, %v357_v33  ;;  %v361_v54 = vld [vmem:[%s6492_s8 + $0x60] sm:$0xff]  ;;  %v363_v2 = vld [vmem:[%s6492_s8 + $0x70] sm:$0xff]  ;;  %v364_v8 = vld [vmem:[%s6492_s8 + $0x78] sm:$0xff] }
  0x45   :  { %434 = vmatmul.mubr.f32.vlgmr.msra.gmra.mrb[2].mxu0 %v367_v43  ;;  %v5870_v59 = vpack.c.bf16 %v362_v57, %v361_v54  ;;  %v5880_v15 = vpack.c.bf16 %v364_v8, %v363_v2  ;;  %v108_v33 = vshrl.u32 %v107_v30, 7 }
  0x46   :  { %505 = vmatmul.mubr.f32.vlgmr.msra.gmra.mrb[2].mxu1 %v367_v43  ;;  %4158 = vmatpush1.bf16.msra.mxu0 %v5740_v44  ;;  %v360_v43 = vld [vmem:[%s6492_s8 + $0x58] sm:$0xff] }
  0x47   :  { %4166 = vmatpush1.bf16.msra.mxu1 %v5744_v45  ;;  %4160 = vmatprep.subr.bf16.mxu0 %v5746_v46  ;;  %v5859_v47 = vpack.c.bf16 %v360_v43, %v359_v40  ;;  %6524 = vst [vmem:[#allocation13_spill] sm:$0xff] %v5870_v59  ;;  %6525 = vst [vmem:[#allocation14_spill] sm:$0xff] %v5880_v15  ;;  %v109_v35 = vsub.s32 0, %v108_v33  ;;  %v105_v40 = vld [vmem:[%s6491_s7] sm:$0xf]  ;;  %v113_v43 = vsub.s32 1, %v108_v33 }
  0x48   :  { %4168 = vmatprep.subr.bf16.mxu1 %v5755_v56  ;;  %579 = vmatprep.mubr.f32.mxu0 %v6499_v7  ;;  %v121_v2 = vsub.s32 3, %v108_v33 }
  0x49   :  { %650 = vmatprep.mubr.f32.mxu1 %v6499_v7  ;;  %v110_v54 = vrot.slane %v105_v40, %v109_v35  ;;  %v114_v57 = vrot.slane %v105_v40, %v113_v43 }
  0x4a   :  { %4162 = vmatpush1.bf16.msra.mxu0 %v5764_v60 }
  0x4b   :  { %4170 = vmatpush1.bf16.msra.mxu1 %v5768_v0  ;;  %4171 = vmatprep.subr.bf16.mxu0 %v6497_v13 }
  0x4c   :  { %4196 = vmatprep.subr.bf16.mxu1 %v5417_v38 }
  0x4d   :  { %3563 = vmatmul.mubr.msk.f32.vlgmr.msra.gmra.mrb[2].mxu0 %vm511_vm0, %v5777_v1 }
  0x4e   :  { %3564 = vmatmul.mubr.msk.f32.vlgmr.msra.gmra.mrb[2].mxu1 %vm511_vm0, %v5777_v1  ;;  %4173 = vmatpush3.bf16.msra.mxu0 %v5808_v9 }
  0x4f   :  { %4198 = vmatpush1.bf16.msra.mxu1 %v5448_v49  ;;  %836 = vmatprep.mubr.f32.mxu1 %v6499_v7 }
  0x50   :  { %4200 = vmatprep.subr.bf16.mxu1 %v5453_v51  ;;  %4174 = vmatprep.subr.bf16.mxu0 %v6497_v13 }
  0x51   :  { %3779 = vmatprep.mubr.msk.f32.mxu0 %vm5141_vm1, %v6499_v7 }
  0x52   :  { %4176 = vmatpush3.bf16.msra.mxu0 %v5819_v18 }
  0x53   :  { %4202 = vmatpush1.bf16.msra.mxu1 %v5483_v61  ;;  %4177 = vmatprep.subr.bf16.mxu0 %v6497_v13 }
  0x54   :  { %4204 = vmatprep.subr.bf16.mxu1 %v5489_v63 }
  0x56   :  { %4179 = vmatpush3.bf16.msra.mxu0 %v5829_v27 }
  0x57   :  { %4206 = vmatpush1.bf16.msra.mxu1 %v5521_v10  ;;  %4180 = vmatprep.subr.bf16.mxu0 %v6497_v13 }
  0x58   :  { %4208 = vmatprep.subr.bf16.mxu1 %v5527_v12 }
  0x5a   :  { %4182 = vmatpush3.bf16.msra.mxu0 %v5839_v32 }
  0x5b   :  { %4210 = vmatpush1.bf16.msra.mxu1 %v5557_v22  ;;  %4183 = vmatprep.subr.bf16.mxu0 %v6497_v13 }
  0x5c   :  { %4212 = vmatprep.subr.bf16.mxu1 %v5563_v24 }
  0x5e   :  { %4185 = vmatpush3.bf16.msra.mxu0 %v5849_v39 }
  0x5f   :  { %4214 = vmatpush1.bf16.msra.mxu1 %v5593_v34  ;;  %4186 = vmatprep.subr.bf16.mxu0 %v6497_v13 }
  0x60   :  { %4216 = vmatprep.subr.bf16.mxu1 %v5602_v37 }
  0x62   :  { %4188 = vmatpush3.bf16.msra.mxu0 %v5859_v47 }
  0x63   :  { %4218 = vmatpush1.bf16.msra.mxu1 %v5629_v48  ;;  %4189 = vmatprep.subr.bf16.mxu0 %v6497_v13 }
  0x64   :  { %4220 = vmatprep.subr.bf16.mxu1 %v5635_v53 }
  0x66   :  { %4191 = vmatpush3.bf16.msra.mxu0 %v5870_v59 }
  0x67   :  { %4222 = vmatpush1.bf16.msra.mxu1 %v5665_v4  ;;  %4192 = vmatprep.subr.bf16.mxu0 %v6497_v13 }
  0x68   :  { %4224 = vmatprep.subr.bf16.mxu1 %v5671_v6  ;;  %v117_v6 = vsub.s32 2, %v108_v33 }
  0x6a   :  { %4194 = vmatpush3.bf16.msra.mxu0 %v5880_v15 }
  0x6b   :  { %4226 = vmatpush1.bf16.msra.mxu1 %v5701_v21  ;;  %4228 = vmatprep.subr.bf16.mxu0 %v5428_v42  ;;  %v122_v21 = vrot.slane %v105_v40, %v121_v2 }
  0x6c   :  { %4260 = vmatprep.subr.bf16.mxu1 %v5707_v26 }
  0xf8   :  { %v193_v17 = vpop.f32.mrb[0].mxu0 }
  0xf9   :  { %v195_v19 = vpop.f32.mrb[1].mxu0  ;;  %v264_v20 = vpop.f32.mrb[0].mxu1  ;;  %v5890_v8 = vadd.f32 %v193_v17, %v110_v54  ;;  %v118_v17 = vrot.slane %v105_v40, %v117_v6  ;;  %v368_v6 = vld [vmem:[%s6487_s3] sm:$0x3] }
  0xfa   :  { %v266_v29 = vpop.f32.mrb[1].mxu1  ;;  %v5892_v13 = vadd.f32 %v195_v19, %v114_v57 }
  0xfb   :  { %6526 = vst [vmem:[#allocation15_spill] sm:$0xff] %v5890_v8  ;;  %v5896_v35 = vadd.f32 %v266_v29, %v122_v21  ;;  %v5899_v43 = vadd.f32 %v264_v20, %v118_v17  ;;  %v6529_v17 = vmov 0.0|0.0  }
  0xfc   :  { %6527 = vst [vmem:[#allocation16_spill] sm:$0xff] %v5892_v13 }
 0x120   :  { %v581_v1 = vpop.f32.mrb[2].mxu0 }
 0x121   :  { %v657_v7 = vadd.f32 %v581_v1, %v5890_v8  ;;  %v652_v26 = vpop.f32.mrb[2].mxu1  ;;  %v583_v42 = vpop.f32.mrb[3].mxu0 }
 0x122   :  { %v658_v30 = vadd.f32 %v583_v42, %v5892_v13  ;;  %v654_v15 = vpop.f32.mrb[3].mxu1  ;;  %v659_v57 = vadd.f32 %v652_v26, %v5899_v43 }
 0x123   :  { %v3565_v4 = vmul.f32 -1.442695, %v657_v7  ;;  %v660_v19 = vadd.f32 %v654_v15, %v5896_v35 }
 0x124   :  { %v3566_v59 = vmul.f32 -1.442695, %v658_v30  ;;  %v6528_v30 = vmov 0.0  }
 0x125   :  { %4962 = vpow2.f32 %v3565_v4  ;;  %v3567_v54 = vmul.f32 -1.442695, %v660_v19  ;;  %v5938_v19 = vld [vmem:[%s6493_s9] ss:$0 sm:$0xff] }
 0x126   :  { %4964 = vpow2.f32 %v3566_v59 }
 0x127   :  { %4966 = vpow2.f32 %v3567_v54 }
 0x128   :  { %4968 = vtanh.f32 %v659_v57 }
 0x12f   :  { %v4963_v1 = vpop.eup %4962 }
 0x130   :  { %v4965_v2 = vpop.eup %4964  ;;  %v664_v8 = vadd.f32 1.0, %v4963_v1 }
 0x131   :  { %v670_v42 = vadd.f32 1.0, %v4965_v2  ;;  %v4967_v7 = vpop.eup %4966  ;;  %v764_v2 = vpop.permute.xlu0 %763 }
 0x132   :  { %4970 = vrcp.f32 %v664_v8  ;;  %v4969_v4 = vpop.eup %4968  ;;  %v677_v20 = vadd.f32 1.0, %v4967_v7 }
 0x133   :  { %4972 = vrcp.f32 %v670_v42 }
 0x134   :  { %4974 = vrcp.f32 %v677_v20  ;;  %v6535_v20 = vld [vmem:[#allocation8_spill] sm:$0xff] }
 0x13c   :  { %v4971_v21 = vpop.eup %4970 }
 0x13d   :  { %v4973_v59 = vpop.eup %4972  ;;  %v681_v15 = vmul.f32 %v4971_v21, %v4969_v4  ;;  %v6530_v4 = vld [vmem:[#allocation13_spill] sm:$0xff]  ;;  %v6532_v21 = vld [vmem:[#allocation10_spill] sm:$0xff] }
 0x13e   :  { %v680_v29 = vmul.f32 %v4973_v59, %v368_v6  ;;  %v4975_v33 = vpop.eup %4974  ;;  %v6531_v6 = vld [vmem:[#allocation9_spill] sm:$0xff]  ;;  %v6533_v59 = vld [vmem:[#allocation14_spill] sm:$0xff] }
 0x140   :  { %v5905_v26 = vadd.f32 %v681_v15, %v680_v29  ;;  %v6534_v15 = vld [vmem:[#allocation11_spill] sm:$0xff]  ;;  %v6536_v29 = vld [vmem:[#allocation12_spill] sm:$0xff] }
 0x142   :  { %4976 = vtanh.f32 %v5905_v26 }
 0x14c   :  { %v4977_v40 = vpop.eup %4976 }
 0x14d   :  { %v684_v8 = vmul.f32 %v4977_v40, %v4975_v33  ;;  %v6537_v40 = vld [vmem:[#allocation15_spill] sm:$0xff] }
 0x14f   :  { %3780 = vmatmul.mubr.f32.vlgmr.msra.gmra.mrb[4].mxu0 %v684_v8  ;;  %837 = vmatmul.mubr.f32.vlgmr.msra.gmra.mrb[4].mxu1 %v684_v8 }
 0x150   :  { %4230 = vmatpush1.bf16.msra.mxu0 %v5451_v50  ;;  %907 = vmatprep.mubr.f32.mxu0 %v6528_v30 }
 0x151   :  { %4232 = vmatprep.subr.bf16.mxu0 %v5465_v55  ;;  %4262 = vmatpush1.bf16.msra.mxu1 %v5740_v44 }
 0x152   :  { %4264 = vmatprep.subr.bf16.mxu1 %v5746_v46  ;;  %981 = vmatprep.mubr.f32.mxu1 %v6528_v30 }
 0x154   :  { %4234 = vmatpush1.bf16.msra.mxu0 %v5487_v62 }
 0x155   :  { %4236 = vmatprep.subr.bf16.mxu0 %v5501_v3  ;;  %4266 = vmatpush1.bf16.msra.mxu1 %v5764_v60 }
 0x156   :  { %4275 = vmatprep.subr.bf16.mxu1 %v6529_v17 }
 0x158   :  { %4238 = vmatpush1.bf16.msra.mxu0 %v5525_v11 }
 0x159   :  { %4240 = vmatprep.subr.bf16.mxu0 %v5539_v16 }
 0x15c   :  { %4242 = vmatpush1.bf16.msra.mxu0 %v5561_v23 }
 0x15d   :  { %4244 = vmatprep.subr.bf16.mxu0 %v5575_v28 }
 0x160   :  { %4246 = vmatpush1.bf16.msra.mxu0 %v5600_v36 }
 0x161   :  { %4248 = vmatprep.subr.bf16.mxu0 %v5611_v41 }
 0x164   :  { %4250 = vmatpush1.bf16.msra.mxu0 %v5633_v52 }
 0x165   :  { %4252 = vmatprep.subr.bf16.mxu0 %v5647_v58 }
 0x168   :  { %4254 = vmatpush1.bf16.msra.mxu0 %v5669_v5 }
 0x169   :  { %4256 = vmatprep.subr.bf16.mxu0 %v5683_v14 }
 0x16c   :  { %4258 = vmatpush1.bf16.msra.mxu0 %v5705_v25 }
 0x16d   :  { %4268 = vmatprep.subr.bf16.mxu0 %v5719_v31 }
 0x16f   :  { %908 = vmatmul.mubr.f32.vlgmr.msra.gmra.mrb[6].mxu0 %v684_v8 }
 0x170   :  { %4270 = vmatpush1.bf16.msra.mxu0 %v5744_v45  ;;  %1052 = vmatprep.mubr.f32.mxu0 %v6528_v30 }
 0x171   :  { %4272 = vmatprep.subr.bf16.mxu0 %v5755_v56 }
 0x174   :  { %4274 = vmatpush1.bf16.msra.mxu0 %v5768_v0 }
 0x175   :  { %4300 = vmatprep.subr.bf16.mxu0 %v5417_v38 }
 0x222   :  { %v757_v54 = vpop.f32.mrb[4].mxu0 }
 0x223   :  { %v758_v57 = vadd.f32 %v5938_v19, %v757_v54  ;;  %v3781_v1 = vpop.f32.mrb[5].mxu0 }
 0x225   :  { %762 = vst.msk [vmem:[%s6494_s10] sm:$0x3] %vm761_vm2, %v758_v57  ;;  %767 = vrot.lane.b32.xlu0 %v758_v57, %s5143_s19 }
 0x297   :  { %v768_v42 = vpop.permute.xlu0 %767 }
 0x298   :  { %v771_v7 = vsel %vm770_vm3, %v764_v2, %v768_v42 }
 0x299   :  { %1159 = vrot.lane.b32.xlu1 %v771_v7, %s5142_s14  ;;  %3569 = vmatmul.mubr.msk.f32.vlgmr.msra.gmra.mrb[4].mxu1 %vm511_vm0, %v771_v7 }
 0x29a   :  { %3570 = vmatmul.mubr.msk.f32.vlgmr.msra.gmra.mrb[6].mxu0 %vm511_vm0, %v771_v7  ;;  %4277 = vmatpush3.bf16.msra.mxu1 %v5808_v9 }
 0x29b   :  { %4302 = vmatpush1.bf16.msra.mxu0 %v5448_v49  ;;  %4278 = vmatprep.subr.bf16.mxu1 %v6529_v17 }
 0x29c   :  { %4304 = vmatprep.subr.bf16.mxu0 %v5453_v51  ;;  %3814 = vmatprep.mubr.msk.f32.mxu1 %vm5141_vm1, %v6528_v30 }
 0x29d   :  { %1231 = vmatprep.mubr.f32.mxu0 %v6528_v30 }
 0x29e   :  { %4280 = vmatpush3.bf16.msra.mxu1 %v5819_v18 }
 0x29f   :  { %4306 = vmatpush1.bf16.msra.mxu0 %v5483_v61  ;;  %4281 = vmatprep.subr.bf16.mxu1 %v6529_v17 }
 0x2a0   :  { %4308 = vmatprep.subr.bf16.mxu0 %v5489_v63 }
 0x2a2   :  { %4283 = vmatpush3.bf16.msra.mxu1 %v5829_v27 }
 0x2a3   :  { %4310 = vmatpush1.bf16.msra.mxu0 %v5521_v10  ;;  %4284 = vmatprep.subr.bf16.mxu1 %v6529_v17 }
 0x2a4   :  { %4312 = vmatprep.subr.bf16.mxu0 %v5527_v12 }
 0x2a6   :  { %4286 = vmatpush3.bf16.msra.mxu1 %v5839_v32 }
 0x2a7   :  { %4314 = vmatpush1.bf16.msra.mxu0 %v5557_v22  ;;  %4287 = vmatprep.subr.bf16.mxu1 %v6529_v17 }
 0x2a8   :  { %4316 = vmatprep.subr.bf16.mxu0 %v5563_v24 }
 0x2aa   :  { %4289 = vmatpush3.bf16.msra.mxu1 %v5849_v39 }
 0x2ab   :  { %4318 = vmatpush1.bf16.msra.mxu0 %v5593_v34  ;;  %4290 = vmatprep.subr.bf16.mxu1 %v6529_v17 }
 0x2ac   :  { %4320 = vmatprep.subr.bf16.mxu0 %v5602_v37 }
 0x2ae   :  { %4292 = vmatpush3.bf16.msra.mxu1 %v5859_v47 }
 0x2af   :  { %4322 = vmatpush1.bf16.msra.mxu0 %v5629_v48  ;;  %4293 = vmatprep.subr.bf16.mxu1 %v6529_v17 }
 0x2b0   :  { %4324 = vmatprep.subr.bf16.mxu0 %v5635_v53 }
 0x2b2   :  { %4295 = vmatpush3.bf16.msra.mxu1 %v6530_v4 }
 0x2b3   :  { %4326 = vmatpush1.bf16.msra.mxu0 %v6531_v6  ;;  %4296 = vmatprep.subr.bf16.mxu1 %v6529_v17 }
 0x2b4   :  { %4328 = vmatprep.subr.bf16.mxu0 %v6532_v21 }
 0x2b6   :  { %4298 = vmatpush3.bf16.msra.mxu1 %v6533_v59 }
 0x2b7   :  { %4330 = vmatpush1.bf16.msra.mxu0 %v6534_v15  ;;  %4332 = vmatprep.subr.bf16.mxu1 %v6535_v20 }
 0x2b8   :  { %4364 = vmatprep.subr.bf16.mxu0 %v6536_v29 }
 0x36c   :  { %v983_v33 = vpop.f32.mrb[4].mxu1 }
 0x36d   :  { %v1059_v8 = vadd.f32 %v983_v33, %v6537_v40  ;;  %v1054_v54 = vpop.f32.mrb[6].mxu0  ;;  %v985_v57 = vpop.f32.mrb[5].mxu1 }
 0x36e   :  { %v1060_v1 = vadd.f32 %v985_v57, %v5892_v13  ;;  %v1056_v2 = vpop.f32.mrb[7].mxu0  ;;  %v1061_v15 = vadd.f32 %v1054_v54, %v5899_v43  ;;  %v6538_v54 = vld [vmem:[#allocation9_spill] sm:$0xff] }
 0x36f   :  { %v3571_v42 = vmul.f32 -1.442695, %v1059_v8  ;;  %v1062_v59 = vadd.f32 %v1056_v2, %v5896_v35 }
 0x370   :  { %v3572_v7 = vmul.f32 -1.442695, %v1060_v1 }
 0x371   :  { %4978 = vpow2.f32 %v3571_v42  ;;  %v3573_v21 = vmul.f32 -1.442695, %v1062_v59 }
 0x372   :  { %4980 = vpow2.f32 %v3572_v7 }
 0x373   :  { %4982 = vpow2.f32 %v3573_v21 }
 0x374   :  { %4984 = vtanh.f32 %v1061_v15  ;;  %v1160_v15 = vpop.permute.xlu1 %1159 }
 0x37b   :  { %v4979_v20 = vpop.eup %4978 }
 0x37c   :  { %v4981_v6 = vpop.eup %4980  ;;  %v1066_v29 = vadd.f32 1.0, %v4979_v20 }
 0x37d   :  { %v1072_v33 = vadd.f32 1.0, %v4981_v6  ;;  %v4983_v40 = vpop.eup %4982 }
 0x37e   :  { %4986 = vrcp.f32 %v1066_v29  ;;  %v4985_v57 = vpop.eup %4984  ;;  %v1079_v42 = vadd.f32 1.0, %v4983_v40 }
 0x37f   :  { %4988 = vrcp.f32 %v1072_v33  ;;  %v6539_v33 = vld [vmem:[#allocation10_spill] sm:$0xff] }
 0x380   :  { %4990 = vrcp.f32 %v1079_v42  ;;  %v6543_v42 = vld [vmem:[#allocation12_spill] sm:$0xff] }
 0x388   :  { %v4987_v13 = vpop.eup %4986 }
 0x389   :  { %v4989_v8 = vpop.eup %4988  ;;  %v1083_v1 = vmul.f32 %v4987_v13, %v4985_v57  ;;  %v6540_v57 = vld [vmem:[#allocation14_spill] sm:$0xff] }
 0x38a   :  { %v1082_v7 = vmul.f32 %v4989_v8, %v5905_v26  ;;  %v4991_v59 = vpop.eup %4990  ;;  %v6541_v8 = vld [vmem:[#allocation11_spill] sm:$0xff] }
 0x38c   :  { %v5990_v2 = vadd.f32 %v1083_v1, %v1082_v7  ;;  %v6542_v1 = vld [vmem:[#allocation8_spill] sm:$0xff] }
 0x38e   :  { %4992 = vtanh.f32 %v5990_v2 }
 0x398   :  { %v4993_v20 = vpop.eup %4992 }
 0x399   :  { %v1086_v21 = vmul.f32 %v4993_v20, %v4991_v59  ;;  %v6544_v59 = vld [vmem:[#allocation15_spill] sm:$0xff] }
 0x39b   :  { %3815 = vmatmul.mubr.f32.vlgmr.msra.gmra.mrb[6].mxu1 %v1086_v21  ;;  %1232 = vmatmul.mubr.f32.vlgmr.msra.gmra.mrb[8].mxu0 %v1086_v21 }
 0x39c   :  { %4334 = vmatpush1.bf16.msra.mxu1 %v5451_v50  ;;  %1302 = vmatprep.mubr.f32.mxu1 %v6528_v30 }
 0x39d   :  { %4336 = vmatprep.subr.bf16.mxu1 %v5465_v55  ;;  %4366 = vmatpush1.bf16.msra.mxu0 %v5740_v44 }
 0x39e   :  { %4368 = vmatprep.subr.bf16.mxu0 %v5746_v46  ;;  %1376 = vmatprep.mubr.f32.mxu0 %v6528_v30 }
 0x3a0   :  { %4338 = vmatpush1.bf16.msra.mxu1 %v5487_v62 }
 0x3a1   :  { %4340 = vmatprep.subr.bf16.mxu1 %v5501_v3  ;;  %4370 = vmatpush1.bf16.msra.mxu0 %v5764_v60 }
 0x3a2   :  { %4379 = vmatprep.subr.bf16.mxu0 %v6529_v17 }
 0x3a4   :  { %4342 = vmatpush1.bf16.msra.mxu1 %v5525_v11 }
 0x3a5   :  { %4344 = vmatprep.subr.bf16.mxu1 %v5539_v16 }
 0x3a8   :  { %4346 = vmatpush1.bf16.msra.mxu1 %v5561_v23 }
 0x3a9   :  { %4348 = vmatprep.subr.bf16.mxu1 %v5575_v28 }
 0x3ac   :  { %4350 = vmatpush1.bf16.msra.mxu1 %v5600_v36 }
 0x3ad   :  { %4352 = vmatprep.subr.bf16.mxu1 %v5611_v41 }
 0x3b0   :  { %4354 = vmatpush1.bf16.msra.mxu1 %v5633_v52 }
 0x3b1   :  { %4356 = vmatprep.subr.bf16.mxu1 %v5647_v58 }
 0x3b4   :  { %4358 = vmatpush1.bf16.msra.mxu1 %v5669_v5 }
 0x3b5   :  { %4360 = vmatprep.subr.bf16.mxu1 %v5683_v14 }
 0x3b8   :  { %4362 = vmatpush1.bf16.msra.mxu1 %v5705_v25 }
 0x3b9   :  { %4372 = vmatprep.subr.bf16.mxu1 %v5719_v31 }
 0x3bb   :  { %1303 = vmatmul.mubr.f32.vlgmr.msra.gmra.mrb[8].mxu1 %v1086_v21 }
 0x3bc   :  { %4374 = vmatpush1.bf16.msra.mxu1 %v5744_v45  ;;  %1447 = vmatprep.mubr.f32.mxu1 %v6528_v30 }
 0x3bd   :  { %4376 = vmatprep.subr.bf16.mxu1 %v5755_v56 }
 0x3c0   :  { %4378 = vmatpush1.bf16.msra.mxu1 %v5768_v0 }
 0x3c1   :  { %4404 = vmatprep.subr.bf16.mxu1 %v5417_v38 }
 0x46e   :  { %v1153_v13 = vpop.f32.mrb[6].mxu1 }
 0x46f   :  { %v1154_v26 = vadd.f32 %v5938_v19, %v1153_v13  ;;  %v3816_v6 = vpop.f32.mrb[7].mxu1 }
 0x471   :  { %3574 = vst.msk [vmem:[%s6494_s10 + $0x2] sm:$0x3] %vm761_vm2, %v1154_v26  ;;  %1163 = vrot.lane.b32.xlu1 %v1154_v26, %s5143_s19  ;;  %v6545_v26 = vld [vmem:[#allocation16_spill] sm:$0xff] }
 0x4e3   :  { %v1164_v29 = vpop.permute.xlu1 %1163 }
 0x4e4   :  { %v1166_v40 = vsel %vm770_vm3, %v1160_v15, %v1164_v29 }
 0x4e5   :  { %1554 = vrot.lane.b32.xlu0 %v1166_v40, %s5142_s14  ;;  %3575 = vmatmul.mubr.msk.f32.vlgmr.msra.gmra.mrb[8].mxu0 %vm511_vm0, %v1166_v40 }
 0x4e6   :  { %3576 = vmatmul.mubr.msk.f32.vlgmr.msra.gmra.mrb[8].mxu1 %vm511_vm0, %v1166_v40  ;;  %4381 = vmatpush3.bf16.msra.mxu0 %v5808_v9 }
 0x4e7   :  { %4406 = vmatpush1.bf16.msra.mxu1 %v5448_v49  ;;  %4382 = vmatprep.subr.bf16.mxu0 %v6529_v17 }
 0x4e8   :  { %4408 = vmatprep.subr.bf16.mxu1 %v5453_v51  ;;  %3849 = vmatprep.mubr.msk.f32.mxu0 %vm5141_vm1, %v6528_v30 }
 0x4e9   :  { %1626 = vmatprep.mubr.f32.mxu1 %v6528_v30 }
 0x4ea   :  { %4384 = vmatpush3.bf16.msra.mxu0 %v5819_v18 }
 0x4eb   :  { %4410 = vmatpush1.bf16.msra.mxu1 %v5483_v61  ;;  %4385 = vmatprep.subr.bf16.mxu0 %v6529_v17 }
 0x4ec   :  { %4412 = vmatprep.subr.bf16.mxu1 %v5489_v63 }
 0x4ee   :  { %4387 = vmatpush3.bf16.msra.mxu0 %v5829_v27 }
 0x4ef   :  { %4414 = vmatpush1.bf16.msra.mxu1 %v5521_v10  ;;  %4388 = vmatprep.subr.bf16.mxu0 %v6529_v17 }
 0x4f0   :  { %4416 = vmatprep.subr.bf16.mxu1 %v5527_v12 }
 0x4f2   :  { %4390 = vmatpush3.bf16.msra.mxu0 %v5839_v32 }
 0x4f3   :  { %4418 = vmatpush1.bf16.msra.mxu1 %v5557_v22  ;;  %4391 = vmatprep.subr.bf16.mxu0 %v6529_v17 }
 0x4f4   :  { %4420 = vmatprep.subr.bf16.mxu1 %v5563_v24 }
 0x4f6   :  { %4393 = vmatpush3.bf16.msra.mxu0 %v5849_v39 }
 0x4f7   :  { %4422 = vmatpush1.bf16.msra.mxu1 %v5593_v34  ;;  %4394 = vmatprep.subr.bf16.mxu0 %v6529_v17 }
 0x4f8   :  { %4424 = vmatprep.subr.bf16.mxu1 %v5602_v37 }
 0x4fa   :  { %4396 = vmatpush3.bf16.msra.mxu0 %v5859_v47 }
 0x4fb   :  { %4426 = vmatpush1.bf16.msra.mxu1 %v5629_v48  ;;  %4397 = vmatprep.subr.bf16.mxu0 %v6529_v17 }
 0x4fc   :  { %4428 = vmatprep.subr.bf16.mxu1 %v5635_v53 }
 0x4fe   :  { %4399 = vmatpush3.bf16.msra.mxu0 %v6530_v4 }
 0x4ff   :  { %4430 = vmatpush1.bf16.msra.mxu1 %v6538_v54  ;;  %4400 = vmatprep.subr.bf16.mxu0 %v6529_v17 }
 0x500   :  { %4432 = vmatprep.subr.bf16.mxu1 %v6539_v33 }
 0x502   :  { %4402 = vmatpush3.bf16.msra.mxu0 %v6540_v57 }
 0x503   :  { %4434 = vmatpush1.bf16.msra.mxu1 %v6541_v8  ;;  %4436 = vmatprep.subr.bf16.mxu0 %v6542_v1 }
 0x504   :  { %4468 = vmatprep.subr.bf16.mxu1 %v6543_v42 }
 0x5b8   :  { %v1378_v7 = vpop.f32.mrb[8].mxu0 }
 0x5b9   :  { %v1454_v20 = vadd.f32 %v1378_v7, %v6544_v59  ;;  %v1449_v21 = vpop.f32.mrb[8].mxu1  ;;  %v1380_v13 = vpop.f32.mrb[9].mxu0 }
 0x5ba   :  { %v1455_v6 = vadd.f32 %v1380_v13, %v6545_v26  ;;  %v1451_v15 = vpop.f32.mrb[9].mxu1  ;;  %v1456_v8 = vadd.f32 %v1449_v21, %v5899_v43 }
 0x5bb   :  { %v3577_v29 = vmul.f32 -1.442695, %v1454_v20  ;;  %v1457_v57 = vadd.f32 %v1451_v15, %v5896_v35 }
 0x5bc   :  { %v3578_v40 = vmul.f32 -1.442695, %v1455_v6 }
 0x5bd   :  { %4994 = vpow2.f32 %v3577_v29  ;;  %v3579_v33 = vmul.f32 -1.442695, %v1457_v57 }
 0x5be   :  { %4996 = vpow2.f32 %v3578_v40 }
 0x5bf   :  { %4998 = vpow2.f32 %v3579_v33 }
 0x5c0   :  { %5000 = vtanh.f32 %v1456_v8 }
 0x5c7   :  { %v4995_v1 = vpop.eup %4994 }
 0x5c8   :  { %v4997_v54 = vpop.eup %4996  ;;  %v1461_v42 = vadd.f32 1.0, %v4995_v1 }
 0x5c9   :  { %v1467_v7 = vadd.f32 1.0, %v4997_v54  ;;  %v4999_v59 = vpop.eup %4998 }
 0x5ca   :  { %5002 = vrcp.f32 %v1461_v42  ;;  %v5001_v13 = vpop.eup %5000  ;;  %v1474_v29 = vadd.f32 1.0, %v4999_v59  ;;  %v1555_v42 = vpop.permute.xlu0 %1554 }
 0x5cb   :  { %5004 = vrcp.f32 %v1467_v7  ;;  %v6547_v7 = vld [vmem:[#allocation10_spill] sm:$0xff] }
 0x5cc   :  { %5006 = vrcp.f32 %v1474_v29  ;;  %v6551_v29 = vld [vmem:[#allocation12_spill] sm:$0xff] }
 0x5d4   :  { %v5003_v26 = vpop.eup %5002 }
 0x5d5   :  { %v5005_v20 = vpop.eup %5004  ;;  %v1478_v6 = vmul.f32 %v5003_v26, %v5001_v13  ;;  %v6546_v26 = vld [vmem:[#allocation9_spill] sm:$0xff]  ;;  %v6548_v13 = vld [vmem:[#allocation14_spill] sm:$0xff] }
 0x5d6   :  { %v1477_v40 = vmul.f32 %v5005_v20, %v5990_v2  ;;  %v5007_v57 = vpop.eup %5006  ;;  %v6549_v20 = vld [vmem:[#allocation11_spill] sm:$0xff] }
 0x5d8   :  { %v6070_v15 = vadd.f32 %v1478_v6, %v1477_v40  ;;  %v6550_v6 = vld [vmem:[#allocation8_spill] sm:$0xff] }
 0x5da   :  { %5008 = vtanh.f32 %v6070_v15 }
 0x5e4   :  { %v5009_v1 = vpop.eup %5008 }
 0x5e5   :  { %v1481_v33 = vmul.f32 %v5009_v1, %v5007_v57  ;;  %v6552_v57 = vld [vmem:[#allocation15_spill] sm:$0xff] }
 0x5e7   :  { %3850 = vmatmul.mubr.f32.vlgmr.msra.gmra.mrb[10].mxu0 %v1481_v33  ;;  %1627 = vmatmul.mubr.f32.vlgmr.msra.gmra.mrb[10].mxu1 %v1481_v33 }
 0x5e8   :  { %4438 = vmatpush1.bf16.msra.mxu0 %v5451_v50  ;;  %1697 = vmatprep.mubr.f32.mxu0 %v6528_v30 }
 0x5e9   :  { %4440 = vmatprep.subr.bf16.mxu0 %v5465_v55  ;;  %4470 = vmatpush1.bf16.msra.mxu1 %v5740_v44 }
 0x5ea   :  { %4472 = vmatprep.subr.bf16.mxu1 %v5746_v46  ;;  %1771 = vmatprep.mubr.f32.mxu1 %v6528_v30 }
 0x5ec   :  { %4442 = vmatpush1.bf16.msra.mxu0 %v5487_v62 }
 0x5ed   :  { %4444 = vmatprep.subr.bf16.mxu0 %v5501_v3  ;;  %4474 = vmatpush1.bf16.msra.mxu1 %v5764_v60 }
 0x5ee   :  { %4483 = vmatprep.subr.bf16.mxu1 %v6529_v17 }
 0x5f0   :  { %4446 = vmatpush1.bf16.msra.mxu0 %v5525_v11 }
 0x5f1   :  { %4448 = vmatprep.subr.bf16.mxu0 %v5539_v16 }
 0x5f4   :  { %4450 = vmatpush1.bf16.msra.mxu0 %v5561_v23 }
 0x5f5   :  { %4452 = vmatprep.subr.bf16.mxu0 %v5575_v28 }
 0x5f8   :  { %4454 = vmatpush1.bf16.msra.mxu0 %v5600_v36 }
 0x5f9   :  { %4456 = vmatprep.subr.bf16.mxu0 %v5611_v41 }
 0x5fc   :  { %4458 = vmatpush1.bf16.msra.mxu0 %v5633_v52 }
 0x5fd   :  { %4460 = vmatprep.subr.bf16.mxu0 %v5647_v58 }
 0x600   :  { %4462 = vmatpush1.bf16.msra.mxu0 %v5669_v5 }
 0x601   :  { %4464 = vmatprep.subr.bf16.mxu0 %v5683_v14 }
 0x604   :  { %4466 = vmatpush1.bf16.msra.mxu0 %v5705_v25 }
 0x605   :  { %4476 = vmatprep.subr.bf16.mxu0 %v5719_v31 }
 0x607   :  { %1698 = vmatmul.mubr.f32.vlgmr.msra.gmra.mrb[12].mxu0 %v1481_v33 }
 0x608   :  { %4478 = vmatpush1.bf16.msra.mxu0 %v5744_v45  ;;  %1842 = vmatprep.mubr.f32.mxu0 %v6528_v30 }
 0x609   :  { %4480 = vmatprep.subr.bf16.mxu0 %v5755_v56 }
 0x60c   :  { %4482 = vmatpush1.bf16.msra.mxu0 %v5768_v0 }
 0x60d   :  { %4508 = vmatprep.subr.bf16.mxu0 %v5417_v38 }
 0x6ba   :  { %v1548_v2 = vpop.f32.mrb[10].mxu0 }
 0x6bb   :  { %v1549_v54 = vadd.f32 %v5938_v19, %v1548_v2  ;;  %v3851_v8 = vpop.f32.mrb[11].mxu0 }
 0x6bd   :  { %3580 = vst.msk [vmem:[%s6494_s10 + $0x4] sm:$0x3] %vm761_vm2, %v1549_v54  ;;  %1558 = vrot.lane.b32.xlu1 %v1549_v54, %s5143_s19  ;;  %v6553_v54 = vld [vmem:[#allocation16_spill] sm:$0xff] }
 0x72f   :  { %v1559_v59 = vpop.permute.xlu1 %1558 }
 0x730   :  { %v1561_v21 = vsel %vm770_vm3, %v1555_v42, %v1559_v59 }
 0x731   :  { %1949 = vrot.lane.b32.xlu0 %v1561_v21, %s5142_s14  ;;  %3581 = vmatmul.mubr.msk.f32.vlgmr.msra.gmra.mrb[10].mxu1 %vm511_vm0, %v1561_v21 }
 0x732   :  { %3582 = vmatmul.mubr.msk.f32.vlgmr.msra.gmra.mrb[12].mxu0 %vm511_vm0, %v1561_v21  ;;  %4485 = vmatpush3.bf16.msra.mxu1 %v5808_v9 }
 0x733   :  { %4510 = vmatpush1.bf16.msra.mxu0 %v5448_v49  ;;  %4486 = vmatprep.subr.bf16.mxu1 %v6529_v17 }
 0x734   :  { %4512 = vmatprep.subr.bf16.mxu0 %v5453_v51  ;;  %3884 = vmatprep.mubr.msk.f32.mxu1 %vm5141_vm1, %v6528_v30 }
 0x735   :  { %2021 = vmatprep.mubr.f32.mxu0 %v6528_v30 }
 0x736   :  { %4488 = vmatpush3.bf16.msra.mxu1 %v5819_v18 }
 0x737   :  { %4514 = vmatpush1.bf16.msra.mxu0 %v5483_v61  ;;  %4489 = vmatprep.subr.bf16.mxu1 %v6529_v17 }
 0x738   :  { %4516 = vmatprep.subr.bf16.mxu0 %v5489_v63 }
 0x73a   :  { %4491 = vmatpush3.bf16.msra.mxu1 %v5829_v27 }
 0x73b   :  { %4518 = vmatpush1.bf16.msra.mxu0 %v5521_v10  ;;  %4492 = vmatprep.subr.bf16.mxu1 %v6529_v17 }
 0x73c   :  { %4520 = vmatprep.subr.bf16.mxu0 %v5527_v12 }
 0x73e   :  { %4494 = vmatpush3.bf16.msra.mxu1 %v5839_v32 }
 0x73f   :  { %4522 = vmatpush1.bf16.msra.mxu0 %v5557_v22  ;;  %4495 = vmatprep.subr.bf16.mxu1 %v6529_v17 }
 0x740   :  { %4524 = vmatprep.subr.bf16.mxu0 %v5563_v24 }
 0x742   :  { %4497 = vmatpush3.bf16.msra.mxu1 %v5849_v39 }
 0x743   :  { %4526 = vmatpush1.bf16.msra.mxu0 %v5593_v34  ;;  %4498 = vmatprep.subr.bf16.mxu1 %v6529_v17 }
 0x744   :  { %4528 = vmatprep.subr.bf16.mxu0 %v5602_v37 }
 0x746   :  { %4500 = vmatpush3.bf16.msra.mxu1 %v5859_v47 }
 0x747   :  { %4530 = vmatpush1.bf16.msra.mxu0 %v5629_v48  ;;  %4501 = vmatprep.subr.bf16.mxu1 %v6529_v17 }
 0x748   :  { %4532 = vmatprep.subr.bf16.mxu0 %v5635_v53 }
 0x74a   :  { %4503 = vmatpush3.bf16.msra.mxu1 %v6530_v4 }
 0x74b   :  { %4534 = vmatpush1.bf16.msra.mxu0 %v6546_v26  ;;  %4504 = vmatprep.subr.bf16.mxu1 %v6529_v17 }
 0x74c   :  { %4536 = vmatprep.subr.bf16.mxu0 %v6547_v7 }
 0x74e   :  { %4506 = vmatpush3.bf16.msra.mxu1 %v6548_v13 }
 0x74f   :  { %4538 = vmatpush1.bf16.msra.mxu0 %v6549_v20  ;;  %4540 = vmatprep.subr.bf16.mxu1 %v6550_v6 }
 0x750   :  { %4572 = vmatprep.subr.bf16.mxu0 %v6551_v29 }
 0x804   :  { %v1773_v40 = vpop.f32.mrb[10].mxu1 }
 0x805   :  { %v1849_v1 = vadd.f32 %v1773_v40, %v6552_v57  ;;  %v1844_v33 = vpop.f32.mrb[12].mxu0  ;;  %v1775_v2 = vpop.f32.mrb[11].mxu1 }
 0x806   :  { %v1850_v8 = vadd.f32 %v1775_v2, %v6553_v54  ;;  %v1846_v42 = vpop.f32.mrb[13].mxu0  ;;  %v1851_v20 = vadd.f32 %v1844_v33, %v5899_v43 }
 0x807   :  { %v3583_v59 = vmul.f32 -1.442695, %v1849_v1  ;;  %v1852_v13 = vadd.f32 %v1846_v42, %v5896_v35 }
 0x808   :  { %v3584_v21 = vmul.f32 -1.442695, %v1850_v8 }
 0x809   :  { %5010 = vpow2.f32 %v3583_v59  ;;  %v3585_v7 = vmul.f32 -1.442695, %v1852_v13 }
 0x80a   :  { %5012 = vpow2.f32 %v3584_v21 }
 0x80b   :  { %5014 = vpow2.f32 %v3585_v7 }
 0x80c   :  { %5016 = vtanh.f32 %v1851_v20 }
 0x813   :  { %v5011_v6 = vpop.eup %5010 }
 0x814   :  { %v5013_v26 = vpop.eup %5012  ;;  %v1856_v29 = vadd.f32 1.0, %v5011_v6 }
 0x815   :  { %v1862_v40 = vadd.f32 1.0, %v5013_v26  ;;  %v5015_v57 = vpop.eup %5014 }
 0x816   :  { %5018 = vrcp.f32 %v1856_v29  ;;  %v5017_v2 = vpop.eup %5016  ;;  %v1869_v59 = vadd.f32 1.0, %v5015_v57  ;;  %v1950_v29 = vpop.permute.xlu0 %1949 }
 0x817   :  { %5020 = vrcp.f32 %v1862_v40  ;;  %v6555_v40 = vld [vmem:[#allocation10_spill] sm:$0xff] }
 0x818   :  { %5022 = vrcp.f32 %v1869_v59  ;;  %v6559_v59 = vld [vmem:[#allocation12_spill] sm:$0xff] }
 0x820   :  { %v5019_v54 = vpop.eup %5018 }
 0x821   :  { %v5021_v1 = vpop.eup %5020  ;;  %v1873_v8 = vmul.f32 %v5019_v54, %v5017_v2  ;;  %v6554_v54 = vld [vmem:[#allocation9_spill] sm:$0xff]  ;;  %v6556_v2 = vld [vmem:[#allocation14_spill] sm:$0xff] }
 0x822   :  { %v1872_v21 = vmul.f32 %v5021_v1, %v6070_v15  ;;  %v5023_v13 = vpop.eup %5022  ;;  %v6557_v1 = vld [vmem:[#allocation11_spill] sm:$0xff] }
 0x824   :  { %v6150_v42 = vadd.f32 %v1873_v8, %v1872_v21  ;;  %v6558_v8 = vld [vmem:[#allocation8_spill] sm:$0xff] }
 0x826   :  { %5024 = vtanh.f32 %v6150_v42 }
 0x830   :  { %v5025_v6 = vpop.eup %5024 }
 0x831   :  { %v1876_v7 = vmul.f32 %v5025_v6, %v5023_v13  ;;  %v6560_v13 = vld [vmem:[#allocation15_spill] sm:$0xff] }
 0x833   :  { %3885 = vmatmul.mubr.f32.vlgmr.msra.gmra.mrb[12].mxu1 %v1876_v7  ;;  %2022 = vmatmul.mubr.f32.vlgmr.msra.gmra.mrb[14].mxu0 %v1876_v7 }
 0x834   :  { %4542 = vmatpush1.bf16.msra.mxu1 %v5451_v50  ;;  %2092 = vmatprep.mubr.f32.mxu1 %v6528_v30 }
 0x835   :  { %4544 = vmatprep.subr.bf16.mxu1 %v5465_v55  ;;  %4574 = vmatpush1.bf16.msra.mxu0 %v5740_v44 }
 0x836   :  { %4576 = vmatprep.subr.bf16.mxu0 %v5746_v46  ;;  %2166 = vmatprep.mubr.f32.mxu0 %v6528_v30 }
 0x838   :  { %4546 = vmatpush1.bf16.msra.mxu1 %v5487_v62 }
 0x839   :  { %4548 = vmatprep.subr.bf16.mxu1 %v5501_v3  ;;  %4578 = vmatpush1.bf16.msra.mxu0 %v5764_v60 }
 0x83a   :  { %4587 = vmatprep.subr.bf16.mxu0 %v6529_v17 }
 0x83c   :  { %4550 = vmatpush1.bf16.msra.mxu1 %v5525_v11 }
 0x83d   :  { %4552 = vmatprep.subr.bf16.mxu1 %v5539_v16 }
 0x840   :  { %4554 = vmatpush1.bf16.msra.mxu1 %v5561_v23 }
 0x841   :  { %4556 = vmatprep.subr.bf16.mxu1 %v5575_v28 }
 0x844   :  { %4558 = vmatpush1.bf16.msra.mxu1 %v5600_v36 }
 0x845   :  { %4560 = vmatprep.subr.bf16.mxu1 %v5611_v41 }
 0x848   :  { %4562 = vmatpush1.bf16.msra.mxu1 %v5633_v52 }
 0x849   :  { %4564 = vmatprep.subr.bf16.mxu1 %v5647_v58 }
 0x84c   :  { %4566 = vmatpush1.bf16.msra.mxu1 %v5669_v5 }
 0x84d   :  { %4568 = vmatprep.subr.bf16.mxu1 %v5683_v14 }
 0x850   :  { %4570 = vmatpush1.bf16.msra.mxu1 %v5705_v25 }
 0x851   :  { %4580 = vmatprep.subr.bf16.mxu1 %v5719_v31 }
 0x853   :  { %2093 = vmatmul.mubr.f32.vlgmr.msra.gmra.mrb[14].mxu1 %v1876_v7 }
 0x854   :  { %4582 = vmatpush1.bf16.msra.mxu1 %v5744_v45  ;;  %2237 = vmatprep.mubr.f32.mxu1 %v6528_v30 }
 0x855   :  { %4584 = vmatprep.subr.bf16.mxu1 %v5755_v56 }
 0x858   :  { %4586 = vmatpush1.bf16.msra.mxu1 %v5768_v0 }
 0x859   :  { %4612 = vmatprep.subr.bf16.mxu1 %v5417_v38 }
 0x906   :  { %v1943_v15 = vpop.f32.mrb[12].mxu1 }
 0x907   :  { %v1944_v26 = vadd.f32 %v5938_v19, %v1943_v15  ;;  %v3886_v20 = vpop.f32.mrb[13].mxu1 }
 0x909   :  { %3586 = vst.msk [vmem:[%s6494_s10 + $0x6] sm:$0x3] %vm761_vm2, %v1944_v26  ;;  %1953 = vrot.lane.b32.xlu1 %v1944_v26, %s5143_s19  ;;  %v6561_v26 = vld [vmem:[#allocation16_spill] sm:$0xff] }
 0x97b   :  { %v1954_v57 = vpop.permute.xlu1 %1953 }
 0x97c   :  { %v1956_v33 = vsel %vm770_vm3, %v1950_v29, %v1954_v57 }
 0x97d   :  { %2344 = vrot.lane.b32.xlu0 %v1956_v33, %s5142_s14  ;;  %3587 = vmatmul.mubr.msk.f32.vlgmr.msra.gmra.mrb[14].mxu0 %vm511_vm0, %v1956_v33 }
 0x97e   :  { %3588 = vmatmul.mubr.msk.f32.vlgmr.msra.gmra.mrb[14].mxu1 %vm511_vm0, %v1956_v33  ;;  %4589 = vmatpush3.bf16.msra.mxu0 %v5808_v9 }
 0x97f   :  { %4614 = vmatpush1.bf16.msra.mxu1 %v5448_v49  ;;  %4590 = vmatprep.subr.bf16.mxu0 %v6529_v17 }
 0x980   :  { %4616 = vmatprep.subr.bf16.mxu1 %v5453_v51  ;;  %3919 = vmatprep.mubr.msk.f32.mxu0 %vm5141_vm1, %v6528_v30 }
 0x981   :  { %2416 = vmatprep.mubr.f32.mxu1 %v6528_v30 }
 0x982   :  { %4592 = vmatpush3.bf16.msra.mxu0 %v5819_v18 }
 0x983   :  { %4618 = vmatpush1.bf16.msra.mxu1 %v5483_v61  ;;  %4593 = vmatprep.subr.bf16.mxu0 %v6529_v17 }
 0x984   :  { %4620 = vmatprep.subr.bf16.mxu1 %v5489_v63 }
 0x986   :  { %4595 = vmatpush3.bf16.msra.mxu0 %v5829_v27 }
 0x987   :  { %4622 = vmatpush1.bf16.msra.mxu1 %v5521_v10  ;;  %4596 = vmatprep.subr.bf16.mxu0 %v6529_v17 }
 0x988   :  { %4624 = vmatprep.subr.bf16.mxu1 %v5527_v12 }
 0x98a   :  { %4598 = vmatpush3.bf16.msra.mxu0 %v5839_v32 }
 0x98b   :  { %4626 = vmatpush1.bf16.msra.mxu1 %v5557_v22  ;;  %4599 = vmatprep.subr.bf16.mxu0 %v6529_v17 }
 0x98c   :  { %4628 = vmatprep.subr.bf16.mxu1 %v5563_v24 }
 0x98e   :  { %4601 = vmatpush3.bf16.msra.mxu0 %v5849_v39 }
 0x98f   :  { %4630 = vmatpush1.bf16.msra.mxu1 %v5593_v34  ;;  %4602 = vmatprep.subr.bf16.mxu0 %v6529_v17 }
 0x990   :  { %4632 = vmatprep.subr.bf16.mxu1 %v5602_v37 }
 0x992   :  { %4604 = vmatpush3.bf16.msra.mxu0 %v5859_v47 }
 0x993   :  { %4634 = vmatpush1.bf16.msra.mxu1 %v5629_v48  ;;  %4605 = vmatprep.subr.bf16.mxu0 %v6529_v17 }
 0x994   :  { %4636 = vmatprep.subr.bf16.mxu1 %v5635_v53 }
 0x996   :  { %4607 = vmatpush3.bf16.msra.mxu0 %v6530_v4 }
 0x997   :  { %4638 = vmatpush1.bf16.msra.mxu1 %v6554_v54  ;;  %4608 = vmatprep.subr.bf16.mxu0 %v6529_v17 }
 0x998   :  { %4640 = vmatprep.subr.bf16.mxu1 %v6555_v40 }
 0x99a   :  { %4610 = vmatpush3.bf16.msra.mxu0 %v6556_v2 }
 0x99b   :  { %4642 = vmatpush1.bf16.msra.mxu1 %v6557_v1  ;;  %4644 = vmatprep.subr.bf16.mxu0 %v6558_v8 }
 0x99c   :  { %4676 = vmatprep.subr.bf16.mxu1 %v6559_v59 }
 0xa50   :  { %v2168_v21 = vpop.f32.mrb[14].mxu0 }
 0xa51   :  { %v2244_v6 = vadd.f32 %v2168_v21, %v6560_v13  ;;  %v2239_v7 = vpop.f32.mrb[14].mxu1  ;;  %v2170_v15 = vpop.f32.mrb[15].mxu0 }
 0xa52   :  { %v2245_v20 = vadd.f32 %v2170_v15, %v6561_v26  ;;  %v2241_v29 = vpop.f32.mrb[15].mxu1  ;;  %v2246_v1 = vadd.f32 %v2239_v7, %v5899_v43 }
 0xa53   :  { %v3589_v57 = vmul.f32 -1.442695, %v2244_v6  ;;  %v2247_v2 = vadd.f32 %v2241_v29, %v5896_v35 }
 0xa54   :  { %v3590_v33 = vmul.f32 -1.442695, %v2245_v20 }
 0xa55   :  { %5026 = vpow2.f32 %v3589_v57  ;;  %v3591_v40 = vmul.f32 -1.442695, %v2247_v2 }
 0xa56   :  { %5028 = vpow2.f32 %v3590_v33 }
 0xa57   :  { %5030 = vpow2.f32 %v3591_v40 }
 0xa58   :  { %5032 = vtanh.f32 %v2246_v1 }
 0xa5f   :  { %v5027_v8 = vpop.eup %5026 }
 0xa60   :  { %v5029_v54 = vpop.eup %5028  ;;  %v2251_v59 = vadd.f32 1.0, %v5027_v8 }
 0xa61   :  { %v2257_v21 = vadd.f32 1.0, %v5029_v54  ;;  %v5031_v13 = vpop.eup %5030 }
 0xa62   :  { %5034 = vrcp.f32 %v2251_v59  ;;  %v5033_v15 = vpop.eup %5032  ;;  %v2264_v57 = vadd.f32 1.0, %v5031_v13  ;;  %v2345_v59 = vpop.permute.xlu0 %2344 }
 0xa63   :  { %5036 = vrcp.f32 %v2257_v21  ;;  %v6564_v21 = vld [vmem:[#allocation14_spill] sm:$0xff] }
 0xa64   :  { %5038 = vrcp.f32 %v2264_v57 }
 0xa6c   :  { %v5035_v26 = vpop.eup %5034 }
 0xa6d   :  { %v5037_v6 = vpop.eup %5036  ;;  %v2268_v20 = vmul.f32 %v5035_v26, %v5033_v15  ;;  %v6563_v26 = vld [vmem:[#allocation10_spill] sm:$0xff]  ;;  %v6565_v15 = vld [vmem:[#allocation11_spill] sm:$0xff] }
 0xa6e   :  { %v2267_v33 = vmul.f32 %v5037_v6, %v6150_v42  ;;  %v5039_v2 = vpop.eup %5038  ;;  %v6566_v6 = vld [vmem:[#allocation8_spill] sm:$0xff] }
 0xa70   :  { %v6230_v29 = vadd.f32 %v2268_v20, %v2267_v33  ;;  %v6567_v20 = vld [vmem:[#allocation12_spill] sm:$0xff]  ;;  %v6568_v33 = vld [vmem:[#allocation15_spill] sm:$0xff] }
 0xa72   :  { %5040 = vtanh.f32 %v6230_v29 }
 0xa7c   :  { %v5041_v8 = vpop.eup %5040 }
 0xa7d   :  { %v2271_v40 = vmul.f32 %v5041_v8, %v5039_v2 }
 0xa7f   :  { %3920 = vmatmul.mubr.f32.vlgmr.msra.gmra.mrb[16].mxu0 %v2271_v40  ;;  %2417 = vmatmul.mubr.f32.vlgmr.msra.gmra.mrb[16].mxu1 %v2271_v40 }
 0xa80   :  { %4646 = vmatpush1.bf16.msra.mxu0 %v5451_v50  ;;  %2487 = vmatprep.mubr.f32.mxu0 %v6528_v30 }
 0xa81   :  { %4648 = vmatprep.subr.bf16.mxu0 %v5465_v55  ;;  %4678 = vmatpush1.bf16.msra.mxu1 %v5740_v44 }
 0xa82   :  { %4680 = vmatprep.subr.bf16.mxu1 %v5746_v46  ;;  %2561 = vmatprep.mubr.f32.mxu1 %v6528_v30 }
 0xa84   :  { %4650 = vmatpush1.bf16.msra.mxu0 %v5487_v62 }
 0xa85   :  { %4652 = vmatprep.subr.bf16.mxu0 %v5501_v3  ;;  %4682 = vmatpush1.bf16.msra.mxu1 %v5764_v60 }
 0xa86   :  { %4691 = vmatprep.subr.bf16.mxu1 %v6529_v17 }
 0xa88   :  { %4654 = vmatpush1.bf16.msra.mxu0 %v5525_v11 }
 0xa89   :  { %4656 = vmatprep.subr.bf16.mxu0 %v5539_v16 }
 0xa8c   :  { %4658 = vmatpush1.bf16.msra.mxu0 %v5561_v23 }
 0xa8d   :  { %4660 = vmatprep.subr.bf16.mxu0 %v5575_v28 }
 0xa90   :  { %4662 = vmatpush1.bf16.msra.mxu0 %v5600_v36 }
 0xa91   :  { %4664 = vmatprep.subr.bf16.mxu0 %v5611_v41 }
 0xa94   :  { %4666 = vmatpush1.bf16.msra.mxu0 %v5633_v52 }
 0xa95   :  { %4668 = vmatprep.subr.bf16.mxu0 %v5647_v58 }
 0xa98   :  { %4670 = vmatpush1.bf16.msra.mxu0 %v5669_v5 }
 0xa99   :  { %4672 = vmatprep.subr.bf16.mxu0 %v5683_v14 }
 0xa9c   :  { %4674 = vmatpush1.bf16.msra.mxu0 %v5705_v25 }
 0xa9d   :  { %4684 = vmatprep.subr.bf16.mxu0 %v5719_v31 }
 0xa9f   :  { %2488 = vmatmul.mubr.f32.vlgmr.msra.gmra.mrb[18].mxu0 %v2271_v40 }
 0xaa0   :  { %4686 = vmatpush1.bf16.msra.mxu0 %v5744_v45  ;;  %2632 = vmatprep.mubr.f32.mxu0 %v6528_v30 }
 0xaa1   :  { %4688 = vmatprep.subr.bf16.mxu0 %v5755_v56 }
 0xaa4   :  { %4690 = vmatpush1.bf16.msra.mxu0 %v5768_v0 }
 0xaa5   :  { %4716 = vmatprep.subr.bf16.mxu0 %v5417_v38 }
 0xb52   :  { %v2338_v42 = vpop.f32.mrb[16].mxu0 }
 0xb53   :  { %v2339_v54 = vadd.f32 %v5938_v19, %v2338_v42  ;;  %v3921_v1 = vpop.f32.mrb[17].mxu0  ;;  %v6562_v19 = vld [vmem:[#allocation9_spill] sm:$0xff]  ;;  %v6569_v42 = vld [vmem:[#allocation16_spill] sm:$0xff] }
 0xb55   :  { %3592 = vst.msk [vmem:[%s6494_s10 + $0x8] sm:$0x3] %vm761_vm2, %v2339_v54  ;;  %2348 = vrot.lane.b32.xlu1 %v2339_v54, %s5143_s19 }
 0xbc7   :  { %v2349_v13 = vpop.permute.xlu1 %2348 }
 0xbc8   :  { %v2351_v7 = vsel %vm770_vm3, %v2345_v59, %v2349_v13 }
 0xbc9   :  { %2739 = vrot.lane.b32.xlu0 %v2351_v7, %s5142_s14  ;;  %3593 = vmatmul.mubr.msk.f32.vlgmr.msra.gmra.mrb[16].mxu1 %vm511_vm0, %v2351_v7 }
 0xbca   :  { %3594 = vmatmul.mubr.msk.f32.vlgmr.msra.gmra.mrb[18].mxu0 %vm511_vm0, %v2351_v7  ;;  %4693 = vmatpush3.bf16.msra.mxu1 %v5808_v9 }
 0xbcb   :  { %4718 = vmatpush1.bf16.msra.mxu0 %v5448_v49  ;;  %4694 = vmatprep.subr.bf16.mxu1 %v6529_v17 }
 0xbcc   :  { %4720 = vmatprep.subr.bf16.mxu0 %v5453_v51  ;;  %3954 = vmatprep.mubr.msk.f32.mxu1 %vm5141_vm1, %v6528_v30 }
 0xbcd   :  { %2811 = vmatprep.mubr.f32.mxu0 %v6528_v30 }
 0xbce   :  { %4696 = vmatpush3.bf16.msra.mxu1 %v5819_v18 }
 0xbcf   :  { %4722 = vmatpush1.bf16.msra.mxu0 %v5483_v61  ;;  %4697 = vmatprep.subr.bf16.mxu1 %v6529_v17 }
 0xbd0   :  { %4724 = vmatprep.subr.bf16.mxu0 %v5489_v63 }
 0xbd2   :  { %4699 = vmatpush3.bf16.msra.mxu1 %v5829_v27 }
 0xbd3   :  { %4726 = vmatpush1.bf16.msra.mxu0 %v5521_v10  ;;  %4700 = vmatprep.subr.bf16.mxu1 %v6529_v17 }
 0xbd4   :  { %4728 = vmatprep.subr.bf16.mxu0 %v5527_v12 }
 0xbd6   :  { %4702 = vmatpush3.bf16.msra.mxu1 %v5839_v32 }
 0xbd7   :  { %4730 = vmatpush1.bf16.msra.mxu0 %v5557_v22  ;;  %4703 = vmatprep.subr.bf16.mxu1 %v6529_v17 }
 0xbd8   :  { %4732 = vmatprep.subr.bf16.mxu0 %v5563_v24 }
 0xbda   :  { %4705 = vmatpush3.bf16.msra.mxu1 %v5849_v39 }
 0xbdb   :  { %4734 = vmatpush1.bf16.msra.mxu0 %v5593_v34  ;;  %4706 = vmatprep.subr.bf16.mxu1 %v6529_v17 }
 0xbdc   :  { %4736 = vmatprep.subr.bf16.mxu0 %v5602_v37 }
 0xbde   :  { %4708 = vmatpush3.bf16.msra.mxu1 %v5859_v47 }
 0xbdf   :  { %4738 = vmatpush1.bf16.msra.mxu0 %v5629_v48  ;;  %4709 = vmatprep.subr.bf16.mxu1 %v6529_v17 }
 0xbe0   :  { %4740 = vmatprep.subr.bf16.mxu0 %v5635_v53 }
 0xbe2   :  { %4711 = vmatpush3.bf16.msra.mxu1 %v6530_v4 }
 0xbe3   :  { %4742 = vmatpush1.bf16.msra.mxu0 %v6562_v19  ;;  %4712 = vmatprep.subr.bf16.mxu1 %v6529_v17 }
 0xbe4   :  { %4744 = vmatprep.subr.bf16.mxu0 %v6563_v26 }
 0xbe6   :  { %4714 = vmatpush3.bf16.msra.mxu1 %v6564_v21 }
 0xbe7   :  { %4746 = vmatpush1.bf16.msra.mxu0 %v6565_v15  ;;  %4748 = vmatprep.subr.bf16.mxu1 %v6566_v6 }
 0xbe8   :  { %4780 = vmatprep.subr.bf16.mxu0 %v6567_v20 }
 0xc9c   :  { %v2563_v57 = vpop.f32.mrb[16].mxu1 }
 0xc9d   :  { %v2639_v2 = vadd.f32 %v2563_v57, %v6568_v33  ;;  %v2634_v8 = vpop.f32.mrb[18].mxu0  ;;  %v2565_v40 = vpop.f32.mrb[17].mxu1 }
 0xc9e   :  { %v2640_v54 = vadd.f32 %v2565_v40, %v6569_v42  ;;  %v2636_v1 = vpop.f32.mrb[19].mxu0  ;;  %v2641_v15 = vadd.f32 %v2634_v8, %v5899_v43 }
 0xc9f   :  { %v3595_v59 = vmul.f32 -1.442695, %v2639_v2  ;;  %v2642_v7 = vadd.f32 %v2636_v1, %v5896_v35 }
 0xca0   :  { %v3596_v13 = vmul.f32 -1.442695, %v2640_v54 }
 0xca1   :  { %5042 = vpow2.f32 %v3595_v59  ;;  %v3597_v21 = vmul.f32 -1.442695, %v2642_v7 }
 0xca2   :  { %5044 = vpow2.f32 %v3596_v13 }
 0xca3   :  { %5046 = vpow2.f32 %v3597_v21 }
 0xca4   :  { %5048 = vtanh.f32 %v2641_v15 }
 0xcab   :  { %v5043_v6 = vpop.eup %5042 }
 0xcac   :  { %v5045_v26 = vpop.eup %5044  ;;  %v2646_v20 = vadd.f32 1.0, %v5043_v6 }
 0xcad   :  { %v2652_v57 = vadd.f32 1.0, %v5045_v26  ;;  %v5047_v33 = vpop.eup %5046  ;;  %v6343_v26 = vld [vmem:[%s6493_s9] ss:$0 sm:$0xff] }
 0xcae   :  { %5050 = vrcp.f32 %v2646_v20  ;;  %v5049_v40 = vpop.eup %5048  ;;  %v2659_v59 = vadd.f32 1.0, %v5047_v33  ;;  %v2740_v33 = vpop.permute.xlu0 %2739 }
 0xcaf   :  { %5052 = vrcp.f32 %v2652_v57 }
 0xcb0   :  { %5054 = vrcp.f32 %v2659_v59 }
 0xcb8   :  { %v5051_v42 = vpop.eup %5050 }
 0xcb9   :  { %v5053_v2 = vpop.eup %5052  ;;  %v2663_v54 = vmul.f32 %v5051_v42, %v5049_v40 }
 0xcba   :  { %v2662_v13 = vmul.f32 %v5053_v2, %v6230_v29  ;;  %v5055_v8 = vpop.eup %5054 }
 0xcbc   :  { %v6310_v1 = vadd.f32 %v2663_v54, %v2662_v13 }
 0xcbe   :  { %5056 = vtanh.f32 %v6310_v1 }
 0xcc8   :  { %v5057_v6 = vpop.eup %5056 }
 0xcc9   :  { %v2666_v21 = vmul.f32 %v5057_v6, %v5055_v8 }
 0xccb   :  { %3955 = vmatmul.mubr.f32.vlgmr.msra.gmra.mrb[18].mxu1 %v2666_v21  ;;  %2812 = vmatmul.mubr.f32.vlgmr.msra.gmra.mrb[20].mxu0 %v2666_v21 }
 0xccc   :  { %4750 = vmatpush1.bf16.msra.mxu1 %v5451_v50  ;;  %2882 = vmatprep.mubr.f32.mxu1 %v6528_v30 }
 0xccd   :  { %4752 = vmatprep.subr.bf16.mxu1 %v5465_v55  ;;  %4782 = vmatpush1.bf16.msra.mxu0 %v5740_v44 }
 0xcce   :  { %4784 = vmatprep.subr.bf16.mxu0 %v5746_v46  ;;  %2956 = vmatprep.mubr.f32.mxu0 %v6528_v30 }
 0xcd0   :  { %4754 = vmatpush1.bf16.msra.mxu1 %v5487_v62 }
 0xcd1   :  { %4756 = vmatprep.subr.bf16.mxu1 %v5501_v3  ;;  %4786 = vmatpush1.bf16.msra.mxu0 %v5764_v60 }
 0xcd2   :  { %4795 = vmatprep.subr.bf16.mxu0 %v6529_v17 }
 0xcd4   :  { %4758 = vmatpush1.bf16.msra.mxu1 %v5525_v11 }
 0xcd5   :  { %4760 = vmatprep.subr.bf16.mxu1 %v5539_v16 }
 0xcd8   :  { %4762 = vmatpush1.bf16.msra.mxu1 %v5561_v23 }
 0xcd9   :  { %4764 = vmatprep.subr.bf16.mxu1 %v5575_v28 }
 0xcdc   :  { %4766 = vmatpush1.bf16.msra.mxu1 %v5600_v36 }
 0xcdd   :  { %4768 = vmatprep.subr.bf16.mxu1 %v5611_v41 }
 0xce0   :  { %4770 = vmatpush1.bf16.msra.mxu1 %v5633_v52 }
 0xce1   :  { %4772 = vmatprep.subr.bf16.mxu1 %v5647_v58 }
 0xce4   :  { %4774 = vmatpush1.bf16.msra.mxu1 %v5669_v5 }
 0xce5   :  { %4776 = vmatprep.subr.bf16.mxu1 %v5683_v14 }
 0xce8   :  { %4778 = vmatpush1.bf16.msra.mxu1 %v5705_v25 }
 0xce9   :  { %4788 = vmatprep.subr.bf16.mxu1 %v5719_v31 }
 0xceb   :  { %2883 = vmatmul.mubr.f32.vlgmr.msra.gmra.mrb[20].mxu1 %v2666_v21 }
 0xcec   :  { %4790 = vmatpush1.bf16.msra.mxu1 %v5744_v45  ;;  %3027 = vmatprep.mubr.f32.mxu1 %v6528_v30 }
 0xced   :  { %4792 = vmatprep.subr.bf16.mxu1 %v5755_v56 }
 0xcf0   :  { %4794 = vmatpush1.bf16.msra.mxu1 %v5768_v0 }
 0xcf1   :  { %4820 = vmatprep.subr.bf16.mxu1 %v5417_v38 }
 0xd9e   :  { %v2733_v29 = vpop.f32.mrb[18].mxu1 }
 0xd9f   :  { %v2734_v15 = vadd.f32 %v6343_v26, %v2733_v29  ;;  %v3956_v20 = vpop.f32.mrb[19].mxu1 }
 0xda1   :  { %3598 = vst.msk [vmem:[%s6494_s10 + $0xa] sm:$0x3] %vm761_vm2, %v2734_v15  ;;  %2743 = vrot.lane.b32.xlu1 %v2734_v15, %s5143_s19 }
 0xe13   :  { %v2744_v42 = vpop.permute.xlu1 %2743 }
 0xe14   :  { %v2746_v38 = vsel %vm770_vm3, %v2740_v33, %v2744_v42 }
 0xe15   :  { %3134 = vrot.lane.b32.xlu0 %v2746_v38, %s5142_s14  ;;  %3599 = vmatmul.mubr.msk.f32.vlgmr.msra.gmra.mrb[20].mxu0 %vm511_vm0, %v2746_v38  ;;  %s5091_s14 = scalar_lea.vmem %s3540_s30, 32 }
 0xe16   :  { %3600 = vmatmul.mubr.msk.f32.vlgmr.msra.gmra.mrb[20].mxu1 %vm511_vm0, %v2746_v38  ;;  %4797 = vmatpush3.bf16.msra.mxu0 %v5808_v9  ;;  %p5092_p0 = scmp.ne.s32.totalorder %s3540_s30, %s5091_s14  ;;  %p5097_p2 = scmp.lt.s32.totalorder %s5091_s14, %s5091_s14 }
 0xe17   :  { %4822 = vmatpush1.bf16.msra.mxu1 %v5448_v49  ;;  %4798 = vmatprep.subr.bf16.mxu0 %v6529_v17  ;;  %v6570_v49 = vld [vmem:[#allocation10_spill] sm:$0xff] }
 0xe18   :  { %4824 = vmatprep.subr.bf16.mxu1 %v5453_v51  ;;  %3989 = vmatprep.mubr.msk.f32.mxu0 %vm5141_vm1, %v6528_v30  ;;  %v6571_v51 = vld [vmem:[#allocation14_spill] sm:$0xff]  ;;  %p5098_p3 = por %p5097_p2, %p5096_p1 }
 0xe19   :  { %3206 = vmatprep.mubr.f32.mxu1 %v6528_v30 }
 0xe1a   :  { %4800 = vmatpush3.bf16.msra.mxu0 %v5819_v18  ;;  %p5099_p4 = pnand %p5098_p3, %p5092_p0 }
 0xe1b   :  { %4826 = vmatpush1.bf16.msra.mxu1 %v5483_v61  ;;  %4801 = vmatprep.subr.bf16.mxu0 %v6529_v17  ;;  %v6572_v61 = vld [vmem:[#allocation11_spill] sm:$0xff] }
 0xe1c   :  { %4828 = vmatprep.subr.bf16.mxu1 %v5489_v63  ;;  %v6573_v63 = vld [vmem:[#allocation8_spill] sm:$0xff] }
 0xe1e   :  { %4803 = vmatpush3.bf16.msra.mxu0 %v5829_v27 }
 0xe1f   :  { %4830 = vmatpush1.bf16.msra.mxu1 %v5521_v10  ;;  %4804 = vmatprep.subr.bf16.mxu0 %v6529_v17  ;;  %v6574_v10 = vld [vmem:[#allocation12_spill] sm:$0xff] }
 0xe20   :  { %4832 = vmatprep.subr.bf16.mxu1 %v5527_v12 }
 0xe22   :  { %4806 = vmatpush3.bf16.msra.mxu0 %v5839_v32 }
 0xe23   :  { %4834 = vmatpush1.bf16.msra.mxu1 %v5557_v22  ;;  %4807 = vmatprep.subr.bf16.mxu0 %v6529_v17  ;;  %v6575_v22 = vld [vmem:[#allocation15_spill] sm:$0xff] }
 0xe24   :  { %4836 = vmatprep.subr.bf16.mxu1 %v5563_v24 }
 0xe26   :  { %4809 = vmatpush3.bf16.msra.mxu0 %v5849_v39 }
 0xe27   :  { %4838 = vmatpush1.bf16.msra.mxu1 %v5593_v34  ;;  %4810 = vmatprep.subr.bf16.mxu0 %v6529_v17 }
 0xe28   :  { %4840 = vmatprep.subr.bf16.mxu1 %v5602_v37 }
 0xe2a   :  { %4812 = vmatpush3.bf16.msra.mxu0 %v5859_v47 }
 0xe2b   :  { %4842 = vmatpush1.bf16.msra.mxu1 %v5629_v48  ;;  %4813 = vmatprep.subr.bf16.mxu0 %v6529_v17  ;;  %v6576_v48 = vld [vmem:[#allocation16_spill] sm:$0xff] }
 0xe2c   :  { %4844 = vmatprep.subr.bf16.mxu1 %v5635_v53 }
 0xe2e   :  { %4815 = vmatpush3.bf16.msra.mxu0 %v6530_v4 }
 0xe2f   :  { %4846 = vmatpush1.bf16.msra.mxu1 %v6562_v19  ;;  %4816 = vmatprep.subr.bf16.mxu0 %v6529_v17 }
 0xe30   :  { %4848 = vmatprep.subr.bf16.mxu1 %v6570_v49 }
 0xe32   :  { %4818 = vmatpush3.bf16.msra.mxu0 %v6571_v51 }
 0xe33   :  { %4850 = vmatpush1.bf16.msra.mxu1 %v6572_v61  ;;  %4852 = vmatprep.subr.bf16.mxu0 %v6573_v63 }
 0xe34   :  { %4884 = vmatprep.subr.bf16.mxu1 %v6574_v10 }
 0xee8   :  { %v2958_v12 = vpop.f32.mrb[20].mxu0 }
 0xee9   :  { %v3034_v24 = vadd.f32 %v2958_v12, %v6575_v22  ;;  %v3029_v34 = vpop.f32.mrb[20].mxu1  ;;  %v2960_v37 = vpop.f32.mrb[21].mxu0 }
 0xeea   :  { %v3035_v53 = vadd.f32 %v2960_v37, %v6576_v48  ;;  %v3031_v19 = vpop.f32.mrb[21].mxu1  ;;  %v3036_v54 = vadd.f32 %v3029_v34, %v5899_v43 }
 0xeeb   :  { %v3601_v7 = vmul.f32 -1.442695, %v3034_v24  ;;  %v3037_v40 = vadd.f32 %v3031_v19, %v5896_v35 }
 0xeec   :  { %v3602_v57 = vmul.f32 -1.442695, %v3035_v53 }
 0xeed   :  { %5058 = vpow2.f32 %v3601_v7  ;;  %v3603_v2 = vmul.f32 -1.442695, %v3037_v40 }
 0xeee   :  { %5060 = vpow2.f32 %v3602_v57 }
 0xeef   :  { %5062 = vpow2.f32 %v3603_v2 }
 0xef0   :  { %5064 = vtanh.f32 %v3036_v54 }
 0xef7   :  { %v5059_v59 = vpop.eup %5058 }
 0xef8   :  { %v5061_v13 = vpop.eup %5060  ;;  %v3041_v8 = vadd.f32 1.0, %v5059_v59 }
 0xef9   :  { %v3047_v6 = vadd.f32 1.0, %v5061_v13  ;;  %v5063_v21 = vpop.eup %5062 }
 0xefa   :  { %5066 = vrcp.f32 %v3041_v8  ;;  %v5065_v29 = vpop.eup %5064  ;;  %v3054_v42 = vadd.f32 1.0, %v5063_v21 }
 0xefb   :  { %5068 = vrcp.f32 %v3047_v6 }
 0xefc   :  { %5070 = vrcp.f32 %v3054_v42 }
 0xf04   :  { %v5067_v15 = vpop.eup %5066 }
 0xf05   :  { %v5069_v20 = vpop.eup %5068  ;;  %v3058_v33 = vmul.f32 %v5067_v15, %v5065_v29 }
 0xf06   :  { %v3057_v38 = vmul.f32 %v5069_v20, %v6310_v1  ;;  %v5071_v61 = vpop.eup %5070 }
 0xf08   :  { %v6395_v49 = vadd.f32 %v3058_v33, %v3057_v38 }
 0xf0a   :  { %5072 = vtanh.f32 %v6395_v49 }
 0xf14   :  { %v5073_v63 = vpop.eup %5072 }
 0xf15   :  { %v3061_v10 = vmul.f32 %v5073_v63, %v5071_v61 }
 0xf17   :  { %3990 = vmatmul.mubr.f32.vlgmr.msra.gmra.mrb[22].mxu0 %v3061_v10  ;;  %3207 = vmatmul.mubr.f32.vlgmr.msra.gmra.mrb[22].mxu1 %v3061_v10 }
 0xf18   :  { %4854 = vmatpush1.bf16.msra.mxu0 %v5451_v50  ;;  %3277 = vmatprep.mubr.f32.mxu0 %v6528_v30 }
 0xf19   :  { %4856 = vmatprep.subr.bf16.mxu0 %v5465_v55  ;;  %4886 = vmatpush1.bf16.msra.mxu1 %v5740_v44 }
 0xf1a   :  { %4888 = vmatprep.subr.bf16.mxu1 %v5746_v46  ;;  %3351 = vmatprep.mubr.f32.mxu1 %v6528_v30 }
 0xf1c   :  { %4858 = vmatpush1.bf16.msra.mxu0 %v5487_v62 }
 0xf1d   :  { %4860 = vmatprep.subr.bf16.mxu0 %v5501_v3  ;;  %4890 = vmatpush1.bf16.msra.mxu1 %v5764_v60  ;;  %v3135_v3 = vpop.permute.xlu0 %3134 }
 0xf1e   :  { %4899 = vmatprep.subr.bf16.mxu1 %v6529_v17 }
 0xf20   :  { %4862 = vmatpush1.bf16.msra.mxu0 %v5525_v11 }
 0xf21   :  { %4864 = vmatprep.subr.bf16.mxu0 %v5539_v16 }
 0xf24   :  { %4866 = vmatpush1.bf16.msra.mxu0 %v5561_v23 }
 0xf25   :  { %4868 = vmatprep.subr.bf16.mxu0 %v5575_v28 }
 0xf28   :  { %4870 = vmatpush1.bf16.msra.mxu0 %v5600_v36 }
 0xf29   :  { %4872 = vmatprep.subr.bf16.mxu0 %v5611_v41 }
 0xf2c   :  { %4874 = vmatpush1.bf16.msra.mxu0 %v5633_v52 }
 0xf2d   :  { %4876 = vmatprep.subr.bf16.mxu0 %v5647_v58 }
 0xf30   :  { %4878 = vmatpush1.bf16.msra.mxu0 %v5669_v5 }
 0xf31   :  { %4880 = vmatprep.subr.bf16.mxu0 %v5683_v14 }
 0xf34   :  { %4882 = vmatpush1.bf16.msra.mxu0 %v5705_v25 }
 0xf35   :  { %4892 = vmatprep.subr.bf16.mxu0 %v5719_v31 }
 0xf37   :  { %3278 = vmatmul.mubr.f32.vlgmr.msra.gmra.mrb[24].mxu0 %v3061_v10 }
 0xf38   :  { %4894 = vmatpush1.bf16.msra.mxu0 %v5744_v45  ;;  %3422 = vmatprep.mubr.f32.mxu0 %v6528_v30 }
 0xf39   :  { %4896 = vmatprep.subr.bf16.mxu0 %v5755_v56 }
 0xf3c   :  { %4898 = vmatpush1.bf16.msra.mxu0 %v5768_v0 }
 0xfea   :  { %v3128_v50 = vpop.f32.mrb[22].mxu0 }
 0xfeb   :  { %v3129_v55 = vadd.f32 %v6343_v26, %v3128_v50  ;;  %v3991_v62 = vpop.f32.mrb[23].mxu0 }
 0xfed   :  { %3604 = vst.msk [vmem:[%s6494_s10 + $0xc] sm:$0x3] %vm761_vm2, %v3129_v55  ;;  %3138 = vrot.lane.b32.xlu1 %v3129_v55, %s5143_s19 }
0x105f   :  { %v3139_v11 = vpop.permute.xlu1 %3138 }
0x1060   :  { %v3141_v16 = vsel %vm770_vm3, %v3135_v3, %v3139_v11 }
0x1061   :  { %3605 = vmatmul.mubr.msk.f32.vlgmr.msra.gmra.mrb[22].mxu1 %vm511_vm0, %v3141_v16  ;;  %3606 = vmatmul.mubr.msk.f32.vlgmr.msra.gmra.mrb[24].mxu0 %vm511_vm0, %v3141_v16 }
0x1062   :  { %4901 = vmatpush3.bf16.msra.mxu1 %v5808_v9  ;;  %4024 = vmatprep.mubr.msk.f32.mxu1 %vm5141_vm1, %v6528_v30 }
0x1063   :  { %4902 = vmatprep.subr.bf16.mxu1 %v6529_v17 }
0x1066   :  { %4904 = vmatpush3.bf16.msra.mxu1 %v5819_v18 }
0x1067   :  { %4905 = vmatprep.subr.bf16.mxu1 %v6529_v17 }
0x106a   :  { %4907 = vmatpush3.bf16.msra.mxu1 %v5829_v27 }
0x106b   :  { %4908 = vmatprep.subr.bf16.mxu1 %v6529_v17 }
0x106e   :  { %4910 = vmatpush3.bf16.msra.mxu1 %v5839_v32 }
0x106f   :  { %4911 = vmatprep.subr.bf16.mxu1 %v6529_v17 }
0x1072   :  { %4913 = vmatpush3.bf16.msra.mxu1 %v5849_v39 }
0x1073   :  { %4914 = vmatprep.subr.bf16.mxu1 %v6529_v17 }
0x1076   :  { %4916 = vmatpush3.bf16.msra.mxu1 %v5859_v47 }
0x1077   :  { %4917 = vmatprep.subr.bf16.mxu1 %v6529_v17 }
0x107a   :  { %4919 = vmatpush3.bf16.msra.mxu1 %v6530_v4 }
0x107b   :  { %4920 = vmatprep.subr.bf16.mxu1 %v6529_v17 }
0x107e   :  { %4922 = vmatpush3.bf16.msra.mxu1 %v6571_v51 }
0x1134   :  { %v3353_v23 = vpop.f32.mrb[22].mxu1  ;;  %v3424_v28 = vpop.f32.mrb[24].mxu0 }
0x1135   :  { %v3429_v36 = vadd.f32 %v3353_v23, %v6575_v22  ;;  %v3355_v41 = vpop.f32.mrb[23].mxu1  ;;  %v3426_v52 = vpop.f32.mrb[25].mxu0  ;;  %v3431_v44 = vadd.f32 %v3424_v28, %v5899_v43 }
0x1136   :  { %v3430_v58 = vadd.f32 %v3355_v41, %v6576_v48  ;;  %v3432_v25 = vadd.f32 %v3426_v52, %v5896_v35 }
0x1137   :  { %v3607_v5 = vmul.f32 -1.442695, %v3429_v36 }
0x1138   :  { %v3608_v14 = vmul.f32 -1.442695, %v3430_v58  ;;  %v3609_v31 = vmul.f32 -1.442695, %v3432_v25 }
0x1139   :  { %5074 = vpow2.f32 %v3607_v5 }
0x113a   :  { %5076 = vpow2.f32 %v3608_v14 }
0x113b   :  { %5078 = vpow2.f32 %v3609_v31 }
0x113c   :  { %5080 = vtanh.f32 %v3431_v44 }
0x1143   :  { %v5075_v45 = vpop.eup %5074 }
0x1144   :  { %v5077_v46 = vpop.eup %5076  ;;  %v3436_v56 = vadd.f32 1.0, %v5075_v45 }
0x1145   :  { %v3442_v60 = vadd.f32 1.0, %v5077_v46  ;;  %v5079_v0 = vpop.eup %5078 }
0x1146   :  { %5082 = vrcp.f32 %v3436_v56  ;;  %v5081_v9 = vpop.eup %5080  ;;  %v3449_v39 = vadd.f32 1.0, %v5079_v0 }
0x1147   :  { %5084 = vrcp.f32 %v3442_v60 }
0x1148   :  { %5086 = vrcp.f32 %v3449_v39 }
0x1150   :  { %v5083_v18 = vpop.eup %5082 }
0x1151   :  { %v5085_v27 = vpop.eup %5084  ;;  %v3453_v32 = vmul.f32 %v5083_v18, %v5081_v9 }
0x1152   :  { %v3452_v47 = vmul.f32 %v5085_v27, %v6395_v49  ;;  %v5087_v43 = vpop.eup %5086 }
0x1154   :  { %v3454_v35 = vadd.f32 %v3453_v32, %v3452_v47 }
0x1156   :  { %3530 = vst [vmem:[#allocation4] sm:$0x3] %v3454_v35  ;;  %5088 = vtanh.f32 %v3454_v35 }
0x1160   :  { %v5089_v30 = vpop.eup %5088 }
0x1161   :  { %v3456_v17 = vmul.f32 %v5089_v30, %v5087_v43 }
0x1163   :  { %4025 = vmatmul.mubr.f32.vlgmr.msra.gmra.mrb[24].mxu1 %v3456_v17  ;;  %3529 = vst [vmem:[#allocation2] sm:$0x3] %v3456_v17 }
0x1164   :  { %5102 = shalt.err (!%p5099_p4)
}
0x1165   :  { %s5103_s7 = scalar_lea.hbm %s6495_s11, 32 }
0x1166   :  { %p5104_p5 = scmp.ne.s32.totalorder %s6495_s11, %s5103_s7  ;;  %p5107_p6 = scmp.lt.u32.totalorder %s5103_s7, %s6495_s11 }
0x1168   :  { %p5109_p7 = pnand %p5107_p6, %p5104_p5 }
0x116a   :  { %5112 = shalt.err (!%p5109_p7)
}
0x116b   :  { %3542 = dma.vmem_to_hbm [thread:$0]  %s3540_s30, 32, %s6495_s11, [#allocation3]  }
0x116c   :  { %s5113_s20 = scalar_lea.vmem %s3550_s13, 32  ;;  %p5118_p9 = scmp.lt.s32.totalorder %s3550_s13, %s3550_s13 }
0x116d   :  { %p5114_p8 = scmp.ne.s32.totalorder %s3550_s13, %s5113_s20  ;;  %p5119_p10 = scmp.lt.s32.totalorder %s5113_s20, %s5113_s20 }
0x116f   :  { %p5120_p11 = por %p5119_p10, %p5118_p9 }
0x1171   :  { %p5121_p12 = pnand %p5120_p11, %p5114_p8 }
0x1173   :  { %5124 = shalt.err (!%p5121_p12)
}
0x1174   :  { %s5125_s2 = scalar_lea.hbm %s6496_s12, 32 }
0x1175   :  { %p5126_p13 = scmp.ne.s32.totalorder %s6496_s12, %s5125_s2  ;;  %p5129_p0 = scmp.lt.u32.totalorder %s5125_s2, %s6496_s12 }
0x1177   :  { %p5131_p1 = pnand %p5129_p0, %p5126_p13 }
0x1179   :  { %5134 = shalt.err (!%p5131_p1)
}
0x117a   :  { %3552 = dma.vmem_to_hbm [thread:$0]  %s3550_s13, 32, %s6496_s12, [#allocation5]  }
0x1236   :  { %v3523_v4 = vpop.f32.mrb[24].mxu1 }
0x1237   :  { %v3524_v1 = vadd.f32 %v6343_v26, %v3523_v4  ;;  %v4026_v51 = vpop.f32.mrb[25].mxu1 }
0x1239   :  { %3610 = vst.msk [vmem:[%s6494_s10 + $0xe] sm:$0x3] %vm761_vm2, %v3524_v1 }
0x123a   :  { %5135 = dma.done.wait [#allocation3], 32  }
0x123b   :  { %5136 = vsyncadd [#allocation3], 4294967264 }
0x123c   :  { %5137 = dma.done.wait [#allocation5], 32  }
0x123d   :  { %5138 = vsyncadd [#allocation5], 4294967264 }
0x123e   :  { %3561 = vsyncpa [#allocation3], 1 }
0x123f   :  { %3562 = vsyncpa [#allocation5], 1 }

</bundles_post_ra>
